<compile_context>
chip_gen: v6e
topology: v6e:2x2x1
jax: 0.10.0
libtpu: 0.0.40
codegen_flags: <defaults>
</compile_context>

<pallas_src>
import functools
import math

import jax
import jax.numpy as jnp
from jax import lax
from jax.experimental import pallas as pl
from jax.experimental.pallas import tpu as pltpu


_STATIC_UNROLL_MAX_STEPS = 16


# ---------------------------------------------------------------------------
# Fused kernel: height max-pool + 2-layer LSTM + final Linear.
#   feat_ref : (bt, C, Himg*W)  NCHW with (H, W) merged (free metadata reshape)
#   wih0     : (C, 4H)   whh0: (H, 4H)   b0: (1, 4H)   (b_ih + b_hh, f32)
#   wih1     : (H, 4H)   whh1: (H, 4H)   b1: (1, 4H)
#   wlin     : (H, H)    blin: (1, H)
#   out_ref  : (bt, H)
#   xw_ref   : VMEM scratch (W, bt, 4H) - hoisted input projection, reused by both layers
#   h0_seq_ref: VMEM scratch (W, bt, H) - layer-0 hidden sequence
# PyTorch LSTM gate order: i, f, g, o.
# ---------------------------------------------------------------------------
def _sar_encoder_kernel(feat_ref, wih0_ref, whh0_ref, b0_ref,
                        wih1_ref, whh1_ref, b1_ref,
                        wlin_ref, blin_ref,
                        out_ref, xw_ref, h0_seq_ref, *, h_img):
    bt, c_in, hw = feat_ref.shape
    seq_w = hw // h_img
    hid = whh0_ref.shape[0]
    f32 = jnp.float32
    w_dtype = wih0_ref.dtype

    # ---- (1) height max-pool in the native (bt, C, Himg*W) layout ----------
    # Lane-axis slices + VPU max: the un-pooled feature map is never relayouted.
    pooled = feat_ref[:, :, 0:seq_w]
    for h in range(1, h_img):
        pooled = jnp.maximum(pooled, feat_ref[:, :, h * seq_w:(h + 1) * seq_w])
    # pooled: (bt, C, W)

    # ---- (2) minor-dim swap of the (Himg-x smaller) pooled map only --------
    x_bwc = jnp.transpose(pooled, (0, 2, 1))                  # (bt, W, C)
    x2d = x_bwc.reshape(bt * seq_w, c_in).astype(w_dtype)     # batch-major rows

    # ---- (3) hoisted layer-0 input projection -> scratch (W, bt, 4H) -------
    # One big MXU matmul; the one-time reorder to time-major happens here (off
    # the serial critical path) so every recurrent step reads a leading-dim slice.
    xw0 = jnp.dot(x2d, wih0_ref[...], preferred_element_type=f32)
    xw0 = (xw0 + b0_ref[...].astype(f32)).reshape(bt, seq_w, 4 * hid)
    for w in range(seq_w):
        xw_ref[w] = xw0[:, w, :].astype(xw_ref.dtype)

    def gate_update(gates, c):
        i_g = jax.nn.sigmoid(gates[:, 0 * hid:1 * hid])
        f_g = jax.nn.sigmoid(gates[:, 1 * hid:2 * hid])
        g_g = jnp.tanh(gates[:, 2 * hid:3 * hid])
        o_g = jax.nn.sigmoid(gates[:, 3 * hid:4 * hid])
        c_new = f_g * c + i_g * g_g
        return o_g * jnp.tanh(c_new), c_new

    def run_layer(whh_ref, store_hidden):
        whh = whh_ref[...]

        def step(t, h, c):
            # Per-step critical path: one (bt, H) @ (H, 4H) matmul + gate math.
            g = xw_ref[t].astype(f32) + jnp.dot(h.astype(whh.dtype), whh,
                                                preferred_element_type=f32)
            h_new, c_new = gate_update(g, c)
            if store_hidden:
                h0_seq_ref[t] = h_new.astype(h0_seq_ref.dtype)
            return h_new, c_new

        h = jnp.zeros((bt, hid), f32)
        c = jnp.zeros((bt, hid), f32)
        if seq_w <= _STATIC_UNROLL_MAX_STEPS:
            for t in range(seq_w):
                h, c = step(t, h, c)
        else:
            def body(t, carry):
                return step(t, carry[0], carry[1])
            h, c = lax.fori_loop(0, seq_w, body, (h, c), unroll=2)
        return h

    # ---- (4) layer-0 recurrence (hidden sequence stashed in VMEM scratch) ---
    run_layer(whh0_ref, store_hidden=True)

    # ---- (5) hoisted layer-1 input projection over the whole h0 sequence ----
    h0_all = h0_seq_ref[...].reshape(seq_w * bt, hid)
    xw1 = jnp.dot(h0_all, wih1_ref[...], preferred_element_type=f32)
    xw1 = xw1 + b1_ref[...].astype(f32)
    xw_ref[...] = xw1.reshape(seq_w, bt, 4 * hid).astype(xw_ref.dtype)

    # ---- (6) layer-1 recurrence ---------------------------------------------
    h1 = run_layer(whh1_ref, store_hidden=False)

    # ---- (7) final Linear on the last time step ------------------------------
    out = jnp.dot(h1.astype(wlin_ref.dtype), wlin_ref[...],
                  preferred_element_type=f32)
    out_ref[...] = (out + blin_ref[...].astype(f32)).astype(out_ref.dtype)


# ---------------------------------------------------------------------------
# VMEM footprint estimate (last dim padded to 128 lanes, 2nd-last to sublanes).
# ---------------------------------------------------------------------------
def _padded_bytes(shape, dtype):
    itemsize = jnp.dtype(dtype).itemsize
    dims = list(shape) if len(shape) >= 2 else [1] + list(shape)
    sub = max(8, 32 // itemsize)              # 8 for f32, 16 for bf16
    dims[-1] = -(-int(dims[-1]) // 128) * 128
    dims[-2] = -(-int(dims[-2]) // sub) * sub
    n = 1
    for d in dims:
        n *= int(d)
    return n * itemsize


# ---------------------------------------------------------------------------
# Wrapper: specs, VMEM budget, cost estimate, optional batch sharding.
# ---------------------------------------------------------------------------
@functools.partial(jax.jit, static_argnames=("num_batch_shards", "vmem_limit_bytes"))
def sar_encoder_forward(feat_nchw, params, *, num_batch_shards=1,
                        vmem_limit_bytes=None):
    B, C, Himg, W = feat_nchw.shape
    H = params["whh0"].shape[0]
    w_dtype = params["whh0"].dtype

    # Free metadata reshape: merge the trailing (Himg, W) dims of the NCHW tensor;
    # no XLA-side transpose / extra HBM pass of the feature map.
    feat = feat_nchw.reshape(B, C, Himg * W)

    # Batch sharding is a VMEM-fit / v7x-megacore measure, not a speedup knob:
    # the per-step recurrent matmul is weight-streaming bound, so keep the whole
    # batch in one block unless the feature block does not fit per-core VMEM.
    shards = max(1, min(int(num_batch_shards), B))
    while shards > 1 and not (B % shards == 0 and (B // shards) % 8 == 0):
        shards -= 1
    bt = B // shards

    # Weights are resident, single-buffered, whole-array VMEM operands.
    vmem_resident = pl.BlockSpec(memory_space=pltpu.MemorySpace.VMEM)
    weight_keys = ("wih0", "whh0", "b0", "wih1", "whh1", "b1", "wlin", "blin")
    weight_specs = [vmem_resident] * len(weight_keys)

    if shards == 1:
        feat_spec = vmem_resident             # single buffer; grid has one step
    else:
        feat_spec = pl.BlockSpec((bt, C, Himg * W), lambda b: (b, 0, 0))

    grid_spec = pltpu.PrefetchScalarGridSpec(
        num_scalar_prefetch=0,
        grid=(shards,),
        in_specs=[feat_spec] + weight_specs,
        out_specs=pl.BlockSpec((bt, H), lambda b: (b, 0)),
        scratch_shapes=[
            pltpu.VMEM((W, bt, 4 * H), w_dtype),   # hoisted projections (reused)
            pltpu.VMEM((W, bt, H), w_dtype),       # layer-0 hidden sequence
        ],
    )

    # ---- explicit VMEM budget (default scoped limits are only 16/32 MiB) ----
    if vmem_limit_bytes is None:
        wbytes = sum(_padded_bytes(params[k].shape, params[k].dtype)
                     for k in weight_keys)
        feat_bytes = _padded_bytes((bt, C, Himg * W), feat_nchw.dtype)
        feat_bytes *= 2 if shards > 1 else 1       # double-buffered only if blocked
        scratch_bytes = (_padded_bytes((W, bt, 4 * H), w_dtype)
                         + _padded_bytes((W, bt, H), w_dtype))
        interm_bytes = (3 * _padded_bytes((bt, C, W), jnp.float32)
                        + _padded_bytes((bt * W, C), jnp.float32)
                        + 2 * _padded_bytes((bt * W, 4 * H), jnp.float32))
        out_bytes = 2 * _padded_bytes((bt, H), jnp.float32)
        est = wbytes + feat_bytes + scratch_bytes + interm_bytes + out_bytes
        vmem_limit_bytes = max(int(est * 1.5) + (8 << 20), 32 << 20)

    # ---- advisory cost estimate so XLA overlaps the feat DMA ramp-up --------
    flops = (2 * B * W * C * 4 * H            # layer-0 input projection
             + 2 * B * W * H * 4 * H          # layer-1 input projection
             + 2 * 2 * B * W * H * 4 * H      # recurrent matmuls (2 layers)
             + 2 * B * H * H                  # final linear
             + B * C * W * Himg)              # height max-pool
    transcendentals = 2 * W * 5 * B * H       # 3 sigmoid + 2 tanh per step/layer
    bytes_accessed = (int(feat_nchw.size) * feat_nchw.dtype.itemsize
                      + sum(int(params[k].size) * params[k].dtype.itemsize
                            for k in weight_keys)
                      + B * H * 4)

    return pl.pallas_call(
        functools.partial(_sar_encoder_kernel, h_img=Himg),
        out_shape=jax.ShapeDtypeStruct((B, H), jnp.float32),
        grid_spec=grid_spec,
        compiler_params=pltpu.CompilerParams(
            dimension_semantics=("parallel",),
            vmem_limit_bytes=int(vmem_limit_bytes)),
        cost_estimate=pl.CostEstimate(flops=int(flops),
                                      transcendentals=int(transcendentals),
                                      bytes_accessed=int(bytes_accessed)),
    )(feat, *(params[k] for k in weight_keys))


# ---------------------------------------------------------------------------
# Deterministic parameter init (nn.LSTM / nn.Linear shapes).  Matrices are
# stored pre-transposed as (in_dim, out_dim); biases stay f32.  bf16 storage
# (the default) is the MXU-native path on v5e/v6e/v7x; use dtype=jnp.float32
# for bit-tighter agreement with the PyTorch f32 reference.
# ---------------------------------------------------------------------------
def init_params(key, in_channels, d_enc, dtype=jnp.bfloat16):
    H = d_enc
    ks = jax.random.split(key, 10)
    scale = 1.0 / math.sqrt(H)

    def rnd(k, shape):
        return jax.random.uniform(k, shape, jnp.float32, -1.0, 1.0) * scale

    wih0 = rnd(ks[0], (4 * H, in_channels)).T.astype(dtype)
    whh0 = rnd(ks[1], (4 * H, H)).T.astype(dtype)
    b0 = (rnd(ks[2], (4 * H,)) + rnd(ks[3], (4 * H,))).reshape(1, 4 * H)
    wih1 = rnd(ks[4], (4 * H, H)).T.astype(dtype)
    whh1 = rnd(ks[5], (4 * H, H)).T.astype(dtype)
    b1 = (rnd(ks[6], (4 * H,)) + rnd(ks[7], (4 * H,))).reshape(1, 4 * H)
    wlin = rnd(ks[8], (H, H)).T.astype(dtype)
    blin = rnd(ks[9], (H,)).reshape(1, H)
    return dict(wih0=wih0, whh0=whh0, b0=b0,
                wih1=wih1, whh1=whh1, b1=b1,
                wlin=wlin, blin=blin)


# ---------------------------------------------------------------------------
# Pure-JAX reference (mirrors the PyTorch forward) for correctness checks.
# ---------------------------------------------------------------------------
def sar_encoder_reference(feat_nchw, params):
    hi = jax.lax.Precision.HIGHEST
    p = {k: v.astype(jnp.float32) for k, v in params.items()}
    pooled = jnp.max(feat_nchw, axis=2)                 # (B, C, W)
    x = jnp.transpose(pooled, (0, 2, 1))                # (B, W, C)
    B, W, _ = x.shape
    H = p["whh0"].shape[0]

    def cell(x_t, h, c, wih, whh, b):
        g = jnp.dot(x_t, wih, precision=hi) + jnp.dot(h, whh, precision=hi) + b
        i = jax.nn.sigmoid(g[:, 0 * H:1 * H])
        f = jax.nn.sigmoid(g[:, 1 * H:2 * H])
        gg = jnp.tanh(g[:, 2 * H:3 * H])
        o = jax.nn.sigmoid(g[:, 3 * H:4 * H])
        c = f * c + i * gg
        return o * jnp.tanh(c), c

    h0 = c0 = h1 = c1 = jnp.zeros((B, H), jnp.float32)
    for t in range(W):
        h0, c0 = cell(x[:, t, :], h0, c0, p["wih0"], p["whh0"], p["b0"])
        h1, c1 = cell(h0, h1, c1, p["wih1"], p["whh1"], p["b1"])
    return jnp.dot(h1, p["wlin"], precision=hi) + p["blin"]


if __name__ == "__main__":
    # Small but lane-aligned shapes: in_channels = d_enc = 128 (production is 512).
    B, C, Himg, W = 2, 128, 4, 8
    d_enc = 128

    key = jax.random.PRNGKey(0)
    k_feat, k_par, k_feat2 = jax.random.split(key, 3)
    feat = jax.random.normal(k_feat, (B, C, Himg, W), jnp.float32)

    # --- run 1: f32 params, single shard (matches PyTorch numerics) ---------
    params_f32 = init_params(k_par, C, d_enc, dtype=jnp.float32)
    out = sar_encoder_forward(feat, params_f32)
    jax.block_until_ready(out)
    assert out.shape == (B, d_enc)

    ref = sar_encoder_reference(feat, params_f32)
    err = float(jnp.max(jnp.abs(out - ref)))
    # With exact f32 MXU passes the observed error is ~1e-6; the bound keeps
    # margin in case the lowering picks a reduced-precision f32 matmul mode,
    # while still catching any gate-order / slicing / layout bug (those are O(0.1+)).
    assert err < 2e-2, f"kernel/reference mismatch (f32): max abs err = {err}"

    # --- run 2: default bf16 weights + 2-way sharded grid (VMEM-fit / v7x
    #     megacore path; just 2 sequential grid steps on single-TC chips) -----
    B2 = 16
    feat2 = jax.random.normal(k_feat2, (B2, C, Himg, W), jnp.float32)
    params_bf16 = init_params(k_par, C, d_enc)          # bf16 default
    out2 = sar_encoder_forward(feat2, params_bf16, num_batch_shards=2)
    jax.block_until_ready(out2)
    assert out2.shape == (B2, d_enc)
    assert bool(jnp.all(jnp.isfinite(out2)))
    ref2 = sar_encoder_reference(feat2, params_bf16)
    err2 = float(jnp.max(jnp.abs(out2 - ref2)))
    assert err2 < 0.2, f"kernel/reference mismatch (bf16 storage): max abs err = {err2}"

    print("KERNEL_OK")
</pallas_src>

<mosaic_0001>
module attributes {stable_mosaic.version = 11 : i64} {
  func.func @_sar_encoder_kernel(%arg0: i32, %arg1: memref<2x128x32xf32, #tpu.memory_space<vmem>>, %arg2: memref<128x512xf32, #tpu.memory_space<vmem>>, %arg3: memref<128x512xf32, #tpu.memory_space<vmem>>, %arg4: memref<1x512xf32, #tpu.memory_space<vmem>>, %arg5: memref<128x512xf32, #tpu.memory_space<vmem>>, %arg6: memref<128x512xf32, #tpu.memory_space<vmem>>, %arg7: memref<1x512xf32, #tpu.memory_space<vmem>>, %arg8: memref<128x128xf32, #tpu.memory_space<vmem>>, %arg9: memref<1x128xf32, #tpu.memory_space<vmem>>, %arg10: memref<2x128xf32, #tpu.memory_space<vmem>>, %arg11: memref<8x2x512xf32, #tpu.memory_space<vmem>>, %arg12: memref<8x2x128xf32, #tpu.memory_space<vmem>>) attributes {dimension_semantics = [#tpu.dimension_semantics<parallel>], iteration_bounds = array<i64: 1>, scalar_prefetch = 0 : i64, scratch_operands = 2 : i64, tpu.core_type = #tpu.core_type<tc>, window_params = [{pipeline_mode = #tpu.pipeline_mode<synchronous>, transform_indices = @transform_0, window_bounds = array<i64: 2, 128, 32>}, {pipeline_mode = #tpu.pipeline_mode<synchronous>, transform_indices = @transform_1, window_bounds = array<i64: 128, 512>}, {pipeline_mode = #tpu.pipeline_mode<synchronous>, transform_indices = @transform_2, window_bounds = array<i64: 128, 512>}, {pipeline_mode = #tpu.pipeline_mode<synchronous>, transform_indices = @transform_3, window_bounds = array<i64: 1, 512>}, {pipeline_mode = #tpu.pipeline_mode<synchronous>, transform_indices = @transform_4, window_bounds = array<i64: 128, 512>}, {pipeline_mode = #tpu.pipeline_mode<synchronous>, transform_indices = @transform_5, window_bounds = array<i64: 128, 512>}, {pipeline_mode = #tpu.pipeline_mode<synchronous>, transform_indices = @transform_6, window_bounds = array<i64: 1, 512>}, {pipeline_mode = #tpu.pipeline_mode<synchronous>, transform_indices = @transform_7, window_bounds = array<i64: 128, 128>}, {pipeline_mode = #tpu.pipeline_mode<synchronous>, transform_indices = @transform_8, window_bounds = array<i64: 1, 128>}, {transform_indices = @transform_9, window_bounds = array<i64: 2, 128>}]} {
    %c0 = arith.constant 0 : index
    %c0_0 = arith.constant 0 : index
    %c0_1 = arith.constant 0 : index
    %0 = vector.load %arg1[%c0, %c0_0, %c0_1] : memref<2x128x32xf32, #tpu.memory_space<vmem>>, vector<2x128x8xf32>
    %c0_2 = arith.constant 0 : index
    %c0_3 = arith.constant 0 : index
    %c8 = arith.constant 8 : index
    %1 = vector.load %arg1[%c0_2, %c0_3, %c8] : memref<2x128x32xf32, #tpu.memory_space<vmem>>, vector<2x128x8xf32>
    %2 = arith.maximumf %0, %1 : vector<2x128x8xf32>
    %c0_4 = arith.constant 0 : index
    %c0_5 = arith.constant 0 : index
    %c16 = arith.constant 16 : index
    %3 = vector.load %arg1[%c0_4, %c0_5, %c16] : memref<2x128x32xf32, #tpu.memory_space<vmem>>, vector<2x128x8xf32>
    %4 = arith.maximumf %2, %3 : vector<2x128x8xf32>
    %c0_6 = arith.constant 0 : index
    %c0_7 = arith.constant 0 : index
    %c24 = arith.constant 24 : index
    %5 = vector.load %arg1[%c0_6, %c0_7, %c24] : memref<2x128x32xf32, #tpu.memory_space<vmem>>, vector<2x128x8xf32>
    %6 = arith.maximumf %4, %5 : vector<2x128x8xf32>
    %7 = tpu.transpose %6, [0, 2, 1] : vector<2x128x8xf32> -> vector<2x8x128xf32>
    %8 = vector.shape_cast %7 : vector<2x8x128xf32> to vector<16x128xf32>
    %c0_8 = arith.constant 0 : index
    %c0_9 = arith.constant 0 : index
    %9 = vector.load %arg2[%c0_8, %c0_9] : memref<128x512xf32, #tpu.memory_space<vmem>>, vector<128x512xf32>
    %cst = arith.constant dense<0.000000e+00> : vector<16x512xf32>
    %10 = tpu.matmul %8, %9, %cst {dimension_numbers = #tpu.dot_dimension_numbers<[1], [0], [0], [1], [0, 0, 1, 1], [], []>} : vector<16x128xf32>, vector<128x512xf32>, vector<16x512xf32> -> vector<16x512xf32>
    %c0_10 = arith.constant 0 : index
    %c0_11 = arith.constant 0 : index
    %11 = vector.load %arg4[%c0_10, %c0_11] : memref<1x512xf32, #tpu.memory_space<vmem>>, vector<1x512xf32>
    %12 = vector.broadcast %11 : vector<1x512xf32> to vector<16x512xf32>
    %13 = arith.addf %10, %12 : vector<16x512xf32>
    %14 = vector.shape_cast %13 : vector<16x512xf32> to vector<2x8x512xf32>
    %15 = vector.extract_strided_slice %14 {offsets = [0, 0, 0], sizes = [2, 1, 512], strides = [1, 1, 1]} : vector<2x8x512xf32> to vector<2x1x512xf32>
    %16 = vector.shape_cast %15 : vector<2x1x512xf32> to vector<2x512xf32>
    %c0_12 = arith.constant 0 : index
    %c0_13 = arith.constant 0 : index
    %c0_14 = arith.constant 0 : index
    %17 = vector.load %arg11[%c0_12, %c0_13, %c0_14] : memref<8x2x512xf32, #tpu.memory_space<vmem>>, vector<1x2x512xf32>
    %18 = vector.shape_cast %17 : vector<1x2x512xf32> to vector<2x512xf32>
    %19 = vector.shape_cast %16 : vector<2x512xf32> to vector<1x2x512xf32>
    tpu.vector_store %arg11[%c0_12, %c0_13, %c0_14], %19 {strides = array<i32>} : memref<8x2x512xf32, #tpu.memory_space<vmem>>, vector<1x2x512xf32>,
    %20 = vector.extract_strided_slice %14 {offsets = [0, 1, 0], sizes = [2, 1, 512], strides = [1, 1, 1]} : vector<2x8x512xf32> to vector<2x1x512xf32>
    %21 = vector.shape_cast %20 : vector<2x1x512xf32> to vector<2x512xf32>
    %c1 = arith.constant 1 : index
    %c0_15 = arith.constant 0 : index
    %c0_16 = arith.constant 0 : index
    %22 = vector.load %arg11[%c1, %c0_15, %c0_16] : memref<8x2x512xf32, #tpu.memory_space<vmem>>, vector<1x2x512xf32>
    %23 = vector.shape_cast %22 : vector<1x2x512xf32> to vector<2x512xf32>
    %24 = vector.shape_cast %21 : vector<2x512xf32> to vector<1x2x512xf32>
    tpu.vector_store %arg11[%c1, %c0_15, %c0_16], %24 {strides = array<i32>} : memref<8x2x512xf32, #tpu.memory_space<vmem>>, vector<1x2x512xf32>,
    %25 = vector.extract_strided_slice %14 {offsets = [0, 2, 0], sizes = [2, 1, 512], strides = [1, 1, 1]} : vector<2x8x512xf32> to vector<2x1x512xf32>
    %26 = vector.shape_cast %25 : vector<2x1x512xf32> to vector<2x512xf32>
    %c2 = arith.constant 2 : index
    %c0_17 = arith.constant 0 : index
    %c0_18 = arith.constant 0 : index
    %27 = vector.load %arg11[%c2, %c0_17, %c0_18] : memref<8x2x512xf32, #tpu.memory_space<vmem>>, vector<1x2x512xf32>
    %28 = vector.shape_cast %27 : vector<1x2x512xf32> to vector<2x512xf32>
    %29 = vector.shape_cast %26 : vector<2x512xf32> to vector<1x2x512xf32>
    tpu.vector_store %arg11[%c2, %c0_17, %c0_18], %29 {strides = array<i32>} : memref<8x2x512xf32, #tpu.memory_space<vmem>>, vector<1x2x512xf32>,
    %30 = vector.extract_strided_slice %14 {offsets = [0, 3, 0], sizes = [2, 1, 512], strides = [1, 1, 1]} : vector<2x8x512xf32> to vector<2x1x512xf32>
    %31 = vector.shape_cast %30 : vector<2x1x512xf32> to vector<2x512xf32>
    %c3 = arith.constant 3 : index
    %c0_19 = arith.constant 0 : index
    %c0_20 = arith.constant 0 : index
    %32 = vector.load %arg11[%c3, %c0_19, %c0_20] : memref<8x2x512xf32, #tpu.memory_space<vmem>>, vector<1x2x512xf32>
    %33 = vector.shape_cast %32 : vector<1x2x512xf32> to vector<2x512xf32>
    %34 = vector.shape_cast %31 : vector<2x512xf32> to vector<1x2x512xf32>
    tpu.vector_store %arg11[%c3, %c0_19, %c0_20], %34 {strides = array<i32>} : memref<8x2x512xf32, #tpu.memory_space<vmem>>, vector<1x2x512xf32>,
    %35 = vector.extract_strided_slice %14 {offsets = [0, 4, 0], sizes = [2, 1, 512], strides = [1, 1, 1]} : vector<2x8x512xf32> to vector<2x1x512xf32>
    %36 = vector.shape_cast %35 : vector<2x1x512xf32> to vector<2x512xf32>
    %c4 = arith.constant 4 : index
    %c0_21 = arith.constant 0 : index
    %c0_22 = arith.constant 0 : index
    %37 = vector.load %arg11[%c4, %c0_21, %c0_22] : memref<8x2x512xf32, #tpu.memory_space<vmem>>, vector<1x2x512xf32>
    %38 = vector.shape_cast %37 : vector<1x2x512xf32> to vector<2x512xf32>
    %39 = vector.shape_cast %36 : vector<2x512xf32> to vector<1x2x512xf32>
    tpu.vector_store %arg11[%c4, %c0_21, %c0_22], %39 {strides = array<i32>} : memref<8x2x512xf32, #tpu.memory_space<vmem>>, vector<1x2x512xf32>,
    %40 = vector.extract_strided_slice %14 {offsets = [0, 5, 0], sizes = [2, 1, 512], strides = [1, 1, 1]} : vector<2x8x512xf32> to vector<2x1x512xf32>
    %41 = vector.shape_cast %40 : vector<2x1x512xf32> to vector<2x512xf32>
    %c5 = arith.constant 5 : index
    %c0_23 = arith.constant 0 : index
    %c0_24 = arith.constant 0 : index
    %42 = vector.load %arg11[%c5, %c0_23, %c0_24] : memref<8x2x512xf32, #tpu.memory_space<vmem>>, vector<1x2x512xf32>
    %43 = vector.shape_cast %42 : vector<1x2x512xf32> to vector<2x512xf32>
    %44 = vector.shape_cast %41 : vector<2x512xf32> to vector<1x2x512xf32>
    tpu.vector_store %arg11[%c5, %c0_23, %c0_24], %44 {strides = array<i32>} : memref<8x2x512xf32, #tpu.memory_space<vmem>>, vector<1x2x512xf32>,
    %45 = vector.extract_strided_slice %14 {offsets = [0, 6, 0], sizes = [2, 1, 512], strides = [1, 1, 1]} : vector<2x8x512xf32> to vector<2x1x512xf32>
    %46 = vector.shape_cast %45 : vector<2x1x512xf32> to vector<2x512xf32>
    %c6 = arith.constant 6 : index
    %c0_25 = arith.constant 0 : index
    %c0_26 = arith.constant 0 : index
    %47 = vector.load %arg11[%c6, %c0_25, %c0_26] : memref<8x2x512xf32, #tpu.memory_space<vmem>>, vector<1x2x512xf32>
    %48 = vector.shape_cast %47 : vector<1x2x512xf32> to vector<2x512xf32>
    %49 = vector.shape_cast %46 : vector<2x512xf32> to vector<1x2x512xf32>
    tpu.vector_store %arg11[%c6, %c0_25, %c0_26], %49 {strides = array<i32>} : memref<8x2x512xf32, #tpu.memory_space<vmem>>, vector<1x2x512xf32>,
    %50 = vector.extract_strided_slice %14 {offsets = [0, 7, 0], sizes = [2, 1, 512], strides = [1, 1, 1]} : vector<2x8x512xf32> to vector<2x1x512xf32>
    %51 = vector.shape_cast %50 : vector<2x1x512xf32> to vector<2x512xf32>
    %c7 = arith.constant 7 : index
    %c0_27 = arith.constant 0 : index
    %c0_28 = arith.constant 0 : index
    %52 = vector.load %arg11[%c7, %c0_27, %c0_28] : memref<8x2x512xf32, #tpu.memory_space<vmem>>, vector<1x2x512xf32>
    %53 = vector.shape_cast %52 : vector<1x2x512xf32> to vector<2x512xf32>
    %54 = vector.shape_cast %51 : vector<2x512xf32> to vector<1x2x512xf32>
    tpu.vector_store %arg11[%c7, %c0_27, %c0_28], %54 {strides = array<i32>} : memref<8x2x512xf32, #tpu.memory_space<vmem>>, vector<1x2x512xf32>,
    %c0_29 = arith.constant 0 : index
    %c0_30 = arith.constant 0 : index
    %55 = vector.load %arg3[%c0_29, %c0_30] : memref<128x512xf32, #tpu.memory_space<vmem>>, vector<128x512xf32>
    %cst_31 = arith.constant 0.000000e+00 : f32
    %56 = vector.broadcast %cst_31 : f32 to vector<2x128xf32>
    %cst_32 = arith.constant 0.000000e+00 : f32
    %57 = vector.broadcast %cst_32 : f32 to vector<2x128xf32>
    %c0_33 = arith.constant 0 : index
    %c0_34 = arith.constant 0 : index
    %c0_35 = arith.constant 0 : index
    %58 = vector.load %arg11[%c0_33, %c0_34, %c0_35] : memref<8x2x512xf32, #tpu.memory_space<vmem>>, vector<1x2x512xf32>
    %59 = vector.shape_cast %58 : vector<1x2x512xf32> to vector<2x512xf32>
    %cst_36 = arith.constant dense<0.000000e+00> : vector<2x512xf32>
    %60 = tpu.matmul %56, %55, %cst_36 {dimension_numbers = #tpu.dot_dimension_numbers<[1], [0], [0], [1], [0, 0, 1, 1], [], []>} : vector<2x128xf32>, vector<128x512xf32>, vector<2x512xf32> -> vector<2x512xf32>
    %61 = arith.addf %59, %60 : vector<2x512xf32>
    %62 = vector.extract_strided_slice %61 {offsets = [0, 0], sizes = [2, 128], strides = [1, 1]} : vector<2x512xf32> to vector<2x128xf32>
    %63 = arith.negf %62 : vector<2x128xf32>
    %64 = math.exp %63 : vector<2x128xf32>
    %cst_37 = arith.constant 1.000000e+00 : f32
    %65 = vector.broadcast %cst_37 : f32 to vector<2x128xf32>
    %66 = arith.addf %65, %64 : vector<2x128xf32>
    %67 = arith.divf %65, %66 : vector<2x128xf32>
    %68 = vector.extract_strided_slice %61 {offsets = [0, 128], sizes = [2, 128], strides = [1, 1]} : vector<2x512xf32> to vector<2x128xf32>
    %69 = arith.negf %68 : vector<2x128xf32>
    %70 = math.exp %69 : vector<2x128xf32>
    %cst_38 = arith.constant 1.000000e+00 : f32
    %71 = vector.broadcast %cst_38 : f32 to vector<2x128xf32>
    %72 = arith.addf %71, %70 : vector<2x128xf32>
    %73 = arith.divf %71, %72 : vector<2x128xf32>
    %74 = vector.extract_strided_slice %61 {offsets = [0, 256], sizes = [2, 128], strides = [1, 1]} : vector<2x512xf32> to vector<2x128xf32>
    %75 = math.tanh %74 : vector<2x128xf32>
    %76 = vector.extract_strided_slice %61 {offsets = [0, 384], sizes = [2, 128], strides = [1, 1]} : vector<2x512xf32> to vector<2x128xf32>
    %77 = arith.negf %76 : vector<2x128xf32>
    %78 = math.exp %77 : vector<2x128xf32>
    %cst_39 = arith.constant 1.000000e+00 : f32
    %79 = vector.broadcast %cst_39 : f32 to vector<2x128xf32>
    %80 = arith.addf %79, %78 : vector<2x128xf32>
    %81 = arith.divf %79, %80 : vector<2x128xf32>
    %82 = arith.mulf %73, %57 : vector<2x128xf32>
    %83 = arith.mulf %67, %75 : vector<2x128xf32>
    %84 = arith.addf %82, %83 : vector<2x128xf32>
    %85 = math.tanh %84 : vector<2x128xf32>
    %86 = arith.mulf %81, %85 : vector<2x128xf32>
    %c0_40 = arith.constant 0 : index
    %c0_41 = arith.constant 0 : index
    %c0_42 = arith.constant 0 : index
    %87 = vector.load %arg12[%c0_40, %c0_41, %c0_42] : memref<8x2x128xf32, #tpu.memory_space<vmem>>, vector<1x2x128xf32>
    %88 = vector.shape_cast %87 : vector<1x2x128xf32> to vector<2x128xf32>
    %89 = vector.shape_cast %86 : vector<2x128xf32> to vector<1x2x128xf32>
    tpu.vector_store %arg12[%c0_40, %c0_41, %c0_42], %89 {strides = array<i32>} : memref<8x2x128xf32, #tpu.memory_space<vmem>>, vector<1x2x128xf32>,
    %c1_43 = arith.constant 1 : index
    %c0_44 = arith.constant 0 : index
    %c0_45 = arith.constant 0 : index
    %90 = vector.load %arg11[%c1_43, %c0_44, %c0_45] : memref<8x2x512xf32, #tpu.memory_space<vmem>>, vector<1x2x512xf32>
    %91 = vector.shape_cast %90 : vector<1x2x512xf32> to vector<2x512xf32>
    %cst_46 = arith.constant dense<0.000000e+00> : vector<2x512xf32>
    %92 = tpu.matmul %86, %55, %cst_46 {dimension_numbers = #tpu.dot_dimension_numbers<[1], [0], [0], [1], [0, 0, 1, 1], [], []>} : vector<2x128xf32>, vector<128x512xf32>, vector<2x512xf32> -> vector<2x512xf32>
    %93 = arith.addf %91, %92 : vector<2x512xf32>
    %94 = vector.extract_strided_slice %93 {offsets = [0, 0], sizes = [2, 128], strides = [1, 1]} : vector<2x512xf32> to vector<2x128xf32>
    %95 = arith.negf %94 : vector<2x128xf32>
    %96 = math.exp %95 : vector<2x128xf32>
    %cst_47 = arith.constant 1.000000e+00 : f32
    %97 = vector.broadcast %cst_47 : f32 to vector<2x128xf32>
    %98 = arith.addf %97, %96 : vector<2x128xf32>
    %99 = arith.divf %97, %98 : vector<2x128xf32>
    %100 = vector.extract_strided_slice %93 {offsets = [0, 128], sizes = [2, 128], strides = [1, 1]} : vector<2x512xf32> to vector<2x128xf32>
    %101 = arith.negf %100 : vector<2x128xf32>
    %102 = math.exp %101 : vector<2x128xf32>
    %cst_48 = arith.constant 1.000000e+00 : f32
    %103 = vector.broadcast %cst_48 : f32 to vector<2x128xf32>
    %104 = arith.addf %103, %102 : vector<2x128xf32>
    %105 = arith.divf %103, %104 : vector<2x128xf32>
    %106 = vector.extract_strided_slice %93 {offsets = [0, 256], sizes = [2, 128], strides = [1, 1]} : vector<2x512xf32> to vector<2x128xf32>
    %107 = math.tanh %106 : vector<2x128xf32>
    %108 = vector.extract_strided_slice %93 {offsets = [0, 384], sizes = [2, 128], strides = [1, 1]} : vector<2x512xf32> to vector<2x128xf32>
    %109 = arith.negf %108 : vector<2x128xf32>
    %110 = math.exp %109 : vector<2x128xf32>
    %cst_49 = arith.constant 1.000000e+00 : f32
    %111 = vector.broadcast %cst_49 : f32 to vector<2x128xf32>
    %112 = arith.addf %111, %110 : vector<2x128xf32>
    %113 = arith.divf %111, %112 : vector<2x128xf32>
    %114 = arith.mulf %105, %84 : vector<2x128xf32>
    %115 = arith.mulf %99, %107 : vector<2x128xf32>
    %116 = arith.addf %114, %115 : vector<2x128xf32>
    %117 = math.tanh %116 : vector<2x128xf32>
    %118 = arith.mulf %113, %117 : vector<2x128xf32>
    %c1_50 = arith.constant 1 : index
    %c0_51 = arith.constant 0 : index
    %c0_52 = arith.constant 0 : index
    %119 = vector.load %arg12[%c1_50, %c0_51, %c0_52] : memref<8x2x128xf32, #tpu.memory_space<vmem>>, vector<1x2x128xf32>
    %120 = vector.shape_cast %119 : vector<1x2x128xf32> to vector<2x128xf32>
    %121 = vector.shape_cast %118 : vector<2x128xf32> to vector<1x2x128xf32>
    tpu.vector_store %arg12[%c1_50, %c0_51, %c0_52], %121 {strides = array<i32>} : memref<8x2x128xf32, #tpu.memory_space<vmem>>, vector<1x2x128xf32>,
    %c2_53 = arith.constant 2 : index
    %c0_54 = arith.constant 0 : index
    %c0_55 = arith.constant 0 : index
    %122 = vector.load %arg11[%c2_53, %c0_54, %c0_55] : memref<8x2x512xf32, #tpu.memory_space<vmem>>, vector<1x2x512xf32>
    %123 = vector.shape_cast %122 : vector<1x2x512xf32> to vector<2x512xf32>
    %cst_56 = arith.constant dense<0.000000e+00> : vector<2x512xf32>
    %124 = tpu.matmul %118, %55, %cst_56 {dimension_numbers = #tpu.dot_dimension_numbers<[1], [0], [0], [1], [0, 0, 1, 1], [], []>} : vector<2x128xf32>, vector<128x512xf32>, vector<2x512xf32> -> vector<2x512xf32>
    %125 = arith.addf %123, %124 : vector<2x512xf32>
    %126 = vector.extract_strided_slice %125 {offsets = [0, 0], sizes = [2, 128], strides = [1, 1]} : vector<2x512xf32> to vector<2x128xf32>
    %127 = arith.negf %126 : vector<2x128xf32>
    %128 = math.exp %127 : vector<2x128xf32>
    %cst_57 = arith.constant 1.000000e+00 : f32
    %129 = vector.broadcast %cst_57 : f32 to vector<2x128xf32>
    %130 = arith.addf %129, %128 : vector<2x128xf32>
    %131 = arith.divf %129, %130 : vector<2x128xf32>
    %132 = vector.extract_strided_slice %125 {offsets = [0, 128], sizes = [2, 128], strides = [1, 1]} : vector<2x512xf32> to vector<2x128xf32>
    %133 = arith.negf %132 : vector<2x128xf32>
    %134 = math.exp %133 : vector<2x128xf32>
    %cst_58 = arith.constant 1.000000e+00 : f32
    %135 = vector.broadcast %cst_58 : f32 to vector<2x128xf32>
    %136 = arith.addf %135, %134 : vector<2x128xf32>
    %137 = arith.divf %135, %136 : vector<2x128xf32>
    %138 = vector.extract_strided_slice %125 {offsets = [0, 256], sizes = [2, 128], strides = [1, 1]} : vector<2x512xf32> to vector<2x128xf32>
    %139 = math.tanh %138 : vector<2x128xf32>
    %140 = vector.extract_strided_slice %125 {offsets = [0, 384], sizes = [2, 128], strides = [1, 1]} : vector<2x512xf32> to vector<2x128xf32>
    %141 = arith.negf %140 : vector<2x128xf32>
    %142 = math.exp %141 : vector<2x128xf32>
    %cst_59 = arith.constant 1.000000e+00 : f32
    %143 = vector.broadcast %cst_59 : f32 to vector<2x128xf32>
    %144 = arith.addf %143, %142 : vector<2x128xf32>
    %145 = arith.divf %143, %144 : vector<2x128xf32>
    %146 = arith.mulf %137, %116 : vector<2x128xf32>
    %147 = arith.mulf %131, %139 : vector<2x128xf32>
    %148 = arith.addf %146, %147 : vector<2x128xf32>
    %149 = math.tanh %148 : vector<2x128xf32>
    %150 = arith.mulf %145, %149 : vector<2x128xf32>
    %c2_60 = arith.constant 2 : index
    %c0_61 = arith.constant 0 : index
    %c0_62 = arith.constant 0 : index
    %151 = vector.load %arg12[%c2_60, %c0_61, %c0_62] : memref<8x2x128xf32, #tpu.memory_space<vmem>>, vector<1x2x128xf32>
    %152 = vector.shape_cast %151 : vector<1x2x128xf32> to vector<2x128xf32>
    %153 = vector.shape_cast %150 : vector<2x128xf32> to vector<1x2x128xf32>
    tpu.vector_store %arg12[%c2_60, %c0_61, %c0_62], %153 {strides = array<i32>} : memref<8x2x128xf32, #tpu.memory_space<vmem>>, vector<1x2x128xf32>,
    %c3_63 = arith.constant 3 : index
    %c0_64 = arith.constant 0 : index
    %c0_65 = arith.constant 0 : index
    %154 = vector.load %arg11[%c3_63, %c0_64, %c0_65] : memref<8x2x512xf32, #tpu.memory_space<vmem>>, vector<1x2x512xf32>
    %155 = vector.shape_cast %154 : vector<1x2x512xf32> to vector<2x512xf32>
    %cst_66 = arith.constant dense<0.000000e+00> : vector<2x512xf32>
    %156 = tpu.matmul %150, %55, %cst_66 {dimension_numbers = #tpu.dot_dimension_numbers<[1], [0], [0], [1], [0, 0, 1, 1], [], []>} : vector<2x128xf32>, vector<128x512xf32>, vector<2x512xf32> -> vector<2x512xf32>
    %157 = arith.addf %155, %156 : vector<2x512xf32>
    %158 = vector.extract_strided_slice %157 {offsets = [0, 0], sizes = [2, 128], strides = [1, 1]} : vector<2x512xf32> to vector<2x128xf32>
    %159 = arith.negf %158 : vector<2x128xf32>
    %160 = math.exp %159 : vector<2x128xf32>
    %cst_67 = arith.constant 1.000000e+00 : f32
    %161 = vector.broadcast %cst_67 : f32 to vector<2x128xf32>
    %162 = arith.addf %161, %160 : vector<2x128xf32>
    %163 = arith.divf %161, %162 : vector<2x128xf32>
    %164 = vector.extract_strided_slice %157 {offsets = [0, 128], sizes = [2, 128], strides = [1, 1]} : vector<2x512xf32> to vector<2x128xf32>
    %165 = arith.negf %164 : vector<2x128xf32>
    %166 = math.exp %165 : vector<2x128xf32>
    %cst_68 = arith.constant 1.000000e+00 : f32
    %167 = vector.broadcast %cst_68 : f32 to vector<2x128xf32>
    %168 = arith.addf %167, %166 : vector<2x128xf32>
    %169 = arith.divf %167, %168 : vector<2x128xf32>
    %170 = vector.extract_strided_slice %157 {offsets = [0, 256], sizes = [2, 128], strides = [1, 1]} : vector<2x512xf32> to vector<2x128xf32>
    %171 = math.tanh %170 : vector<2x128xf32>
    %172 = vector.extract_strided_slice %157 {offsets = [0, 384], sizes = [2, 128], strides = [1, 1]} : vector<2x512xf32> to vector<2x128xf32>
    %173 = arith.negf %172 : vector<2x128xf32>
    %174 = math.exp %173 : vector<2x128xf32>
    %cst_69 = arith.constant 1.000000e+00 : f32
    %175 = vector.broadcast %cst_69 : f32 to vector<2x128xf32>
    %176 = arith.addf %175, %174 : vector<2x128xf32>
    %177 = arith.divf %175, %176 : vector<2x128xf32>
    %178 = arith.mulf %169, %148 : vector<2x128xf32>
    %179 = arith.mulf %163, %171 : vector<2x128xf32>
    %180 = arith.addf %178, %179 : vector<2x128xf32>
    %181 = math.tanh %180 : vector<2x128xf32>
    %182 = arith.mulf %177, %181 : vector<2x128xf32>
    %c3_70 = arith.constant 3 : index
    %c0_71 = arith.constant 0 : index
    %c0_72 = arith.constant 0 : index
    %183 = vector.load %arg12[%c3_70, %c0_71, %c0_72] : memref<8x2x128xf32, #tpu.memory_space<vmem>>, vector<1x2x128xf32>
    %184 = vector.shape_cast %183 : vector<1x2x128xf32> to vector<2x128xf32>
    %185 = vector.shape_cast %182 : vector<2x128xf32> to vector<1x2x128xf32>
    tpu.vector_store %arg12[%c3_70, %c0_71, %c0_72], %185 {strides = array<i32>} : memref<8x2x128xf32, #tpu.memory_space<vmem>>, vector<1x2x128xf32>,
    %c4_73 = arith.constant 4 : index
    %c0_74 = arith.constant 0 : index
    %c0_75 = arith.constant 0 : index
    %186 = vector.load %arg11[%c4_73, %c0_74, %c0_75] : memref<8x2x512xf32, #tpu.memory_space<vmem>>, vector<1x2x512xf32>
    %187 = vector.shape_cast %186 : vector<1x2x512xf32> to vector<2x512xf32>
    %cst_76 = arith.constant dense<0.000000e+00> : vector<2x512xf32>
    %188 = tpu.matmul %182, %55, %cst_76 {dimension_numbers = #tpu.dot_dimension_numbers<[1], [0], [0], [1], [0, 0, 1, 1], [], []>} : vector<2x128xf32>, vector<128x512xf32>, vector<2x512xf32> -> vector<2x512xf32>
    %189 = arith.addf %187, %188 : vector<2x512xf32>
    %190 = vector.extract_strided_slice %189 {offsets = [0, 0], sizes = [2, 128], strides = [1, 1]} : vector<2x512xf32> to vector<2x128xf32>
    %191 = arith.negf %190 : vector<2x128xf32>
    %192 = math.exp %191 : vector<2x128xf32>
    %cst_77 = arith.constant 1.000000e+00 : f32
    %193 = vector.broadcast %cst_77 : f32 to vector<2x128xf32>
    %194 = arith.addf %193, %192 : vector<2x128xf32>
    %195 = arith.divf %193, %194 : vector<2x128xf32>
    %196 = vector.extract_strided_slice %189 {offsets = [0, 128], sizes = [2, 128], strides = [1, 1]} : vector<2x512xf32> to vector<2x128xf32>
    %197 = arith.negf %196 : vector<2x128xf32>
    %198 = math.exp %197 : vector<2x128xf32>
    %cst_78 = arith.constant 1.000000e+00 : f32
    %199 = vector.broadcast %cst_78 : f32 to vector<2x128xf32>
    %200 = arith.addf %199, %198 : vector<2x128xf32>
    %201 = arith.divf %199, %200 : vector<2x128xf32>
    %202 = vector.extract_strided_slice %189 {offsets = [0, 256], sizes = [2, 128], strides = [1, 1]} : vector<2x512xf32> to vector<2x128xf32>
    %203 = math.tanh %202 : vector<2x128xf32>
    %204 = vector.extract_strided_slice %189 {offsets = [0, 384], sizes = [2, 128], strides = [1, 1]} : vector<2x512xf32> to vector<2x128xf32>
    %205 = arith.negf %204 : vector<2x128xf32>
    %206 = math.exp %205 : vector<2x128xf32>
    %cst_79 = arith.constant 1.000000e+00 : f32
    %207 = vector.broadcast %cst_79 : f32 to vector<2x128xf32>
    %208 = arith.addf %207, %206 : vector<2x128xf32>
    %209 = arith.divf %207, %208 : vector<2x128xf32>
    %210 = arith.mulf %201, %180 : vector<2x128xf32>
    %211 = arith.mulf %195, %203 : vector<2x128xf32>
    %212 = arith.addf %210, %211 : vector<2x128xf32>
    %213 = math.tanh %212 : vector<2x128xf32>
    %214 = arith.mulf %209, %213 : vector<2x128xf32>
    %c4_80 = arith.constant 4 : index
    %c0_81 = arith.constant 0 : index
    %c0_82 = arith.constant 0 : index
    %215 = vector.load %arg12[%c4_80, %c0_81, %c0_82] : memref<8x2x128xf32, #tpu.memory_space<vmem>>, vector<1x2x128xf32>
    %216 = vector.shape_cast %215 : vector<1x2x128xf32> to vector<2x128xf32>
    %217 = vector.shape_cast %214 : vector<2x128xf32> to vector<1x2x128xf32>
    tpu.vector_store %arg12[%c4_80, %c0_81, %c0_82], %217 {strides = array<i32>} : memref<8x2x128xf32, #tpu.memory_space<vmem>>, vector<1x2x128xf32>,
    %c5_83 = arith.constant 5 : index
    %c0_84 = arith.constant 0 : index
    %c0_85 = arith.constant 0 : index
    %218 = vector.load %arg11[%c5_83, %c0_84, %c0_85] : memref<8x2x512xf32, #tpu.memory_space<vmem>>, vector<1x2x512xf32>
    %219 = vector.shape_cast %218 : vector<1x2x512xf32> to vector<2x512xf32>
    %cst_86 = arith.constant dense<0.000000e+00> : vector<2x512xf32>
    %220 = tpu.matmul %214, %55, %cst_86 {dimension_numbers = #tpu.dot_dimension_numbers<[1], [0], [0], [1], [0, 0, 1, 1], [], []>} : vector<2x128xf32>, vector<128x512xf32>, vector<2x512xf32> -> vector<2x512xf32>
    %221 = arith.addf %219, %220 : vector<2x512xf32>
    %222 = vector.extract_strided_slice %221 {offsets = [0, 0], sizes = [2, 128], strides = [1, 1]} : vector<2x512xf32> to vector<2x128xf32>
    %223 = arith.negf %222 : vector<2x128xf32>
    %224 = math.exp %223 : vector<2x128xf32>
    %cst_87 = arith.constant 1.000000e+00 : f32
    %225 = vector.broadcast %cst_87 : f32 to vector<2x128xf32>
    %226 = arith.addf %225, %224 : vector<2x128xf32>
    %227 = arith.divf %225, %226 : vector<2x128xf32>
    %228 = vector.extract_strided_slice %221 {offsets = [0, 128], sizes = [2, 128], strides = [1, 1]} : vector<2x512xf32> to vector<2x128xf32>
    %229 = arith.negf %228 : vector<2x128xf32>
    %230 = math.exp %229 : vector<2x128xf32>
    %cst_88 = arith.constant 1.000000e+00 : f32
    %231 = vector.broadcast %cst_88 : f32 to vector<2x128xf32>
    %232 = arith.addf %231, %230 : vector<2x128xf32>
    %233 = arith.divf %231, %232 : vector<2x128xf32>
    %234 = vector.extract_strided_slice %221 {offsets = [0, 256], sizes = [2, 128], strides = [1, 1]} : vector<2x512xf32> to vector<2x128xf32>
    %235 = math.tanh %234 : vector<2x128xf32>
    %236 = vector.extract_strided_slice %221 {offsets = [0, 384], sizes = [2, 128], strides = [1, 1]} : vector<2x512xf32> to vector<2x128xf32>
    %237 = arith.negf %236 : vector<2x128xf32>
    %238 = math.exp %237 : vector<2x128xf32>
    %cst_89 = arith.constant 1.000000e+00 : f32
    %239 = vector.broadcast %cst_89 : f32 to vector<2x128xf32>
    %240 = arith.addf %239, %238 : vector<2x128xf32>
    %241 = arith.divf %239, %240 : vector<2x128xf32>
    %242 = arith.mulf %233, %212 : vector<2x128xf32>
    %243 = arith.mulf %227, %235 : vector<2x128xf32>
    %244 = arith.addf %242, %243 : vector<2x128xf32>
    %245 = math.tanh %244 : vector<2x128xf32>
    %246 = arith.mulf %241, %245 : vector<2x128xf32>
    %c5_90 = arith.constant 5 : index
    %c0_91 = arith.constant 0 : index
    %c0_92 = arith.constant 0 : index
    %247 = vector.load %arg12[%c5_90, %c0_91, %c0_92] : memref<8x2x128xf32, #tpu.memory_space<vmem>>, vector<1x2x128xf32>
    %248 = vector.shape_cast %247 : vector<1x2x128xf32> to vector<2x128xf32>
    %249 = vector.shape_cast %246 : vector<2x128xf32> to vector<1x2x128xf32>
    tpu.vector_store %arg12[%c5_90, %c0_91, %c0_92], %249 {strides = array<i32>} : memref<8x2x128xf32, #tpu.memory_space<vmem>>, vector<1x2x128xf32>,
    %c6_93 = arith.constant 6 : index
    %c0_94 = arith.constant 0 : index
    %c0_95 = arith.constant 0 : index
    %250 = vector.load %arg11[%c6_93, %c0_94, %c0_95] : memref<8x2x512xf32, #tpu.memory_space<vmem>>, vector<1x2x512xf32>
    %251 = vector.shape_cast %250 : vector<1x2x512xf32> to vector<2x512xf32>
    %cst_96 = arith.constant dense<0.000000e+00> : vector<2x512xf32>
    %252 = tpu.matmul %246, %55, %cst_96 {dimension_numbers = #tpu.dot_dimension_numbers<[1], [0], [0], [1], [0, 0, 1, 1], [], []>} : vector<2x128xf32>, vector<128x512xf32>, vector<2x512xf32> -> vector<2x512xf32>
    %253 = arith.addf %251, %252 : vector<2x512xf32>
    %254 = vector.extract_strided_slice %253 {offsets = [0, 0], sizes = [2, 128], strides = [1, 1]} : vector<2x512xf32> to vector<2x128xf32>
    %255 = arith.negf %254 : vector<2x128xf32>
    %256 = math.exp %255 : vector<2x128xf32>
    %cst_97 = arith.constant 1.000000e+00 : f32
    %257 = vector.broadcast %cst_97 : f32 to vector<2x128xf32>
    %258 = arith.addf %257, %256 : vector<2x128xf32>
    %259 = arith.divf %257, %258 : vector<2x128xf32>
    %260 = vector.extract_strided_slice %253 {offsets = [0, 128], sizes = [2, 128], strides = [1, 1]} : vector<2x512xf32> to vector<2x128xf32>
    %261 = arith.negf %260 : vector<2x128xf32>
    %262 = math.exp %261 : vector<2x128xf32>
    %cst_98 = arith.constant 1.000000e+00 : f32
    %263 = vector.broadcast %cst_98 : f32 to vector<2x128xf32>
    %264 = arith.addf %263, %262 : vector<2x128xf32>
    %265 = arith.divf %263, %264 : vector<2x128xf32>
    %266 = vector.extract_strided_slice %253 {offsets = [0, 256], sizes = [2, 128], strides = [1, 1]} : vector<2x512xf32> to vector<2x128xf32>
    %267 = math.tanh %266 : vector<2x128xf32>
    %268 = vector.extract_strided_slice %253 {offsets = [0, 384], sizes = [2, 128], strides = [1, 1]} : vector<2x512xf32> to vector<2x128xf32>
    %269 = arith.negf %268 : vector<2x128xf32>
    %270 = math.exp %269 : vector<2x128xf32>
    %cst_99 = arith.constant 1.000000e+00 : f32
    %271 = vector.broadcast %cst_99 : f32 to vector<2x128xf32>
    %272 = arith.addf %271, %270 : vector<2x128xf32>
    %273 = arith.divf %271, %272 : vector<2x128xf32>
    %274 = arith.mulf %265, %244 : vector<2x128xf32>
    %275 = arith.mulf %259, %267 : vector<2x128xf32>
    %276 = arith.addf %274, %275 : vector<2x128xf32>
    %277 = math.tanh %276 : vector<2x128xf32>
    %278 = arith.mulf %273, %277 : vector<2x128xf32>
    %c6_100 = arith.constant 6 : index
    %c0_101 = arith.constant 0 : index
    %c0_102 = arith.constant 0 : index
    %279 = vector.load %arg12[%c6_100, %c0_101, %c0_102] : memref<8x2x128xf32, #tpu.memory_space<vmem>>, vector<1x2x128xf32>
    %280 = vector.shape_cast %279 : vector<1x2x128xf32> to vector<2x128xf32>
    %281 = vector.shape_cast %278 : vector<2x128xf32> to vector<1x2x128xf32>
    tpu.vector_store %arg12[%c6_100, %c0_101, %c0_102], %281 {strides = array<i32>} : memref<8x2x128xf32, #tpu.memory_space<vmem>>, vector<1x2x128xf32>,
    %c7_103 = arith.constant 7 : index
    %c0_104 = arith.constant 0 : index
    %c0_105 = arith.constant 0 : index
    %282 = vector.load %arg11[%c7_103, %c0_104, %c0_105] : memref<8x2x512xf32, #tpu.memory_space<vmem>>, vector<1x2x512xf32>
    %283 = vector.shape_cast %282 : vector<1x2x512xf32> to vector<2x512xf32>
    %cst_106 = arith.constant dense<0.000000e+00> : vector<2x512xf32>
    %284 = tpu.matmul %278, %55, %cst_106 {dimension_numbers = #tpu.dot_dimension_numbers<[1], [0], [0], [1], [0, 0, 1, 1], [], []>} : vector<2x128xf32>, vector<128x512xf32>, vector<2x512xf32> -> vector<2x512xf32>
    %285 = arith.addf %283, %284 : vector<2x512xf32>
    %286 = vector.extract_strided_slice %285 {offsets = [0, 0], sizes = [2, 128], strides = [1, 1]} : vector<2x512xf32> to vector<2x128xf32>
    %287 = arith.negf %286 : vector<2x128xf32>
    %288 = math.exp %287 : vector<2x128xf32>
    %cst_107 = arith.constant 1.000000e+00 : f32
    %289 = vector.broadcast %cst_107 : f32 to vector<2x128xf32>
    %290 = arith.addf %289, %288 : vector<2x128xf32>
    %291 = arith.divf %289, %290 : vector<2x128xf32>
    %292 = vector.extract_strided_slice %285 {offsets = [0, 128], sizes = [2, 128], strides = [1, 1]} : vector<2x512xf32> to vector<2x128xf32>
    %293 = arith.negf %292 : vector<2x128xf32>
    %294 = math.exp %293 : vector<2x128xf32>
    %cst_108 = arith.constant 1.000000e+00 : f32
    %295 = vector.broadcast %cst_108 : f32 to vector<2x128xf32>
    %296 = arith.addf %295, %294 : vector<2x128xf32>
    %297 = arith.divf %295, %296 : vector<2x128xf32>
    %298 = vector.extract_strided_slice %285 {offsets = [0, 256], sizes = [2, 128], strides = [1, 1]} : vector<2x512xf32> to vector<2x128xf32>
    %299 = math.tanh %298 : vector<2x128xf32>
    %300 = vector.extract_strided_slice %285 {offsets = [0, 384], sizes = [2, 128], strides = [1, 1]} : vector<2x512xf32> to vector<2x128xf32>
    %301 = arith.negf %300 : vector<2x128xf32>
    %302 = math.exp %301 : vector<2x128xf32>
    %cst_109 = arith.constant 1.000000e+00 : f32
    %303 = vector.broadcast %cst_109 : f32 to vector<2x128xf32>
    %304 = arith.addf %303, %302 : vector<2x128xf32>
    %305 = arith.divf %303, %304 : vector<2x128xf32>
    %306 = arith.mulf %297, %276 : vector<2x128xf32>
    %307 = arith.mulf %291, %299 : vector<2x128xf32>
    %308 = arith.addf %306, %307 : vector<2x128xf32>
    %309 = math.tanh %308 : vector<2x128xf32>
    %310 = arith.mulf %305, %309 : vector<2x128xf32>
    %c7_110 = arith.constant 7 : index
    %c0_111 = arith.constant 0 : index
    %c0_112 = arith.constant 0 : index
    %311 = vector.load %arg12[%c7_110, %c0_111, %c0_112] : memref<8x2x128xf32, #tpu.memory_space<vmem>>, vector<1x2x128xf32>
    %312 = vector.shape_cast %311 : vector<1x2x128xf32> to vector<2x128xf32>
    %313 = vector.shape_cast %310 : vector<2x128xf32> to vector<1x2x128xf32>
    tpu.vector_store %arg12[%c7_110, %c0_111, %c0_112], %313 {strides = array<i32>} : memref<8x2x128xf32, #tpu.memory_space<vmem>>, vector<1x2x128xf32>,
    %c0_113 = arith.constant 0 : index
    %c0_114 = arith.constant 0 : index
    %c0_115 = arith.constant 0 : index
    %314 = vector.load %arg12[%c0_113, %c0_114, %c0_115] : memref<8x2x128xf32, #tpu.memory_space<vmem>>, vector<8x2x128xf32>
    %315 = vector.shape_cast %314 : vector<8x2x128xf32> to vector<16x128xf32>
    %c0_116 = arith.constant 0 : index
    %c0_117 = arith.constant 0 : index
    %316 = vector.load %arg5[%c0_116, %c0_117] : memref<128x512xf32, #tpu.memory_space<vmem>>, vector<128x512xf32>
    %cst_118 = arith.constant dense<0.000000e+00> : vector<16x512xf32>
    %317 = tpu.matmul %315, %316, %cst_118 {dimension_numbers = #tpu.dot_dimension_numbers<[1], [0], [0], [1], [0, 0, 1, 1], [], []>} : vector<16x128xf32>, vector<128x512xf32>, vector<16x512xf32> -> vector<16x512xf32>
    %c0_119 = arith.constant 0 : index
    %c0_120 = arith.constant 0 : index
    %318 = vector.load %arg7[%c0_119, %c0_120] : memref<1x512xf32, #tpu.memory_space<vmem>>, vector<1x512xf32>
    %319 = vector.broadcast %318 : vector<1x512xf32> to vector<16x512xf32>
    %320 = arith.addf %317, %319 : vector<16x512xf32>
    %321 = vector.shape_cast %320 : vector<16x512xf32> to vector<8x2x512xf32>
    %c0_121 = arith.constant 0 : index
    %c0_122 = arith.constant 0 : index
    %c0_123 = arith.constant 0 : index
    %322 = vector.load %arg11[%c0_121, %c0_122, %c0_123] : memref<8x2x512xf32, #tpu.memory_space<vmem>>, vector<8x2x512xf32>
    tpu.vector_store %arg11[%c0_121, %c0_122, %c0_123], %321 {strides = array<i32>} : memref<8x2x512xf32, #tpu.memory_space<vmem>>, vector<8x2x512xf32>,
    %c0_124 = arith.constant 0 : index
    %c0_125 = arith.constant 0 : index
    %323 = vector.load %arg6[%c0_124, %c0_125] : memref<128x512xf32, #tpu.memory_space<vmem>>, vector<128x512xf32>
    %cst_126 = arith.constant 0.000000e+00 : f32
    %324 = vector.broadcast %cst_126 : f32 to vector<2x128xf32>
    %cst_127 = arith.constant 0.000000e+00 : f32
    %325 = vector.broadcast %cst_127 : f32 to vector<2x128xf32>
    %c0_128 = arith.constant 0 : index
    %c0_129 = arith.constant 0 : index
    %c0_130 = arith.constant 0 : index
    %326 = vector.load %arg11[%c0_128, %c0_129, %c0_130] : memref<8x2x512xf32, #tpu.memory_space<vmem>>, vector<1x2x512xf32>
    %327 = vector.shape_cast %326 : vector<1x2x512xf32> to vector<2x512xf32>
    %cst_131 = arith.constant dense<0.000000e+00> : vector<2x512xf32>
    %328 = tpu.matmul %324, %323, %cst_131 {dimension_numbers = #tpu.dot_dimension_numbers<[1], [0], [0], [1], [0, 0, 1, 1], [], []>} : vector<2x128xf32>, vector<128x512xf32>, vector<2x512xf32> -> vector<2x512xf32>
    %329 = arith.addf %327, %328 : vector<2x512xf32>
    %330 = vector.extract_strided_slice %329 {offsets = [0, 0], sizes = [2, 128], strides = [1, 1]} : vector<2x512xf32> to vector<2x128xf32>
    %331 = arith.negf %330 : vector<2x128xf32>
    %332 = math.exp %331 : vector<2x128xf32>
    %cst_132 = arith.constant 1.000000e+00 : f32
    %333 = vector.broadcast %cst_132 : f32 to vector<2x128xf32>
    %334 = arith.addf %333, %332 : vector<2x128xf32>
    %335 = arith.divf %333, %334 : vector<2x128xf32>
    %336 = vector.extract_strided_slice %329 {offsets = [0, 128], sizes = [2, 128], strides = [1, 1]} : vector<2x512xf32> to vector<2x128xf32>
    %337 = arith.negf %336 : vector<2x128xf32>
    %338 = math.exp %337 : vector<2x128xf32>
    %cst_133 = arith.constant 1.000000e+00 : f32
    %339 = vector.broadcast %cst_133 : f32 to vector<2x128xf32>
    %340 = arith.addf %339, %338 : vector<2x128xf32>
    %341 = arith.divf %339, %340 : vector<2x128xf32>
    %342 = vector.extract_strided_slice %329 {offsets = [0, 256], sizes = [2, 128], strides = [1, 1]} : vector<2x512xf32> to vector<2x128xf32>
    %343 = math.tanh %342 : vector<2x128xf32>
    %344 = vector.extract_strided_slice %329 {offsets = [0, 384], sizes = [2, 128], strides = [1, 1]} : vector<2x512xf32> to vector<2x128xf32>
    %345 = arith.negf %344 : vector<2x128xf32>
    %346 = math.exp %345 : vector<2x128xf32>
    %cst_134 = arith.constant 1.000000e+00 : f32
    %347 = vector.broadcast %cst_134 : f32 to vector<2x128xf32>
    %348 = arith.addf %347, %346 : vector<2x128xf32>
    %349 = arith.divf %347, %348 : vector<2x128xf32>
    %350 = arith.mulf %341, %325 : vector<2x128xf32>
    %351 = arith.mulf %335, %343 : vector<2x128xf32>
    %352 = arith.addf %350, %351 : vector<2x128xf32>
    %353 = math.tanh %352 : vector<2x128xf32>
    %354 = arith.mulf %349, %353 : vector<2x128xf32>
    %c1_135 = arith.constant 1 : index
    %c0_136 = arith.constant 0 : index
    %c0_137 = arith.constant 0 : index
    %355 = vector.load %arg11[%c1_135, %c0_136, %c0_137] : memref<8x2x512xf32, #tpu.memory_space<vmem>>, vector<1x2x512xf32>
    %356 = vector.shape_cast %355 : vector<1x2x512xf32> to vector<2x512xf32>
    %cst_138 = arith.constant dense<0.000000e+00> : vector<2x512xf32>
    %357 = tpu.matmul %354, %323, %cst_138 {dimension_numbers = #tpu.dot_dimension_numbers<[1], [0], [0], [1], [0, 0, 1, 1], [], []>} : vector<2x128xf32>, vector<128x512xf32>, vector<2x512xf32> -> vector<2x512xf32>
    %358 = arith.addf %356, %357 : vector<2x512xf32>
    %359 = vector.extract_strided_slice %358 {offsets = [0, 0], sizes = [2, 128], strides = [1, 1]} : vector<2x512xf32> to vector<2x128xf32>
    %360 = arith.negf %359 : vector<2x128xf32>
    %361 = math.exp %360 : vector<2x128xf32>
    %cst_139 = arith.constant 1.000000e+00 : f32
    %362 = vector.broadcast %cst_139 : f32 to vector<2x128xf32>
    %363 = arith.addf %362, %361 : vector<2x128xf32>
    %364 = arith.divf %362, %363 : vector<2x128xf32>
    %365 = vector.extract_strided_slice %358 {offsets = [0, 128], sizes = [2, 128], strides = [1, 1]} : vector<2x512xf32> to vector<2x128xf32>
    %366 = arith.negf %365 : vector<2x128xf32>
    %367 = math.exp %366 : vector<2x128xf32>
    %cst_140 = arith.constant 1.000000e+00 : f32
    %368 = vector.broadcast %cst_140 : f32 to vector<2x128xf32>
    %369 = arith.addf %368, %367 : vector<2x128xf32>
    %370 = arith.divf %368, %369 : vector<2x128xf32>
    %371 = vector.extract_strided_slice %358 {offsets = [0, 256], sizes = [2, 128], strides = [1, 1]} : vector<2x512xf32> to vector<2x128xf32>
    %372 = math.tanh %371 : vector<2x128xf32>
    %373 = vector.extract_strided_slice %358 {offsets = [0, 384], sizes = [2, 128], strides = [1, 1]} : vector<2x512xf32> to vector<2x128xf32>
    %374 = arith.negf %373 : vector<2x128xf32>
    %375 = math.exp %374 : vector<2x128xf32>
    %cst_141 = arith.constant 1.000000e+00 : f32
    %376 = vector.broadcast %cst_141 : f32 to vector<2x128xf32>
    %377 = arith.addf %376, %375 : vector<2x128xf32>
    %378 = arith.divf %376, %377 : vector<2x128xf32>
    %379 = arith.mulf %370, %352 : vector<2x128xf32>
    %380 = arith.mulf %364, %372 : vector<2x128xf32>
    %381 = arith.addf %379, %380 : vector<2x128xf32>
    %382 = math.tanh %381 : vector<2x128xf32>
    %383 = arith.mulf %378, %382 : vector<2x128xf32>
    %c2_142 = arith.constant 2 : index
    %c0_143 = arith.constant 0 : index
    %c0_144 = arith.constant 0 : index
    %384 = vector.load %arg11[%c2_142, %c0_143, %c0_144] : memref<8x2x512xf32, #tpu.memory_space<vmem>>, vector<1x2x512xf32>
    %385 = vector.shape_cast %384 : vector<1x2x512xf32> to vector<2x512xf32>
    %cst_145 = arith.constant dense<0.000000e+00> : vector<2x512xf32>
    %386 = tpu.matmul %383, %323, %cst_145 {dimension_numbers = #tpu.dot_dimension_numbers<[1], [0], [0], [1], [0, 0, 1, 1], [], []>} : vector<2x128xf32>, vector<128x512xf32>, vector<2x512xf32> -> vector<2x512xf32>
    %387 = arith.addf %385, %386 : vector<2x512xf32>
    %388 = vector.extract_strided_slice %387 {offsets = [0, 0], sizes = [2, 128], strides = [1, 1]} : vector<2x512xf32> to vector<2x128xf32>
    %389 = arith.negf %388 : vector<2x128xf32>
    %390 = math.exp %389 : vector<2x128xf32>
    %cst_146 = arith.constant 1.000000e+00 : f32
    %391 = vector.broadcast %cst_146 : f32 to vector<2x128xf32>
    %392 = arith.addf %391, %390 : vector<2x128xf32>
    %393 = arith.divf %391, %392 : vector<2x128xf32>
    %394 = vector.extract_strided_slice %387 {offsets = [0, 128], sizes = [2, 128], strides = [1, 1]} : vector<2x512xf32> to vector<2x128xf32>
    %395 = arith.negf %394 : vector<2x128xf32>
    %396 = math.exp %395 : vector<2x128xf32>
    %cst_147 = arith.constant 1.000000e+00 : f32
    %397 = vector.broadcast %cst_147 : f32 to vector<2x128xf32>
    %398 = arith.addf %397, %396 : vector<2x128xf32>
    %399 = arith.divf %397, %398 : vector<2x128xf32>
    %400 = vector.extract_strided_slice %387 {offsets = [0, 256], sizes = [2, 128], strides = [1, 1]} : vector<2x512xf32> to vector<2x128xf32>
    %401 = math.tanh %400 : vector<2x128xf32>
    %402 = vector.extract_strided_slice %387 {offsets = [0, 384], sizes = [2, 128], strides = [1, 1]} : vector<2x512xf32> to vector<2x128xf32>
    %403 = arith.negf %402 : vector<2x128xf32>
    %404 = math.exp %403 : vector<2x128xf32>
    %cst_148 = arith.constant 1.000000e+00 : f32
    %405 = vector.broadcast %cst_148 : f32 to vector<2x128xf32>
    %406 = arith.addf %405, %404 : vector<2x128xf32>
    %407 = arith.divf %405, %406 : vector<2x128xf32>
    %408 = arith.mulf %399, %381 : vector<2x128xf32>
    %409 = arith.mulf %393, %401 : vector<2x128xf32>
    %410 = arith.addf %408, %409 : vector<2x128xf32>
    %411 = math.tanh %410 : vector<2x128xf32>
    %412 = arith.mulf %407, %411 : vector<2x128xf32>
    %c3_149 = arith.constant 3 : index
    %c0_150 = arith.constant 0 : index
    %c0_151 = arith.constant 0 : index
    %413 = vector.load %arg11[%c3_149, %c0_150, %c0_151] : memref<8x2x512xf32, #tpu.memory_space<vmem>>, vector<1x2x512xf32>
    %414 = vector.shape_cast %413 : vector<1x2x512xf32> to vector<2x512xf32>
    %cst_152 = arith.constant dense<0.000000e+00> : vector<2x512xf32>
    %415 = tpu.matmul %412, %323, %cst_152 {dimension_numbers = #tpu.dot_dimension_numbers<[1], [0], [0], [1], [0, 0, 1, 1], [], []>} : vector<2x128xf32>, vector<128x512xf32>, vector<2x512xf32> -> vector<2x512xf32>
    %416 = arith.addf %414, %415 : vector<2x512xf32>
    %417 = vector.extract_strided_slice %416 {offsets = [0, 0], sizes = [2, 128], strides = [1, 1]} : vector<2x512xf32> to vector<2x128xf32>
    %418 = arith.negf %417 : vector<2x128xf32>
    %419 = math.exp %418 : vector<2x128xf32>
    %cst_153 = arith.constant 1.000000e+00 : f32
    %420 = vector.broadcast %cst_153 : f32 to vector<2x128xf32>
    %421 = arith.addf %420, %419 : vector<2x128xf32>
    %422 = arith.divf %420, %421 : vector<2x128xf32>
    %423 = vector.extract_strided_slice %416 {offsets = [0, 128], sizes = [2, 128], strides = [1, 1]} : vector<2x512xf32> to vector<2x128xf32>
    %424 = arith.negf %423 : vector<2x128xf32>
    %425 = math.exp %424 : vector<2x128xf32>
    %cst_154 = arith.constant 1.000000e+00 : f32
    %426 = vector.broadcast %cst_154 : f32 to vector<2x128xf32>
    %427 = arith.addf %426, %425 : vector<2x128xf32>
    %428 = arith.divf %426, %427 : vector<2x128xf32>
    %429 = vector.extract_strided_slice %416 {offsets = [0, 256], sizes = [2, 128], strides = [1, 1]} : vector<2x512xf32> to vector<2x128xf32>
    %430 = math.tanh %429 : vector<2x128xf32>
    %431 = vector.extract_strided_slice %416 {offsets = [0, 384], sizes = [2, 128], strides = [1, 1]} : vector<2x512xf32> to vector<2x128xf32>
    %432 = arith.negf %431 : vector<2x128xf32>
    %433 = math.exp %432 : vector<2x128xf32>
    %cst_155 = arith.constant 1.000000e+00 : f32
    %434 = vector.broadcast %cst_155 : f32 to vector<2x128xf32>
    %435 = arith.addf %434, %433 : vector<2x128xf32>
    %436 = arith.divf %434, %435 : vector<2x128xf32>
    %437 = arith.mulf %428, %410 : vector<2x128xf32>
    %438 = arith.mulf %422, %430 : vector<2x128xf32>
    %439 = arith.addf %437, %438 : vector<2x128xf32>
    %440 = math.tanh %439 : vector<2x128xf32>
    %441 = arith.mulf %436, %440 : vector<2x128xf32>
    %c4_156 = arith.constant 4 : index
    %c0_157 = arith.constant 0 : index
    %c0_158 = arith.constant 0 : index
    %442 = vector.load %arg11[%c4_156, %c0_157, %c0_158] : memref<8x2x512xf32, #tpu.memory_space<vmem>>, vector<1x2x512xf32>
    %443 = vector.shape_cast %442 : vector<1x2x512xf32> to vector<2x512xf32>
    %cst_159 = arith.constant dense<0.000000e+00> : vector<2x512xf32>
    %444 = tpu.matmul %441, %323, %cst_159 {dimension_numbers = #tpu.dot_dimension_numbers<[1], [0], [0], [1], [0, 0, 1, 1], [], []>} : vector<2x128xf32>, vector<128x512xf32>, vector<2x512xf32> -> vector<2x512xf32>
    %445 = arith.addf %443, %444 : vector<2x512xf32>
    %446 = vector.extract_strided_slice %445 {offsets = [0, 0], sizes = [2, 128], strides = [1, 1]} : vector<2x512xf32> to vector<2x128xf32>
    %447 = arith.negf %446 : vector<2x128xf32>
    %448 = math.exp %447 : vector<2x128xf32>
    %cst_160 = arith.constant 1.000000e+00 : f32
    %449 = vector.broadcast %cst_160 : f32 to vector<2x128xf32>
    %450 = arith.addf %449, %448 : vector<2x128xf32>
    %451 = arith.divf %449, %450 : vector<2x128xf32>
    %452 = vector.extract_strided_slice %445 {offsets = [0, 128], sizes = [2, 128], strides = [1, 1]} : vector<2x512xf32> to vector<2x128xf32>
    %453 = arith.negf %452 : vector<2x128xf32>
    %454 = math.exp %453 : vector<2x128xf32>
    %cst_161 = arith.constant 1.000000e+00 : f32
    %455 = vector.broadcast %cst_161 : f32 to vector<2x128xf32>
    %456 = arith.addf %455, %454 : vector<2x128xf32>
    %457 = arith.divf %455, %456 : vector<2x128xf32>
    %458 = vector.extract_strided_slice %445 {offsets = [0, 256], sizes = [2, 128], strides = [1, 1]} : vector<2x512xf32> to vector<2x128xf32>
    %459 = math.tanh %458 : vector<2x128xf32>
    %460 = vector.extract_strided_slice %445 {offsets = [0, 384], sizes = [2, 128], strides = [1, 1]} : vector<2x512xf32> to vector<2x128xf32>
    %461 = arith.negf %460 : vector<2x128xf32>
    %462 = math.exp %461 : vector<2x128xf32>
    %cst_162 = arith.constant 1.000000e+00 : f32
    %463 = vector.broadcast %cst_162 : f32 to vector<2x128xf32>
    %464 = arith.addf %463, %462 : vector<2x128xf32>
    %465 = arith.divf %463, %464 : vector<2x128xf32>
    %466 = arith.mulf %457, %439 : vector<2x128xf32>
    %467 = arith.mulf %451, %459 : vector<2x128xf32>
    %468 = arith.addf %466, %467 : vector<2x128xf32>
    %469 = math.tanh %468 : vector<2x128xf32>
    %470 = arith.mulf %465, %469 : vector<2x128xf32>
    %c5_163 = arith.constant 5 : index
    %c0_164 = arith.constant 0 : index
    %c0_165 = arith.constant 0 : index
    %471 = vector.load %arg11[%c5_163, %c0_164, %c0_165] : memref<8x2x512xf32, #tpu.memory_space<vmem>>, vector<1x2x512xf32>
    %472 = vector.shape_cast %471 : vector<1x2x512xf32> to vector<2x512xf32>
    %cst_166 = arith.constant dense<0.000000e+00> : vector<2x512xf32>
    %473 = tpu.matmul %470, %323, %cst_166 {dimension_numbers = #tpu.dot_dimension_numbers<[1], [0], [0], [1], [0, 0, 1, 1], [], []>} : vector<2x128xf32>, vector<128x512xf32>, vector<2x512xf32> -> vector<2x512xf32>
    %474 = arith.addf %472, %473 : vector<2x512xf32>
    %475 = vector.extract_strided_slice %474 {offsets = [0, 0], sizes = [2, 128], strides = [1, 1]} : vector<2x512xf32> to vector<2x128xf32>
    %476 = arith.negf %475 : vector<2x128xf32>
    %477 = math.exp %476 : vector<2x128xf32>
    %cst_167 = arith.constant 1.000000e+00 : f32
    %478 = vector.broadcast %cst_167 : f32 to vector<2x128xf32>
    %479 = arith.addf %478, %477 : vector<2x128xf32>
    %480 = arith.divf %478, %479 : vector<2x128xf32>
    %481 = vector.extract_strided_slice %474 {offsets = [0, 128], sizes = [2, 128], strides = [1, 1]} : vector<2x512xf32> to vector<2x128xf32>
    %482 = arith.negf %481 : vector<2x128xf32>
    %483 = math.exp %482 : vector<2x128xf32>
    %cst_168 = arith.constant 1.000000e+00 : f32
    %484 = vector.broadcast %cst_168 : f32 to vector<2x128xf32>
    %485 = arith.addf %484, %483 : vector<2x128xf32>
    %486 = arith.divf %484, %485 : vector<2x128xf32>
    %487 = vector.extract_strided_slice %474 {offsets = [0, 256], sizes = [2, 128], strides = [1, 1]} : vector<2x512xf32> to vector<2x128xf32>
    %488 = math.tanh %487 : vector<2x128xf32>
    %489 = vector.extract_strided_slice %474 {offsets = [0, 384], sizes = [2, 128], strides = [1, 1]} : vector<2x512xf32> to vector<2x128xf32>
    %490 = arith.negf %489 : vector<2x128xf32>
    %491 = math.exp %490 : vector<2x128xf32>
    %cst_169 = arith.constant 1.000000e+00 : f32
    %492 = vector.broadcast %cst_169 : f32 to vector<2x128xf32>
    %493 = arith.addf %492, %491 : vector<2x128xf32>
    %494 = arith.divf %492, %493 : vector<2x128xf32>
    %495 = arith.mulf %486, %468 : vector<2x128xf32>
    %496 = arith.mulf %480, %488 : vector<2x128xf32>
    %497 = arith.addf %495, %496 : vector<2x128xf32>
    %498 = math.tanh %497 : vector<2x128xf32>
    %499 = arith.mulf %494, %498 : vector<2x128xf32>
    %c6_170 = arith.constant 6 : index
    %c0_171 = arith.constant 0 : index
    %c0_172 = arith.constant 0 : index
    %500 = vector.load %arg11[%c6_170, %c0_171, %c0_172] : memref<8x2x512xf32, #tpu.memory_space<vmem>>, vector<1x2x512xf32>
    %501 = vector.shape_cast %500 : vector<1x2x512xf32> to vector<2x512xf32>
    %cst_173 = arith.constant dense<0.000000e+00> : vector<2x512xf32>
    %502 = tpu.matmul %499, %323, %cst_173 {dimension_numbers = #tpu.dot_dimension_numbers<[1], [0], [0], [1], [0, 0, 1, 1], [], []>} : vector<2x128xf32>, vector<128x512xf32>, vector<2x512xf32> -> vector<2x512xf32>
    %503 = arith.addf %501, %502 : vector<2x512xf32>
    %504 = vector.extract_strided_slice %503 {offsets = [0, 0], sizes = [2, 128], strides = [1, 1]} : vector<2x512xf32> to vector<2x128xf32>
    %505 = arith.negf %504 : vector<2x128xf32>
    %506 = math.exp %505 : vector<2x128xf32>
    %cst_174 = arith.constant 1.000000e+00 : f32
    %507 = vector.broadcast %cst_174 : f32 to vector<2x128xf32>
    %508 = arith.addf %507, %506 : vector<2x128xf32>
    %509 = arith.divf %507, %508 : vector<2x128xf32>
    %510 = vector.extract_strided_slice %503 {offsets = [0, 128], sizes = [2, 128], strides = [1, 1]} : vector<2x512xf32> to vector<2x128xf32>
    %511 = arith.negf %510 : vector<2x128xf32>
    %512 = math.exp %511 : vector<2x128xf32>
    %cst_175 = arith.constant 1.000000e+00 : f32
    %513 = vector.broadcast %cst_175 : f32 to vector<2x128xf32>
    %514 = arith.addf %513, %512 : vector<2x128xf32>
    %515 = arith.divf %513, %514 : vector<2x128xf32>
    %516 = vector.extract_strided_slice %503 {offsets = [0, 256], sizes = [2, 128], strides = [1, 1]} : vector<2x512xf32> to vector<2x128xf32>
    %517 = math.tanh %516 : vector<2x128xf32>
    %518 = vector.extract_strided_slice %503 {offsets = [0, 384], sizes = [2, 128], strides = [1, 1]} : vector<2x512xf32> to vector<2x128xf32>
    %519 = arith.negf %518 : vector<2x128xf32>
    %520 = math.exp %519 : vector<2x128xf32>
    %cst_176 = arith.constant 1.000000e+00 : f32
    %521 = vector.broadcast %cst_176 : f32 to vector<2x128xf32>
    %522 = arith.addf %521, %520 : vector<2x128xf32>
    %523 = arith.divf %521, %522 : vector<2x128xf32>
    %524 = arith.mulf %515, %497 : vector<2x128xf32>
    %525 = arith.mulf %509, %517 : vector<2x128xf32>
    %526 = arith.addf %524, %525 : vector<2x128xf32>
    %527 = math.tanh %526 : vector<2x128xf32>
    %528 = arith.mulf %523, %527 : vector<2x128xf32>
    %c7_177 = arith.constant 7 : index
    %c0_178 = arith.constant 0 : index
    %c0_179 = arith.constant 0 : index
    %529 = vector.load %arg11[%c7_177, %c0_178, %c0_179] : memref<8x2x512xf32, #tpu.memory_space<vmem>>, vector<1x2x512xf32>
    %530 = vector.shape_cast %529 : vector<1x2x512xf32> to vector<2x512xf32>
    %cst_180 = arith.constant dense<0.000000e+00> : vector<2x512xf32>
    %531 = tpu.matmul %528, %323, %cst_180 {dimension_numbers = #tpu.dot_dimension_numbers<[1], [0], [0], [1], [0, 0, 1, 1], [], []>} : vector<2x128xf32>, vector<128x512xf32>, vector<2x512xf32> -> vector<2x512xf32>
    %532 = arith.addf %530, %531 : vector<2x512xf32>
    %533 = vector.extract_strided_slice %532 {offsets = [0, 0], sizes = [2, 128], strides = [1, 1]} : vector<2x512xf32> to vector<2x128xf32>
    %534 = arith.negf %533 : vector<2x128xf32>
    %535 = math.exp %534 : vector<2x128xf32>
    %cst_181 = arith.constant 1.000000e+00 : f32
    %536 = vector.broadcast %cst_181 : f32 to vector<2x128xf32>
    %537 = arith.addf %536, %535 : vector<2x128xf32>
    %538 = arith.divf %536, %537 : vector<2x128xf32>
    %539 = vector.extract_strided_slice %532 {offsets = [0, 128], sizes = [2, 128], strides = [1, 1]} : vector<2x512xf32> to vector<2x128xf32>
    %540 = arith.negf %539 : vector<2x128xf32>
    %541 = math.exp %540 : vector<2x128xf32>
    %cst_182 = arith.constant 1.000000e+00 : f32
    %542 = vector.broadcast %cst_182 : f32 to vector<2x128xf32>
    %543 = arith.addf %542, %541 : vector<2x128xf32>
    %544 = arith.divf %542, %543 : vector<2x128xf32>
    %545 = vector.extract_strided_slice %532 {offsets = [0, 256], sizes = [2, 128], strides = [1, 1]} : vector<2x512xf32> to vector<2x128xf32>
    %546 = math.tanh %545 : vector<2x128xf32>
    %547 = vector.extract_strided_slice %532 {offsets = [0, 384], sizes = [2, 128], strides = [1, 1]} : vector<2x512xf32> to vector<2x128xf32>
    %548 = arith.negf %547 : vector<2x128xf32>
    %549 = math.exp %548 : vector<2x128xf32>
    %cst_183 = arith.constant 1.000000e+00 : f32
    %550 = vector.broadcast %cst_183 : f32 to vector<2x128xf32>
    %551 = arith.addf %550, %549 : vector<2x128xf32>
    %552 = arith.divf %550, %551 : vector<2x128xf32>
    %553 = arith.mulf %544, %526 : vector<2x128xf32>
    %554 = arith.mulf %538, %546 : vector<2x128xf32>
    %555 = arith.addf %553, %554 : vector<2x128xf32>
    %556 = math.tanh %555 : vector<2x128xf32>
    %557 = arith.mulf %552, %556 : vector<2x128xf32>
    %c0_184 = arith.constant 0 : index
    %c0_185 = arith.constant 0 : index
    %558 = vector.load %arg8[%c0_184, %c0_185] : memref<128x128xf32, #tpu.memory_space<vmem>>, vector<128x128xf32>
    %cst_186 = arith.constant dense<0.000000e+00> : vector<2x128xf32>
    %559 = tpu.matmul %557, %558, %cst_186 {dimension_numbers = #tpu.dot_dimension_numbers<[1], [0], [0], [1], [0, 0, 1, 1], [], []>} : vector<2x128xf32>, vector<128x128xf32>, vector<2x128xf32> -> vector<2x128xf32>
    %c0_187 = arith.constant 0 : index
    %c0_188 = arith.constant 0 : index
    %560 = vector.load %arg9[%c0_187, %c0_188] : memref<1x128xf32, #tpu.memory_space<vmem>>, vector<1x128xf32>
    %561 = vector.broadcast %560 : vector<1x128xf32> to vector<2x128xf32>
    %562 = arith.addf %559, %561 : vector<2x128xf32>
    %c0_189 = arith.constant 0 : index
    %c0_190 = arith.constant 0 : index
    %563 = vector.load %arg10[%c0_189, %c0_190] : memref<2x128xf32, #tpu.memory_space<vmem>>, vector<2x128xf32>
    tpu.vector_store %arg10[%c0_189, %c0_190], %562 {strides = array<i32>} : memref<2x128xf32, #tpu.memory_space<vmem>>, vector<2x128xf32>,
    return
  }
  func.func @transform_0(%arg0: i32) -> (i32, i32, i32) {
    %c0_i32 = arith.constant 0 : i32
    %c0_i32_0 = arith.constant 0 : i32
    %c0_i32_1 = arith.constant 0 : i32
    %c0_i32_2 = arith.constant 0 : i32
    return %c0_i32, %c0_i32_0, %c0_i32_1 : i32, i32, i32
  }
  func.func @transform_1(%arg0: i32) -> (i32, i32) {
    %c0_i32 = arith.constant 0 : i32
    %c0_i32_0 = arith.constant 0 : i32
    %c0_i32_1 = arith.constant 0 : i32
    return %c0_i32, %c0_i32_0 : i32, i32
  }
  func.func @transform_2(%arg0: i32) -> (i32, i32) {
    %c0_i32 = arith.constant 0 : i32
    %c0_i32_0 = arith.constant 0 : i32
    %c0_i32_1 = arith.constant 0 : i32
    return %c0_i32, %c0_i32_0 : i32, i32
  }
  func.func @transform_3(%arg0: i32) -> (i32, i32) {
    %c0_i32 = arith.constant 0 : i32
    %c0_i32_0 = arith.constant 0 : i32
    %c0_i32_1 = arith.constant 0 : i32
    return %c0_i32, %c0_i32_0 : i32, i32
  }
  func.func @transform_4(%arg0: i32) -> (i32, i32) {
    %c0_i32 = arith.constant 0 : i32
    %c0_i32_0 = arith.constant 0 : i32
    %c0_i32_1 = arith.constant 0 : i32
    return %c0_i32, %c0_i32_0 : i32, i32
  }
  func.func @transform_5(%arg0: i32) -> (i32, i32) {
    %c0_i32 = arith.constant 0 : i32
    %c0_i32_0 = arith.constant 0 : i32
    %c0_i32_1 = arith.constant 0 : i32
    return %c0_i32, %c0_i32_0 : i32, i32
  }
  func.func @transform_6(%arg0: i32) -> (i32, i32) {
    %c0_i32 = arith.constant 0 : i32
    %c0_i32_0 = arith.constant 0 : i32
    %c0_i32_1 = arith.constant 0 : i32
    return %c0_i32, %c0_i32_0 : i32, i32
  }
  func.func @transform_7(%arg0: i32) -> (i32, i32) {
    %c0_i32 = arith.constant 0 : i32
    %c0_i32_0 = arith.constant 0 : i32
    %c0_i32_1 = arith.constant 0 : i32
    return %c0_i32, %c0_i32_0 : i32, i32
  }
  func.func @transform_8(%arg0: i32) -> (i32, i32) {
    %c0_i32 = arith.constant 0 : i32
    %c0_i32_0 = arith.constant 0 : i32
    %c0_i32_1 = arith.constant 0 : i32
    return %c0_i32, %c0_i32_0 : i32, i32
  }
  func.func @transform_9(%arg0: i32) -> (i32, i32) {
    %c0_i32 = arith.constant 0 : i32
    %c0_i32_0 = arith.constant 0 : i32
    return %arg0, %c0_i32 : i32, i32
  }
}

</mosaic_0001>

<bundles_post_ra>
// kernel: sar_encoder_forward.1
= control target key start
LH: loop header
LB: loop body
LE: loop exit
PB: predicated region body
PF: predicated region fallthrough
CT: control target
= control target key end

     0   :  { %14 = vsyncpa [#allocation5], 0  ;;  %s8077_s0 = inlined_call_operand.vmem [shape: f32[2,128,32], index: 0, kind: input, shape index: {}]   ;;  %s8078_s1 = inlined_call_operand.hbm [shape: f32[128,512], index: 1, kind: input, shape index: {}]   ;;  %s8079_s2 = inlined_call_operand.hbm [shape: f32[128,512], index: 2, kind: input, shape index: {}]   ;;  %s8080_s3 = inlined_call_operand.vmem [shape: f32[1,512], index: 3, kind: input, shape index: {}]   ;;  %s8081_s4 = inlined_call_operand.hbm [shape: f32[128,512], index: 4, kind: input, shape index: {}]   ;;  %s8082_s5 = inlined_call_operand.hbm [shape: f32[128,512], index: 5, kind: input, shape index: {}]   ;;  %s8083_s6 = inlined_call_operand.vmem [shape: f32[1,512], index: 6, kind: input, shape index: {}]   ;;  %s8084_s7 = inlined_call_operand.vmem [shape: f32[128,128], index: 7, kind: input, shape index: {}]   ;;  %s8085_s8 = inlined_call_operand.vmem [shape: f32[1,128], index: 8, kind: input, shape index: {}]   ;;  %s8086_s9 = inlined_call_operand.hbm [shape: f32[2,128], index: 9, kind: output, shape index: {}]  }
   0x1   :  { %15 = vsyncpa [#allocation8], 0 }
   0x2   :  { %16 = vsyncpa [#allocation11], 0 }
   0x3   :  { %17 = vsyncpa [#allocation6], 0  ;;  %s5682_s30 = smov [#allocation7]   ;;  %s5683_s11 = smov [#allocation4]  }
   0x4   :  { %s37_s10 = sshll.u32 %s5682_s30, 4  ;;  %s25_s12 = sshll.u32 %s5683_s11, 4  ;;  %s38_s10 = int_to_ptr.vmem [resolvable:$true] %s37_s10  ;;  %s26_s12 = int_to_ptr.vmem [resolvable:$true] %s25_s12 }
   0x5   :  { %s5582_s13 = scalar_lea.vmem %s38_s10, 8192  ;;  %p5587_p1 = scmp.lt.s32.totalorder %s38_s10, %s38_s10 }
   0x6   :  { %p5583_p0 = scmp.ne.s32.totalorder %s38_s10, %s5582_s13  ;;  %p5588_p2 = scmp.lt.s32.totalorder %s5582_s13, %s5582_s13 }
   0x8   :  { %p5589_p3 = por %p5588_p2, %p5587_p1 }
   0xa   :  { %p5590_p4 = pnand %p5589_p3, %p5583_p0 }
   0xc   :  { %5593 = shalt.err (!%p5590_p4)
}
   0xd   :  { %s5684_s14 = smov 512   ;;  %s5685_s15 = smov 32  }
   0xe   :  { %43 = dma.hbm_to_vmem [thread:$0]  %s8079_s2, 8192, %s38_s10, [#allocation8], %s5684_s14, %s5684_s14, %s5685_s15  }
   0xf   :  { %s5602_s18 = scalar_lea.vmem %s26_s12, 8192  ;;  %p5607_p6 = scmp.lt.s32.totalorder %s26_s12, %s26_s12 }
  0x10   :  { %p5603_p5 = scmp.ne.s32.totalorder %s26_s12, %s5602_s18  ;;  %p5608_p7 = scmp.lt.s32.totalorder %s5602_s18, %s5602_s18 }
  0x12   :  { %p5609_p8 = por %p5608_p7, %p5607_p6 }
  0x14   :  { %p5610_p9 = pnand %p5609_p8, %p5603_p5 }
  0x16   :  { %5613 = shalt.err (!%p5610_p9)
}
  0x17   :  { %31 = dma.hbm_to_vmem [thread:$0]  %s8078_s1, 8192, %s26_s12, [#allocation5], %s5684_s14, %s5684_s14, %s5685_s15  }
  0x18   :  { %s5686_s21 = smov [#allocation9]   ;;  %s5687_s23 = smov [#allocation10]  }
  0x19   :  { %s51_s22 = sshll.u32 %s5686_s21, 4  ;;  %s63_s24 = sshll.u32 %s5687_s23, 4  ;;  %s52_s22 = int_to_ptr.vmem [resolvable:$true] %s51_s22  ;;  %s64_s24 = int_to_ptr.vmem [resolvable:$true] %s63_s24 }
  0x1a   :  { %s5622_s2 = scalar_lea.vmem %s52_s22, 8192  ;;  %p5627_p11 = scmp.lt.s32.totalorder %s52_s22, %s52_s22 }
  0x1b   :  { %p5623_p10 = scmp.ne.s32.totalorder %s52_s22, %s5622_s2  ;;  %p5628_p12 = scmp.lt.s32.totalorder %s5622_s2, %s5622_s2 }
  0x1d   :  { %p5629_p13 = por %p5628_p12, %p5627_p11 }
  0x1f   :  { %p5630_p0 = pnand %p5629_p13, %p5623_p10 }
  0x21   :  { %5633 = shalt.err (!%p5630_p0)
}
  0x22   :  { %57 = dma.hbm_to_vmem [thread:$0]  %s8081_s4, 8192, %s52_s22, [#allocation8], %s5684_s14, %s5684_s14, %s5685_s15  }
  0x23   :  { %s5642_s1 = scalar_lea.vmem %s64_s24, 8192  ;;  %p5647_p2 = scmp.lt.s32.totalorder %s64_s24, %s64_s24 }
  0x24   :  { %p5643_p1 = scmp.ne.s32.totalorder %s64_s24, %s5642_s1  ;;  %p5648_p3 = scmp.lt.s32.totalorder %s5642_s1, %s5642_s1 }
  0x26   :  { %p5649_p4 = por %p5648_p3, %p5647_p2 }
  0x28   :  { %p5650_p5 = pnand %p5649_p4, %p5643_p1 }
  0x2a   :  { %5653 = shalt.err (!%p5650_p5)
}
  0x2b   :  { %69 = dma.hbm_to_vmem [thread:$0]  %s8082_s5, 8192, %s64_s24, [#allocation11], %s5684_s14, %s5684_s14, %s5685_s15  }
  0x2c   :  { %5674 = dma.done.wait [#allocation5], 8192  }
  0x2d   :  { %5675 = vsyncadd [#allocation5], 4294959104 }
  0x2e   :  { %5676 = dma.done.wait [#allocation8], 16384  }
  0x2f   :  { %5677 = vsyncadd [#allocation8], 4294950912 }
  0x30   :  { %5678 = dma.done.wait [#allocation11], 8192  }
  0x31   :  { %5679 = vsyncadd [#allocation11], 4294959104  ;;  %v5772_v0 = vld [vmem:[%s8077_s0 + $0x10] sm:$0xff]  ;;  %v5777_v1 = vld [vmem:[%s8077_s0 + $0x18] sm:$0xff]  ;;  %s5688_s14 = smov 120   ;;  %s5689_s19 = smov 104  }
  0x32   :  { %v5782_v2 = vld [vmem:[%s8077_s0] sm:$0xff]  ;;  %v4923_v3 = vpack.i.bf16 %v5777_v1, %v5772_v0  ;;  %v5789_v4 = vld [vmem:[%s8077_s0 + $0x8] sm:$0xff]  ;;  %s5690_s20 = smov 112   ;;  %v5814_v9 = vld [vmem:[%s8077_s0 + $0x30] sm:$0xff]  ;;  %vm887_vm0 = vcmask 1041409   ;;  %vm889_vm1 = vcmask 1043459  }
  0x33   :  { %v4913_v5 = vpack.i.bf16 %v5789_v4, %v5782_v2  ;;  %v5798_v6 = vld [vmem:[%s8077_s0 + $0x20] sm:$0xff]  ;;  %v5803_v7 = vld [vmem:[%s8077_s0 + $0x28] sm:$0xff]  ;;  %v5819_v10 = vld [vmem:[%s8077_s0 + $0x38] sm:$0xff]  ;;  %vm891_vm2 = vcmask 1045509   ;;  %vm893_vm3 = vcmask 1047559   ;;  %vm5693_vm4 = vmmov 0  }
  0x34   :  { %4924 = vrot.lane.b32.xlu1 %v4923_v3, %s5688_s14  ;;  %v4938_v8 = vpack.i.bf16 %v5803_v7, %v5798_v6  ;;  %v4953_v11 = vpack.i.bf16 %v5819_v10, %v5814_v9  ;;  %v5828_v12 = vld [vmem:[%s8077_s0 + $0x40] sm:$0xff]  ;;  %v5833_v13 = vld [vmem:[%s8077_s0 + $0x48] sm:$0xff]  ;;  %v5844_v15 = vld [vmem:[%s8077_s0 + $0x50] sm:$0xff]  ;;  %s5694_s29 = smov [#allocation12]  }
  0x35   :  { %4914 = vrot.lane.b32.xlu0 %v4913_v5, %s5688_s14  ;;  %v4968_v14 = vpack.i.bf16 %v5833_v13, %v5828_v12  ;;  %v5849_v16 = vld [vmem:[%s8077_s0 + $0x58] sm:$0xff]  ;;  %v5858_v18 = vld [vmem:[%s8077_s0 + $0x60] sm:$0xff]  ;;  %v5872_v21 = vld [vmem:[%s8077_s0 + $0x68] sm:$0xff]  ;;  %s4788_s30 = sshll.u32 %s5694_s29, 4  ;;  %s4789_s30 = int_to_ptr.vmem [resolvable:$true] %s4788_s30 }
  0x36   :  { %v4983_v17 = vpack.i.bf16 %v5849_v16, %v5844_v15  ;;  %v5863_v19 = vld [vmem:[%s8077_s0 + $0x80] sm:$0xff]  ;;  %8342 = vst [vmem:[#allocation17_spill] sm:$0xff] %v5872_v21  ;;  %v5877_v22 = vld [vmem:[%s8077_s0 + $0x88] sm:$0xff]  ;;  %v5886_v24 = vld [vmem:[%s8077_s0 + $0x70] sm:$0xff]  ;;  %s5654_s10 = scalar_lea.vmem %s4789_s30, 32  ;;  %p5659_p7 = scmp.lt.s32.totalorder %s4789_s30, %s4789_s30 }
  0x37   :  { %v4998_v20 = vpack.i.bf16 %v5858_v18, %v5863_v19  ;;  %v5008_v23 = vpack.i.bf16 %v5872_v21, %v5877_v22  ;;  %8343 = vst [vmem:[#allocation18_spill] sm:$0xff] %v5886_v24  ;;  %v5891_v25 = vld [vmem:[%s8077_s0 + $0x90] sm:$0xff]  ;;  %v5902_v27 = vld [vmem:[%s8077_s0 + $0x78] sm:$0xff]  ;;  %v5916_v30 = vld [vmem:[%s8077_s0 + $0xa0] sm:$0xff]  ;;  %p5655_p6 = scmp.ne.s32.totalorder %s4789_s30, %s5654_s10  ;;  %p5660_p8 = scmp.lt.s32.totalorder %s5654_s10, %s5654_s10 }
  0x38   :  { %4929 = vrot.lane.b32.xlu1 %v4913_v5, %s5689_s19  ;;  %v5018_v26 = vpack.i.bf16 %v5886_v24, %v5891_v25  ;;  %8344 = vst [vmem:[#allocation19_spill] sm:$0xff] %v5902_v27  ;;  %v5907_v28 = vld [vmem:[%s8077_s0 + $0x98] sm:$0xff]  ;;  %v5921_v31 = vld [vmem:[%s8077_s0 + $0xa8] sm:$0xff]  ;;  %v5934_v33 = vld [vmem:[%s8077_s0 + $0xb0] sm:$0xff] }
  0x39   :  { %4919 = vrot.lane.b32.xlu0 %v4913_v5, %s5690_s20  ;;  %v5033_v29 = vpack.i.bf16 %v5902_v27, %v5907_v28  ;;  %v5048_v32 = vpack.i.bf16 %v5921_v31, %v5916_v30  ;;  %v5939_v34 = vld [vmem:[%s8077_s0 + $0xb8] sm:$0xff]  ;;  %v5948_v36 = vld [vmem:[%s8077_s0 + $0xc0] sm:$0xff]  ;;  %v5953_v37 = vld [vmem:[%s8077_s0 + $0xc8] sm:$0xff]  ;;  %p5661_p9 = por %p5660_p8, %p5659_p7 }
  0x3a   :  { %v5073_v35 = vpack.i.bf16 %v5939_v34, %v5934_v33  ;;  %v5088_v38 = vpack.i.bf16 %v5953_v37, %v5948_v36  ;;  %v5964_v39 = vld [vmem:[%s8077_s0 + $0xd0] sm:$0xff]  ;;  %v5969_v40 = vld [vmem:[%s8077_s0 + $0xd8] sm:$0xff]  ;;  %v5978_v42 = vld [vmem:[%s8077_s0 + $0xe0] sm:$0xff] }
  0x3b   :  { %v5103_v41 = vpack.i.bf16 %v5969_v40, %v5964_v39  ;;  %v5983_v43 = vld [vmem:[%s8077_s0 + $0xe8] sm:$0xff]  ;;  %v5994_v45 = vld [vmem:[%s8077_s0 + $0xf0] sm:$0xff]  ;;  %v5999_v46 = vld [vmem:[%s8077_s0 + $0xf8] sm:$0xff]  ;;  %p5662_p10 = pnand %p5661_p9, %p5655_p6 }
  0x3c   :  { %4939 = vrot.lane.b32.xlu1 %v4938_v8, %s5688_s14  ;;  %v5118_v44 = vpack.i.bf16 %v5983_v43, %v5978_v42  ;;  %8345 = vst [vmem:[#allocation20_spill] sm:$0xff] %v5994_v45  ;;  %8346 = vst [vmem:[#allocation21_spill] sm:$0xff] %v5999_v46  ;;  %v5133_v47 = vpack.i.bf16 %v5999_v46, %v5994_v45  ;;  %v661_v48 = vld [vmem:[#allocation4 + $0x1e8] sm:$0xff]  ;;  %v663_v49 = vld [vmem:[#allocation4 + $0x1f8] sm:$0xff] }
  0x3d   :  { %4934 = vrot.lane.b32.xlu0 %v4923_v3, %s5690_s20  ;;  %v660_v50 = vld [vmem:[#allocation4 + $0x1e0] sm:$0xff]  ;;  %686 = vmatprep.subr.mxu0 %v661_v48  ;;  %v662_v51 = vld [vmem:[#allocation4 + $0x1f0] sm:$0xff]  ;;  %v657_v52 = vld [vmem:[#allocation4 + $0x1c8] sm:$0xff] }
  0x3e   :  { %763 = vmatprep.subr.mxu1 %v663_v49  ;;  %v659_v53 = vld [vmem:[#allocation4 + $0x1d8] sm:$0xff]  ;;  %687 = vmatpush1.msra.mxu0 %v660_v50  ;;  %v656_v54 = vld [vmem:[#allocation4 + $0x1c0] sm:$0xff]  ;;  %v658_v55 = vld [vmem:[#allocation4 + $0x1d0] sm:$0xff] }
  0x3f   :  { %764 = vmatpush1.msra.mxu1 %v662_v51  ;;  %v653_v56 = vld [vmem:[#allocation4 + $0x1a8] sm:$0xff]  ;;  %688 = vmatprep.subr.mxu0 %v657_v52  ;;  %v655_v57 = vld [vmem:[#allocation4 + $0x1b8] sm:$0xff]  ;;  %v652_v58 = vld [vmem:[#allocation4 + $0x1a0] sm:$0xff] }
  0x40   :  { %4949 = vrot.lane.b32.xlu1 %v4938_v8, %s5690_s20  ;;  %765 = vmatprep.subr.mxu1 %v659_v53  ;;  %v654_v59 = vld [vmem:[#allocation4 + $0x1b0] sm:$0xff]  ;;  %v649_v60 = vld [vmem:[#allocation4 + $0x188] sm:$0xff]  ;;  %v651_v61 = vld [vmem:[#allocation4 + $0x198] sm:$0xff] }
  0x41   :  { %4944 = vrot.lane.b32.xlu0 %v4923_v3, %s5689_s19  ;;  %689 = vmatpush1.msra.mxu0 %v656_v54  ;;  %v648_v62 = vld [vmem:[#allocation4 + $0x180] sm:$0xff]  ;;  %v650_v63 = vld [vmem:[#allocation4 + $0x190] sm:$0xff]  ;;  %v645_v3 = vld [vmem:[#allocation4 + $0x168] sm:$0xff] }
  0x42   :  { %766 = vmatpush1.msra.mxu1 %v658_v55  ;;  %690 = vmatprep.subr.mxu0 %v653_v56  ;;  %v647_v5 = vld [vmem:[#allocation4 + $0x178] sm:$0xff]  ;;  %v632_v48 = vld [vmem:[#allocation4 + $0x100] sm:$0xff]  ;;  %v634_v49 = vld [vmem:[#allocation4 + $0x110] sm:$0xff] }
  0x43   :  { %767 = vmatprep.subr.mxu1 %v655_v57  ;;  %691 = vmatpush1.msra.mxu0 %v652_v58  ;;  %v629_v50 = vld [vmem:[#allocation4 + $0xe8] sm:$0xff]  ;;  %v631_v51 = vld [vmem:[#allocation4 + $0xf8] sm:$0xff]  ;;  %v628_v52 = vld [vmem:[#allocation4 + $0xe0] sm:$0xff] }
  0x44   :  { %4959 = vrot.lane.b32.xlu1 %v4938_v8, %s5689_s19  ;;  %768 = vmatpush1.msra.mxu1 %v654_v59  ;;  %v644_v8 = vld [vmem:[#allocation4 + $0x160] sm:$0xff]  ;;  %v630_v53 = vld [vmem:[#allocation4 + $0xf0] sm:$0xff]  ;;  %v625_v55 = vld [vmem:[#allocation4 + $0xc8] sm:$0xff] }
  0x45   :  { %4954 = vrot.lane.b32.xlu0 %v4953_v11, %s5688_s14  ;;  %692 = vmatprep.subr.mxu0 %v649_v60  ;;  %v627_v56 = vld [vmem:[#allocation4 + $0xd8] sm:$0xff]  ;;  %v624_v58 = vld [vmem:[#allocation4 + $0xc0] sm:$0xff]  ;;  %v626_v59 = vld [vmem:[#allocation4 + $0xd0] sm:$0xff] }
  0x46   :  { %769 = vmatprep.subr.mxu1 %v651_v61  ;;  %693 = vmatpush1.msra.mxu0 %v648_v62  ;;  %v621_v60 = vld [vmem:[#allocation4 + $0xa8] sm:$0xff]  ;;  %v623_v61 = vld [vmem:[#allocation4 + $0xb8] sm:$0xff]  ;;  %v620_v62 = vld [vmem:[#allocation4 + $0xa0] sm:$0xff] }
  0x47   :  { %770 = vmatpush1.msra.mxu1 %v650_v63  ;;  %694 = vmatprep.subr.mxu0 %v645_v3  ;;  %v622_v63 = vld [vmem:[#allocation4 + $0xb0] sm:$0xff] }
  0x48   :  { %4969 = vrot.lane.b32.xlu1 %v4968_v14, %s5688_s14  ;;  %771 = vmatprep.subr.mxu1 %v647_v5  ;;  %v617_v5 = vld [vmem:[#allocation4 + $0x88] sm:$0xff] }
  0x49   :  { %4964 = vrot.lane.b32.xlu0 %v4953_v11, %s5690_s20  ;;  %695 = vmatpush1.msra.mxu0 %v644_v8  ;;  %v619_v8 = vld [vmem:[#allocation4 + $0x98] sm:$0xff] }
  0x4c   :  { %4979 = vrot.lane.b32.xlu1 %v4968_v14, %s5690_s20 }
  0x4d   :  { %4974 = vrot.lane.b32.xlu0 %v4953_v11, %s5689_s19  ;;  %v646_v11 = vld [vmem:[#allocation4 + $0x170] sm:$0xff] }
  0x4e   :  { %772 = vmatpush1.msra.mxu1 %v646_v11 }
  0x50   :  { %4989 = vrot.lane.b32.xlu1 %v4968_v14, %s5689_s19  ;;  %v641_v14 = vld [vmem:[#allocation4 + $0x148] sm:$0xff] }
  0x51   :  { %4984 = vrot.lane.b32.xlu0 %v4983_v17, %s5688_s14  ;;  %696 = vmatprep.subr.mxu0 %v641_v14  ;;  %v616_v14 = vld [vmem:[#allocation4 + $0x80] sm:$0xff] }
  0x54   :  { %4999 = vrot.lane.b32.xlu1 %v4998_v20, %s5688_s14 }
  0x55   :  { %4994 = vrot.lane.b32.xlu0 %v4983_v17, %s5690_s20 }
  0x58   :  { %5009 = vrot.lane.b32.xlu1 %v5008_v23, %s5688_s14 }
  0x59   :  { %5004 = vrot.lane.b32.xlu0 %v4983_v17, %s5689_s19  ;;  %v643_v17 = vld [vmem:[#allocation4 + $0x158] sm:$0xff] }
  0x5a   :  { %773 = vmatprep.subr.mxu1 %v643_v17  ;;  %v618_v17 = vld [vmem:[#allocation4 + $0x90] sm:$0xff] }
  0x5c   :  { %5019 = vrot.lane.b32.xlu1 %v5018_v26, %s5688_s14 }
  0x5d   :  { %5014 = vrot.lane.b32.xlu0 %v4998_v20, %s5690_s20 }
  0x60   :  { %5029 = vrot.lane.b32.xlu1 %v4998_v20, %s5689_s19  ;;  %v640_v20 = vld [vmem:[#allocation4 + $0x140] sm:$0xff] }
  0x61   :  { %5024 = vrot.lane.b32.xlu0 %v5008_v23, %s5690_s20  ;;  %697 = vmatpush1.msra.mxu0 %v640_v20  ;;  %v613_v20 = vld [vmem:[#allocation4 + $0x68] sm:$0xff] }
  0x64   :  { %5039 = vrot.lane.b32.xlu1 %v5018_v26, %s5690_s20 }
  0x65   :  { %5034 = vrot.lane.b32.xlu0 %v5033_v29, %s5688_s14 }
  0x68   :  { %5049 = vrot.lane.b32.xlu1 %v5048_v32, %s5688_s14 }
  0x69   :  { %5044 = vrot.lane.b32.xlu0 %v5008_v23, %s5689_s19  ;;  %v642_v23 = vld [vmem:[#allocation4 + $0x150] sm:$0xff] }
  0x6a   :  { %774 = vmatpush1.msra.mxu1 %v642_v23  ;;  %v615_v23 = vld [vmem:[#allocation4 + $0x78] sm:$0xff] }
  0x6c   :  { %5059 = vrot.lane.b32.xlu1 %v5018_v26, %s5689_s19  ;;  %v637_v26 = vld [vmem:[#allocation4 + $0x128] sm:$0xff] }
  0x6d   :  { %5054 = vrot.lane.b32.xlu0 %v5033_v29, %s5690_s20  ;;  %698 = vmatprep.subr.mxu0 %v637_v26  ;;  %v612_v26 = vld [vmem:[#allocation4 + $0x60] sm:$0xff] }
  0x70   :  { %5069 = vrot.lane.b32.xlu1 %v5033_v29, %s5689_s19  ;;  %v639_v29 = vld [vmem:[#allocation4 + $0x138] sm:$0xff] }
  0x71   :  { %5064 = vrot.lane.b32.xlu0 %v5048_v32, %s5690_s20  ;;  %775 = vmatprep.subr.mxu1 %v639_v29  ;;  %v614_v29 = vld [vmem:[#allocation4 + $0x70] sm:$0xff] }
  0x74   :  { %5079 = vrot.lane.b32.xlu1 %v5048_v32, %s5689_s19  ;;  %v636_v32 = vld [vmem:[#allocation4 + $0x120] sm:$0xff] }
  0x75   :  { %5074 = vrot.lane.b32.xlu0 %v5073_v35, %s5688_s14  ;;  %699 = vmatpush1.msra.mxu0 %v636_v32 }
  0x78   :  { %5089 = vrot.lane.b32.xlu1 %v5088_v38, %s5688_s14 }
  0x79   :  { %5084 = vrot.lane.b32.xlu0 %v5073_v35, %s5690_s20 }
  0x7c   :  { %5099 = vrot.lane.b32.xlu1 %v5088_v38, %s5690_s20 }
  0x7d   :  { %5094 = vrot.lane.b32.xlu0 %v5073_v35, %s5689_s19  ;;  %v638_v35 = vld [vmem:[#allocation4 + $0x130] sm:$0xff] }
  0x7e   :  { %776 = vmatpush1.msra.mxu1 %v638_v35  ;;  %v609_v35 = vld [vmem:[#allocation4 + $0x48] sm:$0xff] }
  0x80   :  { %5109 = vrot.lane.b32.xlu1 %v5088_v38, %s5689_s19 }
  0x81   :  { %5104 = vrot.lane.b32.xlu0 %v5103_v41, %s5688_s14 }
  0x84   :  { %5119 = vrot.lane.b32.xlu1 %v5118_v44, %s5688_s14 }
  0x85   :  { %5114 = vrot.lane.b32.xlu0 %v5103_v41, %s5690_s20 }
  0x88   :  { %5129 = vrot.lane.b32.xlu1 %v5118_v44, %s5690_s20 }
  0x89   :  { %5124 = vrot.lane.b32.xlu0 %v5103_v41, %s5689_s19  ;;  %v633_v41 = vld [vmem:[#allocation4 + $0x108] sm:$0xff] }
  0x8a   :  { %700 = vmatprep.subr.mxu0 %v633_v41  ;;  %v611_v41 = vld [vmem:[#allocation4 + $0x58] sm:$0xff] }
  0x8b   :  { %701 = vmatpush1.msra.mxu0 %v632_v48  ;;  %v608_v48 = vld [vmem:[#allocation4 + $0x40] sm:$0xff] }
  0x8c   :  { %5139 = vrot.lane.b32.xlu1 %v5118_v44, %s5689_s19  ;;  %v635_v44 = vld [vmem:[#allocation4 + $0x118] sm:$0xff]  ;;  %702 = vmatprep.subr.mxu0 %v629_v50  ;;  %v605_v50 = vld [vmem:[#allocation4 + $0x28] sm:$0xff] }
  0x8d   :  { %5134 = vrot.lane.b32.xlu0 %v5133_v47, %s5688_s14  ;;  %777 = vmatprep.subr.mxu1 %v635_v44 }
  0x8e   :  { %778 = vmatpush1.msra.mxu1 %v634_v49  ;;  %703 = vmatpush1.msra.mxu0 %v628_v52  ;;  %v610_v49 = vld [vmem:[#allocation4 + $0x50] sm:$0xff]  ;;  %v604_v52 = vld [vmem:[#allocation4 + $0x20] sm:$0xff] }
  0x8f   :  { %779 = vmatprep.subr.mxu1 %v631_v51  ;;  %704 = vmatprep.subr.mxu0 %v625_v55  ;;  %v607_v51 = vld [vmem:[#allocation4 + $0x38] sm:$0xff] }
  0x90   :  { %5149 = vrot.lane.b32.xlu1 %v5133_v47, %s5689_s19  ;;  %780 = vmatpush1.msra.mxu1 %v630_v53  ;;  %v606_v53 = vld [vmem:[#allocation4 + $0x30] sm:$0xff] }
  0x91   :  { %5144 = vrot.lane.b32.xlu0 %v5133_v47, %s5690_s20  ;;  %781 = vmatprep.subr.mxu1 %v627_v56  ;;  %v601_v56 = vld [vmem:[#allocation4 + $0x8] sm:$0xff] }
  0x92   :  { %705 = vmatpush1.msra.mxu0 %v624_v58  ;;  %782 = vmatpush1.msra.mxu1 %v626_v59  ;;  %v603_v58 = vld [vmem:[#allocation4 + $0x18] sm:$0xff] }
  0x93   :  { %706 = vmatprep.subr.mxu0 %v621_v60  ;;  %783 = vmatprep.subr.mxu1 %v623_v61 }
  0x94   :  { %707 = vmatpush1.msra.mxu0 %v620_v62  ;;  %784 = vmatpush1.msra.mxu1 %v622_v63 }
  0x95   :  { %708 = vmatprep.subr.mxu0 %v617_v5  ;;  %785 = vmatprep.subr.mxu1 %v619_v8 }
  0x96   :  { %709 = vmatpush1.msra.mxu0 %v616_v14  ;;  %786 = vmatpush1.msra.mxu1 %v618_v17 }
  0x97   :  { %710 = vmatprep.subr.mxu0 %v613_v20  ;;  %787 = vmatprep.subr.mxu1 %v615_v23 }
  0x98   :  { %711 = vmatpush1.msra.mxu0 %v612_v26  ;;  %788 = vmatpush1.msra.mxu1 %v614_v29 }
  0x99   :  { %712 = vmatprep.subr.mxu0 %v609_v35  ;;  %789 = vmatprep.subr.mxu1 %v611_v41 }
  0x9a   :  { %713 = vmatpush1.msra.mxu0 %v608_v48  ;;  %790 = vmatpush1.msra.mxu1 %v610_v49 }
  0x9b   :  { %714 = vmatprep.subr.mxu0 %v605_v50  ;;  %791 = vmatprep.subr.mxu1 %v607_v51 }
  0x9c   :  { %715 = vmatpush1.msra.mxu0 %v604_v52  ;;  %792 = vmatpush1.msra.mxu1 %v606_v53 }
  0x9d   :  { %716 = vmatprep.subr.mxu0 %v601_v56  ;;  %793 = vmatprep.subr.mxu1 %v603_v58 }
  0xa6   :  { %v6009_v38 = vpop.permute.xlu1 %4924 }
  0xa7   :  { %v6011_v47 = vpop.permute.xlu0 %4914 }
  0xa8   :  { %v4916_v23 = vunpack.i.l.bf16 %v6011_v47  ;;  %v4917_v46 = vunpack.i.h.bf16 %v6011_v47 }
  0xaa   :  { %v6013_v54 = vpop.permute.xlu1 %4929  ;;  %v248_v48 = vmax.f32 %v5782_v2, %v4916_v23 }
  0xab   :  { %v6015_v57 = vpop.permute.xlu0 %4919  ;;  %v4931_v56 = vunpack.i.l.bf16 %v6013_v54 }
  0xac   :  { %v4921_v29 = vunpack.i.l.bf16 %v6015_v57  ;;  %v4922_v23 = vunpack.i.h.bf16 %v6015_v57 }
  0xae   :  { %v6017_v3 = vpop.permute.xlu1 %4939  ;;  %v376_v51 = vmax.f32 %v248_v48, %v4921_v29  ;;  %v249_v48 = vmax.f32 %v5789_v4, %v4917_v46 }
  0xaf   :  { %v6019_v11 = vpop.permute.xlu0 %4934 }
  0xb0   :  { %v504_v21 = vmax.f32 %v376_v51, %v4931_v56  ;;  %v377_v47 = vmax.f32 %v249_v48, %v4922_v23  ;;  %v600_v51 = vld [vmem:[#allocation4] sm:$0xff]  ;;  %v602_v56 = vld [vmem:[#allocation4 + $0x10] sm:$0xff]  ;;  %v8095_v48 = vmov 0.0  }
  0xb1   :  { %717 = vmatpush1.msra.mxu0 %v600_v51  ;;  %794 = vmatpush1.msra.mxu1 %v602_v56 }
  0xb2   :  { %v6021_v32 = vpop.permute.xlu1 %4949  ;;  %750 = vmatprep.mubr.f32.mxu0 %v8095_v48  ;;  %827 = vmatprep.mubr.f32.mxu1 %v8095_v48 }
  0xb3   :  { %v6023_v44 = vpop.permute.xlu0 %4944 }
  0xb6   :  { %v6025_v55 = vpop.permute.xlu1 %4959 }
  0xb7   :  { %v6027_v59 = vpop.permute.xlu0 %4954 }
  0xba   :  { %v6029_v60 = vpop.permute.xlu1 %4969 }
  0xbb   :  { %v6031_v61 = vpop.permute.xlu0 %4964 }
  0xbe   :  { %v6033_v62 = vpop.permute.xlu1 %4979 }
  0xbf   :  { %v6035_v63 = vpop.permute.xlu0 %4974 }
  0xc2   :  { %v6037_v5 = vpop.permute.xlu1 %4989 }
  0xc3   :  { %v6039_v8 = vpop.permute.xlu0 %4984 }
  0xc6   :  { %v6041_v14 = vpop.permute.xlu1 %4999 }
  0xc7   :  { %v6043_v17 = vpop.permute.xlu0 %4994  ;;  %v5001_v35 = vunpack.i.l.bf16 %v6041_v14 }
  0xc9   :  { %v264_v52 = vmax.f32 %v5863_v19, %v5001_v35 }
  0xca   :  { %v6045_v20 = vpop.permute.xlu1 %5009 }
  0xcb   :  { %v6048_v26 = vpop.permute.xlu0 %5004  ;;  %v5011_v45 = vunpack.i.l.bf16 %v6045_v20 }
  0xce   :  { %v6052_v41 = vpop.permute.xlu1 %5019 }
  0xcf   :  { %8347 = vst [vmem:[#allocation22_spill] sm:$0xff] %v6052_v41  ;;  %v6055_v49 = vpop.permute.xlu0 %5014 }
  0xd0   :  { %v5016_v50 = vunpack.i.l.bf16 %v6055_v49 }
  0xd2   :  { %v6059_v53 = vpop.permute.xlu1 %5029  ;;  %v392_v58 = vmax.f32 %v264_v52, %v5016_v50  ;;  %v4926_v52 = vunpack.i.l.bf16 %v6009_v38 }
  0xd3   :  { %8348 = vst [vmem:[#allocation23_spill] sm:$0xff] %v6059_v53  ;;  %v5031_v27 = vunpack.i.l.bf16 %v6059_v53  ;;  %v6063_v24 = vpop.permute.xlu0 %5024  ;;  %v5021_v53 = vunpack.i.l.bf16 %v6052_v41 }
  0xd4   :  { %8349 = vst [vmem:[#allocation24_spill] sm:$0xff] %v6063_v24  ;;  %v5026_v50 = vunpack.i.l.bf16 %v6063_v24 }
  0xd5   :  { %v520_v2 = vmax.f32 %v392_v58, %v5031_v27  ;;  %v265_v27 = vmax.f32 %v5877_v22, %v5011_v45  ;;  %v4927_v58 = vunpack.i.h.bf16 %v6009_v38  ;;  %v4932_v22 = vunpack.i.h.bf16 %v6013_v54 }
  0xd6   :  { %v6068_v29 = vpop.permute.xlu1 %5039  ;;  %v250_v38 = vmax.f32 %v5772_v0, %v4926_v52  ;;  %v266_v51 = vmax.f32 %v5891_v25, %v5021_v53  ;;  %v4941_v25 = vunpack.i.l.bf16 %v6017_v3  ;;  %v4947_v53 = vunpack.i.h.bf16 %v6023_v44 }
  0xd7   :  { %8350 = vst [vmem:[#allocation25_spill] sm:$0xff] %v6068_v29  ;;  %v6070_v19 = vpop.permute.xlu0 %5034  ;;  %v5153_v35 = vpack.i.bf16 %v520_v2, %v504_v21  ;;  %v4936_v21 = vunpack.i.l.bf16 %v6019_v11  ;;  %v5041_v4 = vunpack.i.l.bf16 %v6068_v29  ;;  %v6084_v2 = vld [vmem:[#allocation7 + $0x1e8] sm:$0xff]  ;;  %v393_v45 = vmax.f32 %v265_v27, %v5026_v50 }
  0xd8   :  { %8352 = vst [vmem:[#allocation27_spill] sm:$0xff] %v6084_v2  ;;  %v4946_v29 = vunpack.i.l.bf16 %v6023_v44  ;;  %v5036_v56 = vunpack.i.l.bf16 %v6070_v19  ;;  %1070 = vmatprep.subr.mxu0 %v6084_v2  ;;  %v505_v54 = vmax.f32 %v377_v47, %v4932_v22  ;;  %v4937_v50 = vunpack.i.h.bf16 %v6019_v11 }
  0xd9   :  { %5154 = vxpose.xlu0.b32.start [1/16] (narrow) %v5153_v35, 8  ;;  %v6086_v35 = vld [vmem:[#allocation7 + $0x1f8] sm:$0xff]  ;;  %v251_v48 = vmax.f32 %v5777_v1, %v4927_v58  ;;  %v378_v41 = vmax.f32 %v250_v38, %v4936_v21  ;;  %v394_v0 = vmax.f32 %v266_v51, %v5041_v4  ;;  %v4951_v21 = vunpack.i.l.bf16 %v6021_v32 }
  0xda   :  { %v6077_v57 = vpop.permute.xlu1 %5049  ;;  %8353 = vst [vmem:[#allocation28_spill] sm:$0xff] %v6086_v35  ;;  %1141 = vmatprep.subr.mxu1 %v6086_v35  ;;  %v267_v11 = vmax.f32 %v5907_v28, %v5036_v56  ;;  %v4942_v2 = vunpack.i.h.bf16 %v6017_v3 }
  0xdb   :  { %v6082_v46 = vpop.permute.xlu0 %5044  ;;  %v506_v22 = vmax.f32 %v378_v41, %v4946_v29  ;;  %v379_v1 = vmax.f32 %v251_v48, %v4937_v50  ;;  %v252_v41 = vmax.f32 %v5798_v6, %v4941_v25  ;;  %v5052_v28 = vunpack.i.h.bf16 %v6077_v57 }
  0xdc   :  { %8351 = vst [vmem:[#allocation26_spill] sm:$0xff] %v6082_v46  ;;  %v5046_v23 = vunpack.i.l.bf16 %v6082_v46  ;;  %v4961_v48 = vunpack.i.l.bf16 %v6025_v55  ;;  %v253_v6 = vmax.f32 %v5803_v7, %v4942_v2 }
  0xdd   :  { %v507_v56 = vmax.f32 %v379_v1, %v4947_v53  ;;  %v269_v25 = vmax.f32 %v5921_v31, %v5052_v28  ;;  %v4966_v1 = vunpack.i.l.bf16 %v6031_v61 }
  0xde   :  { %v521_v27 = vmax.f32 %v393_v45, %v5046_v23  ;;  %v6099_v46 = vpop.permute.xlu1 %5059  ;;  %v5051_v45 = vunpack.i.l.bf16 %v6077_v57  ;;  %v4956_v57 = vunpack.i.l.bf16 %v6027_v59 }
  0xdf   :  { %v5061_v52 = vunpack.i.l.bf16 %v6099_v46  ;;  %v6103_v24 = vpop.permute.xlu0 %5054 }
  0xe0   :  { %v5056_v35 = vunpack.i.l.bf16 %v6103_v24  ;;  %v5155_v47 = vpack.i.bf16 %v521_v27, %v505_v54  ;;  %v268_v54 = vmax.f32 %v5916_v30, %v5051_v45  ;;  %v4952_v27 = vunpack.i.h.bf16 %v6021_v32 }
  0xe1   :  { %v522_v23 = vmax.f32 %v394_v0, %v5061_v52  ;;  %v380_v52 = vmax.f32 %v252_v41, %v4951_v21  ;;  %v4962_v30 = vunpack.i.h.bf16 %v6025_v55  ;;  %v4957_v32 = vunpack.i.h.bf16 %v6027_v59 }
  0xe2   :  { %5156 = vxpose.xlu0.b32.cont [2/16] (narrow) %v5155_v47, 8  ;;  %v6110_v58 = vpop.permute.xlu1 %5069  ;;  %v395_v4 = vmax.f32 %v267_v11, %v5056_v35  ;;  %v254_v31 = vmax.f32 %v5814_v9, %v4956_v57  ;;  %v4967_v59 = vunpack.i.h.bf16 %v6031_v61  ;;  %v4972_v61 = vunpack.i.h.bf16 %v6029_v60 }
  0xe3   :  { %v5071_v38 = vunpack.i.l.bf16 %v6110_v58  ;;  %v5065_v51 = vpop.permute.xlu0 %5064  ;;  %v5157_v44 = vpack.i.bf16 %v522_v23, %v506_v22  ;;  %v508_v45 = vmax.f32 %v380_v52, %v4961_v48  ;;  %v4971_v57 = vunpack.i.l.bf16 %v6029_v60 }
  0xe4   :  { %v5066_v29 = vunpack.i.l.bf16 %v5065_v51  ;;  %v5067_v35 = vunpack.i.h.bf16 %v5065_v51  ;;  %v381_v51 = vmax.f32 %v253_v6, %v4952_v27  ;;  %v382_v48 = vmax.f32 %v254_v31, %v4966_v1 }
  0xe5   :  { %v523_v50 = vmax.f32 %v395_v4, %v5071_v38  ;;  %v256_v60 = vmax.f32 %v5828_v12, %v4971_v57  ;;  %v4986_v12 = vunpack.i.l.bf16 %v6039_v8 }
  0xe6   :  { %5158 = vxpose.xlu0.b32.cont [3/16] (narrow) %v5157_v44, 8  ;;  %v5080_v0 = vpop.permute.xlu1 %5079  ;;  %v396_v47 = vmax.f32 %v268_v54, %v5066_v29  ;;  %v397_v21 = vmax.f32 %v269_v25, %v5067_v35  ;;  %v509_v55 = vmax.f32 %v381_v51, %v4962_v30  ;;  %v4976_v54 = vunpack.i.l.bf16 %v6035_v63 }
  0xe7   :  { %v5081_v22 = vunpack.i.l.bf16 %v5080_v0  ;;  %v5075_v3 = vpop.permute.xlu0 %5074  ;;  %v5159_v11 = vpack.i.bf16 %v523_v50, %v507_v56  ;;  %v5082_v53 = vunpack.i.h.bf16 %v5080_v0  ;;  %v255_v56 = vmax.f32 %v5819_v10, %v4957_v32 }
  0xe8   :  { %v5076_v4 = vunpack.i.l.bf16 %v5075_v3  ;;  %v5077_v44 = vunpack.i.h.bf16 %v5075_v3 }
  0xe9   :  { %v524_v23 = vmax.f32 %v396_v47, %v5081_v22  ;;  %v525_v28 = vmax.f32 %v397_v21, %v5082_v53  ;;  %v383_v25 = vmax.f32 %v255_v56, %v4967_v59  ;;  %v510_v53 = vmax.f32 %v382_v48, %v4976_v54 }
  0xea   :  { %5160 = vxpose.xlu0.b32.cont [4/16] (narrow) %v5159_v11, 8  ;;  %v5090_v38 = vpop.permute.xlu1 %5089  ;;  %v270_v50 = vmax.f32 %v5934_v33, %v5076_v4  ;;  %v271_v0 = vmax.f32 %v5939_v34, %v5077_v44  ;;  %v4977_v33 = vunpack.i.h.bf16 %v6035_v63  ;;  %v257_v63 = vmax.f32 %v5833_v13, %v4972_v61 }
  0xeb   :  { %v5091_v7 = vunpack.i.l.bf16 %v5090_v38  ;;  %v5085_v2 = vpop.permute.xlu0 %5084  ;;  %v5161_v41 = vpack.i.bf16 %v524_v23, %v508_v45  ;;  %v5092_v52 = vunpack.i.h.bf16 %v5090_v38  ;;  %v5163_v6 = vpack.i.bf16 %v525_v28, %v509_v55 }
  0xec   :  { %v5086_v29 = vunpack.i.l.bf16 %v5085_v2  ;;  %v5087_v35 = vunpack.i.h.bf16 %v5085_v2  ;;  %v511_v2 = vmax.f32 %v383_v25, %v4977_v33  ;;  %v258_v61 = vmax.f32 %v5844_v15, %v4986_v12  ;;  %v8357_v12 = vld [vmem:[#allocation17_spill] sm:$0xff] }
  0xed   :  { %v272_v9 = vmax.f32 %v5948_v36, %v5091_v7  ;;  %v4981_v36 = vunpack.i.l.bf16 %v6033_v62  ;;  %v273_v32 = vmax.f32 %v5953_v37, %v5092_v52  ;;  %v4982_v7 = vunpack.i.h.bf16 %v6033_v62 }
  0xee   :  { %5162 = vxpose.xlu0.b32.cont [5/16] (narrow) %v5161_v41, 8  ;;  %v5100_v27 = vpop.permute.xlu1 %5099  ;;  %v398_v3 = vmax.f32 %v270_v50, %v5086_v29  ;;  %v399_v30 = vmax.f32 %v271_v0, %v5087_v35  ;;  %v4991_v41 = vunpack.i.l.bf16 %v6037_v5  ;;  %v4992_v62 = vunpack.i.h.bf16 %v6037_v5 }
  0xef   :  { %v5101_v47 = vunpack.i.l.bf16 %v5100_v27  ;;  %v5095_v22 = vpop.permute.xlu0 %5094  ;;  %v5102_v23 = vunpack.i.h.bf16 %v5100_v27  ;;  %v384_v28 = vmax.f32 %v256_v60, %v4981_v36  ;;  %v385_v13 = vmax.f32 %v257_v63, %v4982_v7 }
  0xf0   :  { %v5097_v11 = vunpack.i.h.bf16 %v5095_v22  ;;  %v5096_v10 = vunpack.i.l.bf16 %v5095_v22  ;;  %v4996_v27 = vunpack.i.l.bf16 %v6043_v17  ;;  %v5002_v5 = vunpack.i.h.bf16 %v6041_v14 }
  0xf1   :  { %v400_v1 = vmax.f32 %v272_v9, %v5101_v47  ;;  %v401_v37 = vmax.f32 %v273_v32, %v5102_v23  ;;  %v512_v35 = vmax.f32 %v384_v28, %v4991_v41  ;;  %v513_v57 = vmax.f32 %v385_v13, %v4992_v62  ;;  %v8354_v28 = vld [vmem:[#allocation23_spill] sm:$0xff]  ;;  %v8358_v62 = vld [vmem:[#allocation22_spill] sm:$0xff] }
  0xf2   :  { %v526_v45 = vmax.f32 %v398_v3, %v5096_v10  ;;  %5164 = vxpose.xlu0.b32.cont [6/16] (narrow) %v5163_v6, 8  ;;  %v5110_v34 = vpop.permute.xlu1 %5109  ;;  %v527_v4 = vmax.f32 %v399_v30, %v5097_v11  ;;  %v4987_v6 = vunpack.i.h.bf16 %v6039_v8  ;;  %v4997_v25 = vunpack.i.h.bf16 %v6043_v17 }
  0xf3   :  { %v5105_v21 = vpop.permute.xlu0 %5104  ;;  %v5111_v38 = vunpack.i.l.bf16 %v5110_v34  ;;  %v5112_v29 = vunpack.i.h.bf16 %v5110_v34  ;;  %v5006_v33 = vunpack.i.l.bf16 %v6048_v26  ;;  %v260_v14 = vmax.f32 %v5858_v18, %v5002_v5  ;;  %v8362_v5 = vld [vmem:[#allocation18_spill] sm:$0xff] }
  0xf4   :  { %v5106_v51 = vunpack.i.l.bf16 %v5105_v21  ;;  %v5165_v44 = vpack.i.bf16 %v526_v45, %v510_v53  ;;  %v5107_v55 = vunpack.i.h.bf16 %v5105_v21  ;;  %v5167_v50 = vpack.i.bf16 %v527_v4, %v511_v2 }
  0xf5   :  { %v528_v59 = vmax.f32 %v400_v1, %v5111_v38  ;;  %v529_v0 = vmax.f32 %v401_v37, %v5112_v29  ;;  %v259_v15 = vmax.f32 %v5849_v16, %v4987_v6  ;;  %v5007_v17 = vunpack.i.h.bf16 %v6048_v26  ;;  %v8355_v37 = vld [vmem:[#allocation24_spill] sm:$0xff] }
  0xf6   :  { %5166 = vxpose.xlu0.b32.cont [7/16] (narrow) %v5165_v44, 8  ;;  %v5120_v31 = vpop.permute.xlu1 %5119  ;;  %v274_v48 = vmax.f32 %v5964_v39, %v5106_v51  ;;  %v275_v52 = vmax.f32 %v5969_v40, %v5107_v55  ;;  %v386_v40 = vmax.f32 %v258_v61, %v4996_v27  ;;  %v5017_v4 = vunpack.i.h.bf16 %v6055_v49 }
  0xf7   :  { %v5115_v56 = vpop.permute.xlu0 %5114  ;;  %v5121_v9 = vunpack.i.l.bf16 %v5120_v31  ;;  %v5169_v10 = vpack.i.bf16 %v528_v59, %v512_v35  ;;  %v5122_v53 = vunpack.i.h.bf16 %v5120_v31  ;;  %v5171_v8 = vpack.i.bf16 %v529_v0, %v513_v57  ;;  %v8356_v59 = vld [vmem:[#allocation20_spill] sm:$0xff]  ;;  %v8359_v0 = vld [vmem:[#allocation26_spill] sm:$0xff] }
  0xf8   :  { %v5116_v54 = vunpack.i.l.bf16 %v5115_v56  ;;  %v5117_v3 = vunpack.i.h.bf16 %v5115_v56  ;;  %v514_v21 = vmax.f32 %v386_v40, %v5006_v33  ;;  %v387_v38 = vmax.f32 %v259_v15, %v4997_v25 }
  0xf9   :  { %v276_v30 = vmax.f32 %v5978_v42, %v5121_v9  ;;  %v277_v42 = vmax.f32 %v5983_v43, %v5122_v53  ;;  %v5012_v16 = vunpack.i.h.bf16 %v6045_v20  ;;  %v388_v18 = vmax.f32 %v260_v14, %v5017_v4 }
  0xfa   :  { %5168 = vxpose.xlu0.b32.cont [8/16] (narrow) %v5167_v50, 8  ;;  %v5130_v47 = vpop.permute.xlu1 %5129  ;;  %v402_v11 = vmax.f32 %v274_v48, %v5116_v54  ;;  %v403_v36 = vmax.f32 %v275_v52, %v5117_v3  ;;  %v515_v31 = vmax.f32 %v387_v38, %v5007_v17  ;;  %v5032_v26 = vunpack.i.h.bf16 %v8354_v28  ;;  %v6203_v28 = vld [vmem:[#allocation7 + $0x188] sm:$0xff] }
  0xfb   :  { %v5125_v22 = vpop.permute.xlu0 %5124  ;;  %v5131_v45 = vunpack.i.l.bf16 %v5130_v47  ;;  %v5132_v51 = vunpack.i.h.bf16 %v5130_v47  ;;  %v5027_v49 = vunpack.i.h.bf16 %v8355_v37  ;;  %v261_v13 = vmax.f32 %v8357_v12, %v5012_v16  ;;  %v8360_v47 = vld [vmem:[#allocation25_spill] sm:$0xff] }
  0xfc   :  { %v5126_v39 = vunpack.i.l.bf16 %v5125_v22  ;;  %v5127_v32 = vunpack.i.h.bf16 %v5125_v22  ;;  %v5022_v20 = vunpack.i.h.bf16 %v8358_v62  ;;  %v516_v27 = vmax.f32 %v388_v18, %v5032_v26  ;;  %v6199_v18 = vld [vmem:[#allocation7 + $0x1b0] sm:$0xff]  ;;  %v6205_v26 = vld [vmem:[#allocation7 + $0x198] sm:$0xff]  ;;  %v6207_v37 = vld [vmem:[#allocation7 + $0x180] sm:$0xff] }
  0xfd   :  { %v404_v44 = vmax.f32 %v276_v30, %v5131_v45  ;;  %v405_v29 = vmax.f32 %v277_v42, %v5132_v51  ;;  %v5047_v52 = vunpack.i.h.bf16 %v8359_v0  ;;  %v389_v9 = vmax.f32 %v261_v13, %v5027_v49  ;;  %v6175_v51 = vld [vmem:[#allocation7 + $0x1f0] sm:$0xff]  ;;  %v6237_v12 = vld [vmem:[#allocation7 + $0x128] sm:$0xff]  ;;  %v6239_v13 = vld [vmem:[#allocation7 + $0x138] sm:$0xff] }
  0xfe   :  { %5170 = vxpose.xlu0.b32.cont [9/16] (narrow) %v5169_v10, 8  ;;  %v530_v23 = vmax.f32 %v402_v11, %v5126_v39  ;;  %v5140_v1 = vpop.permute.xlu1 %5139  ;;  %v531_v60 = vmax.f32 %v403_v36, %v5127_v32  ;;  %v5042_v22 = vunpack.i.h.bf16 %v8360_v47  ;;  %v8361_v11 = vld [vmem:[#allocation21_spill] sm:$0xff]  ;;  %v262_v25 = vmax.f32 %v8362_v5, %v5022_v20  ;;  %v6209_v49 = vld [vmem:[#allocation7 + $0x190] sm:$0xff]  ;;  %v6263_v47 = vld [vmem:[#allocation7 + $0xf8] sm:$0xff] }
  0xff   :  { %v5135_v34 = vpop.permute.xlu0 %5134  ;;  %v5141_v63 = vunpack.i.l.bf16 %v5140_v1  ;;  %v5142_v55 = vunpack.i.h.bf16 %v5140_v1  ;;  %v5037_v33 = vunpack.i.h.bf16 %v6070_v19  ;;  %v517_v40 = vmax.f32 %v389_v9, %v5047_v52  ;;  %v6243_v62 = vld [vmem:[#allocation7 + $0x120] sm:$0xff]  ;;  %v6245_v20 = vld [vmem:[#allocation7 + $0x130] sm:$0xff]  ;;  %v6261_v9 = vld [vmem:[#allocation7 + $0xe8] sm:$0xff] }
 0x100   :  { %v5136_v7 = vunpack.i.l.bf16 %v5135_v34  ;;  %v5173_v2 = vpack.i.bf16 %v530_v23, %v514_v21  ;;  %v5137_v56 = vunpack.i.h.bf16 %v5135_v34  ;;  %v5175_v50 = vpack.i.bf16 %v531_v60, %v515_v31  ;;  %v6179_v60 = vld [vmem:[#allocation7 + $0x1d8] sm:$0xff]  ;;  %v6197_v31 = vld [vmem:[#allocation7 + $0x1a0] sm:$0xff]  ;;  %v6257_v52 = vld [vmem:[#allocation7 + $0x110] sm:$0xff] }
 0x101   :  { %v532_v43 = vmax.f32 %v404_v44, %v5141_v63  ;;  %v533_v3 = vmax.f32 %v405_v29, %v5142_v55  ;;  %v5062_v53 = vunpack.i.h.bf16 %v6099_v46  ;;  %v390_v30 = vmax.f32 %v262_v25, %v5042_v22  ;;  %v6177_v44 = vld [vmem:[#allocation7 + $0x1c8] sm:$0xff]  ;;  %v6183_v63 = vld [vmem:[#allocation7 + $0x1d0] sm:$0xff]  ;;  %v6215_v55 = vld [vmem:[#allocation7 + $0x178] sm:$0xff] }
 0x102   :  { %5172 = vxpose.xlu0.b32.cont [10/16] (narrow) %v5171_v8, 8  ;;  %v278_v48 = vmax.f32 %v8356_v59, %v5136_v7  ;;  %v5150_v35 = vpop.permute.xlu1 %5149  ;;  %v279_v39 = vmax.f32 %v8361_v11, %v5137_v56  ;;  %v5057_v45 = vunpack.i.h.bf16 %v6103_v24  ;;  %v8363_v8 = vld [vmem:[#allocation19_spill] sm:$0xff]  ;;  %v5072_v14 = vunpack.i.h.bf16 %v6110_v58  ;;  %v6173_v24 = vld [vmem:[#allocation7 + $0x1e0] sm:$0xff]  ;;  %v6189_v7 = vld [vmem:[#allocation7 + $0x1a8] sm:$0xff] }
 0x103   :  { %v5145_v41 = vpop.permute.xlu0 %5144  ;;  %v5151_v61 = vunpack.i.l.bf16 %v5150_v35  ;;  %v5177_v57 = vpack.i.bf16 %v532_v43, %v516_v27  ;;  %v5152_v36 = vunpack.i.h.bf16 %v5150_v35  ;;  %v5179_v23 = vpack.i.bf16 %v533_v3, %v517_v40  ;;  %v6181_v58 = vld [vmem:[#allocation7 + $0x1c0] sm:$0xff]  ;;  %v6213_v29 = vld [vmem:[#allocation7 + $0x168] sm:$0xff]  ;;  %v6221_v43 = vld [vmem:[#allocation7 + $0x170] sm:$0xff] }
 0x104   :  { %v5146_v54 = vunpack.i.l.bf16 %v5145_v41  ;;  %v5147_v10 = vunpack.i.h.bf16 %v5145_v41  ;;  %v263_v15 = vmax.f32 %v8363_v8, %v5037_v33  ;;  %v518_v1 = vmax.f32 %v390_v30, %v5062_v53  ;;  %v6219_v56 = vld [vmem:[#allocation7 + $0x160] sm:$0xff]  ;;  %v6225_v59 = vld [vmem:[#allocation7 + $0x148] sm:$0xff]  ;;  %v6251_v27 = vld [vmem:[#allocation7 + $0x118] sm:$0xff] }
 0x105   :  { %v8364_v41 = vmov 0.0   ;;  %v6249_v35 = vld [vmem:[#allocation7 + $0x108] sm:$0xff]  ;;  %v6255_v0 = vld [vmem:[#allocation7 + $0x100] sm:$0xff]  ;;  %v6269_v3 = vld [vmem:[#allocation7 + $0xf0] sm:$0xff] }
 0x106   :  { %5174 = vxpose.xlu0.b32.cont [11/16] (narrow) %v5173_v2, 8  ;;  %v406_v6 = vmax.f32 %v278_v48, %v5146_v54  ;;  %v407_v34 = vmax.f32 %v279_v39, %v5147_v10  ;;  %v391_v17 = vmax.f32 %v263_v15, %v5057_v45  ;;  %v6191_v2 = vld [vmem:[#allocation7 + $0x1b8] sm:$0xff]  ;;  %v6231_v54 = vld [vmem:[#allocation7 + $0x140] sm:$0xff]  ;;  %8365 = vst [vmem:[#allocation23_spill] sm:$0xff] %v6269_v3  ;;  %v6273_v11 = vld [vmem:[#allocation7 + $0xc8] sm:$0xff] }
 0x107   :  { %v6227_v48 = vld [vmem:[#allocation7 + $0x158] sm:$0xff]  ;;  %v6267_v22 = vld [vmem:[#allocation7 + $0xe0] sm:$0xff]  ;;  %8366 = vst [vmem:[#allocation24_spill] sm:$0xff] %v6273_v11  ;;  %v6293_v25 = vld [vmem:[#allocation7 + $0xb0] sm:$0xff] }
 0x108   :  { %v534_v32 = vmax.f32 %v406_v6, %v5151_v61  ;;  %v535_v21 = vmax.f32 %v407_v34, %v5152_v36  ;;  %v519_v4 = vmax.f32 %v391_v17, %v5072_v14  ;;  %v6275_v39 = vld [vmem:[#allocation7 + $0xd8] sm:$0xff]  ;;  %v6279_v10 = vld [vmem:[#allocation7 + $0xc0] sm:$0xff]  ;;  %v6281_v6 = vld [vmem:[#allocation7 + $0xd0] sm:$0xff]  ;;  %8373 = vst [vmem:[#allocation18_spill] sm:$0xff] %v6293_v25 }
 0x109   :  { %8367 = vst [vmem:[#allocation20_spill] sm:$0xff] %v6275_v39  ;;  %8368 = vst [vmem:[#allocation17_spill] sm:$0xff] %v6279_v10  ;;  %v6285_v61 = vld [vmem:[#allocation7 + $0xa8] sm:$0xff]  ;;  %v6291_v5 = vld [vmem:[#allocation7 + $0xa0] sm:$0xff] }
 0x10a   :  { %5176 = vxpose.xlu0.b32.cont [12/16] (narrow) %v5175_v50, 8  ;;  %v5181_v19 = vpack.i.bf16 %v534_v32, %v518_v1  ;;  %v5183_v46 = vpack.i.bf16 %v535_v21, %v519_v4  ;;  %v6233_v50 = vld [vmem:[#allocation7 + $0x150] sm:$0xff]  ;;  %8369 = vst [vmem:[#allocation22_spill] sm:$0xff] %v6281_v6  ;;  %8370 = vst [vmem:[#allocation26_spill] sm:$0xff] %v6285_v61  ;;  %v6297_v33 = vld [vmem:[#allocation7 + $0x88] sm:$0xff] }
 0x10b   :  { %8372 = vst [vmem:[#allocation21_spill] sm:$0xff] %v6291_v5  ;;  %8374 = vst [vmem:[#allocation19_spill] sm:$0xff] %v6297_v33  ;;  %v6299_v40 = vld [vmem:[#allocation7 + $0x98] sm:$0xff]  ;;  %v6303_v53 = vld [vmem:[#allocation7 + $0x80] sm:$0xff] }
 0x10c   :  { %8375 = vst [vmem:[#allocation29_spill] sm:$0xff] %v6299_v40  ;;  %8376 = vst [vmem:[#allocation30_spill] sm:$0xff] %v6303_v53  ;;  %v6305_v30 = vld [vmem:[#allocation7 + $0x90] sm:$0xff]  ;;  %v6309_v45 = vld [vmem:[#allocation7 + $0x68] sm:$0xff] }
 0x10d   :  { %8377 = vst [vmem:[#allocation31_spill] sm:$0xff] %v6305_v30  ;;  %8378 = vst [vmem:[#allocation32_spill] sm:$0xff] %v6309_v45  ;;  %v6311_v34 = vld [vmem:[#allocation7 + $0x78] sm:$0xff]  ;;  %v6315_v36 = vld [vmem:[#allocation7 + $0x60] sm:$0xff] }
 0x10e   :  { %5178 = vxpose.xlu0.b32.cont [13/16] (narrow) %v5177_v57, 8  ;;  %v6287_v57 = vld [vmem:[#allocation7 + $0xb8] sm:$0xff]  ;;  %8379 = vst [vmem:[#allocation33_spill] sm:$0xff] %v6311_v34  ;;  %8380 = vst [vmem:[#allocation34_spill] sm:$0xff] %v6315_v36  ;;  %v6317_v32 = vld [vmem:[#allocation7 + $0x70] sm:$0xff] }
 0x10f   :  { %8371 = vst [vmem:[#allocation25_spill] sm:$0xff] %v6287_v57  ;;  %8381 = vst [vmem:[#allocation35_spill] sm:$0xff] %v6317_v32  ;;  %v6323_v8 = vld [vmem:[#allocation7 + $0x58] sm:$0xff]  ;;  %v6327_v15 = vld [vmem:[#allocation7 + $0x40] sm:$0xff] }
 0x110   :  { %8383 = vst [vmem:[#allocation37_spill] sm:$0xff] %v6323_v8  ;;  %8384 = vst [vmem:[#allocation38_spill] sm:$0xff] %v6327_v15  ;;  %v6329_v1 = vld [vmem:[#allocation7 + $0x50] sm:$0xff]  ;;  %v6333_v14 = vld [vmem:[#allocation7 + $0x28] sm:$0xff] }
 0x111   :  { %8385 = vst [vmem:[#allocation39_spill] sm:$0xff] %v6329_v1  ;;  %8386 = vst [vmem:[#allocation40_spill] sm:$0xff] %v6333_v14  ;;  %v6335_v17 = vld [vmem:[#allocation7 + $0x38] sm:$0xff]  ;;  %v6339_v21 = vld [vmem:[#allocation7 + $0x20] sm:$0xff] }
 0x112   :  { %5180 = vxpose.xlu0.b32.cont [14/16] (narrow) %v5179_v23, 8  ;;  %v6321_v23 = vld [vmem:[#allocation7 + $0x48] sm:$0xff]  ;;  %8387 = vst [vmem:[#allocation41_spill] sm:$0xff] %v6335_v17  ;;  %8388 = vst [vmem:[#allocation42_spill] sm:$0xff] %v6339_v21 }
 0x113   :  { %8382 = vst [vmem:[#allocation36_spill] sm:$0xff] %v6321_v23  ;;  %v6345_v4 = vld [vmem:[#allocation7 + $0x8] sm:$0xff] }
 0x114   :  { %8390 = vst [vmem:[#allocation44_spill] sm:$0xff] %v6345_v4 }
 0x116   :  { %5182 = vxpose.xlu0.b32.cont [15/16] (narrow) %v5181_v19, 8  ;;  %v6341_v19 = vld [vmem:[#allocation7 + $0x30] sm:$0xff] }
 0x117   :  { %8389 = vst [vmem:[#allocation43_spill] sm:$0xff] %v6341_v19 }
 0x11a   :  { %5184 = vxpose.xlu0.b32.end [16/16] (narrow) %v5183_v46, 8  ;;  %v6347_v46 = vld [vmem:[#allocation7 + $0x18] sm:$0xff] }
 0x11b   :  { %8391 = vst [vmem:[#allocation45_spill] sm:$0xff] %v6347_v46 }
 0x15a   :  { %v5185_v38 = vpop.trf.xlu0 }
 0x15b   :  { %v5186_v42 = vunpack.i.l.bf16 %v5185_v38  ;;  %v5189_v16 = vunpack.i.h.bf16 %v5185_v38  ;;  %v6351_v38 = vld [vmem:[#allocation7] sm:$0xff] }
 0x15c   :  { %8392 = vst [vmem:[#allocation46_spill] sm:$0xff] %v6351_v38 }
 0x15d   :  { %751 = vmatmul.mubr.f32.vlgmr.msra.gmra.mxu0 %v5186_v42  ;;  %828 = vmatmul.mubr.f32.vlgmr.msra.gmra.mxu1 %v5186_v42  ;;  %v6355_v42 = vld [vmem:[#allocation7 + $0x10] sm:$0xff] }
 0x15e   :  { %1071 = vmatpush1.msra.mxu0 %v6173_v24  ;;  %1142 = vmatpush1.msra.mxu1 %v6175_v51  ;;  %8393 = vst [vmem:[#allocation47_spill] sm:$0xff] %v6355_v42 }
 0x15f   :  { %1072 = vmatprep.subr.mxu0 %v6177_v44  ;;  %1143 = vmatprep.subr.mxu1 %v6179_v60 }
 0x160   :  { %1073 = vmatpush1.msra.mxu0 %v6181_v58  ;;  %1144 = vmatpush1.msra.mxu1 %v6183_v63 }
 0x161   :  { %756 = vmatprep.mubr.f32.mxu0 %v8364_v41  ;;  %833 = vmatprep.mubr.f32.mxu1 %v8364_v41 }
 0x162   :  { %1074 = vmatprep.subr.mxu0 %v6189_v7  ;;  %1145 = vmatprep.subr.mxu1 %v6191_v2 }
 0x163   :  { %757 = vmatmul.mubr.f32.gmra.mxu0 %v5189_v16  ;;  %834 = vmatmul.mubr.f32.gmra.mxu1 %v5189_v16  ;;  %v8394_v16 = vld [vmem:[#allocation27_spill] sm:$0xff] }
 0x164   :  { %1075 = vmatpush1.msra.mxu0 %v6197_v31  ;;  %1146 = vmatpush1.msra.mxu1 %v6199_v18 }
 0x165   :  { %1076 = vmatprep.subr.mxu0 %v6203_v28  ;;  %1147 = vmatprep.subr.mxu1 %v6205_v26 }
 0x166   :  { %1077 = vmatpush1.msra.mxu0 %v6207_v37  ;;  %1148 = vmatpush1.msra.mxu1 %v6209_v49 }
 0x167   :  { %1078 = vmatprep.subr.mxu0 %v6213_v29  ;;  %1149 = vmatprep.subr.mxu1 %v6215_v55 }
 0x168   :  { %1079 = vmatpush1.msra.mxu0 %v6219_v56  ;;  %1150 = vmatpush1.msra.mxu1 %v6221_v43 }
 0x169   :  { %1080 = vmatprep.subr.mxu0 %v6225_v59  ;;  %1151 = vmatprep.subr.mxu1 %v6227_v48 }
 0x16a   :  { %1081 = vmatpush1.msra.mxu0 %v6231_v54  ;;  %1152 = vmatpush1.msra.mxu1 %v6233_v50 }
 0x16b   :  { %1082 = vmatprep.subr.mxu0 %v6237_v12  ;;  %1153 = vmatprep.subr.mxu1 %v6239_v13 }
 0x16c   :  { %1083 = vmatpush1.msra.mxu0 %v6243_v62  ;;  %1154 = vmatpush1.msra.mxu1 %v6245_v20 }
 0x16d   :  { %1084 = vmatprep.subr.mxu0 %v6249_v35  ;;  %1155 = vmatprep.subr.mxu1 %v6251_v27 }
 0x16e   :  { %1085 = vmatpush1.msra.mxu0 %v6255_v0  ;;  %1156 = vmatpush1.msra.mxu1 %v6257_v52 }
 0x16f   :  { %1086 = vmatprep.subr.mxu0 %v6261_v9  ;;  %1157 = vmatprep.subr.mxu1 %v6263_v47 }
 0x170   :  { %1087 = vmatpush1.msra.mxu0 %v6267_v22  ;;  %1158 = vmatpush1.msra.mxu1 %v6269_v3 }
 0x171   :  { %1088 = vmatprep.subr.mxu0 %v6273_v11  ;;  %1159 = vmatprep.subr.mxu1 %v6275_v39 }
 0x172   :  { %1089 = vmatpush1.msra.mxu0 %v6279_v10  ;;  %1160 = vmatpush1.msra.mxu1 %v6281_v6 }
 0x173   :  { %1090 = vmatprep.subr.mxu0 %v6285_v61  ;;  %1161 = vmatprep.subr.mxu1 %v6287_v57 }
 0x174   :  { %1091 = vmatpush1.msra.mxu0 %v6291_v5  ;;  %1162 = vmatpush1.msra.mxu1 %v6293_v25 }
 0x175   :  { %1092 = vmatprep.subr.mxu0 %v6297_v33  ;;  %1163 = vmatprep.subr.mxu1 %v6299_v40 }
 0x176   :  { %1093 = vmatpush1.msra.mxu0 %v6303_v53  ;;  %1164 = vmatpush1.msra.mxu1 %v6305_v30 }
 0x177   :  { %1094 = vmatprep.subr.mxu0 %v6309_v45  ;;  %1165 = vmatprep.subr.mxu1 %v6311_v34 }
 0x178   :  { %1095 = vmatpush1.msra.mxu0 %v6315_v36  ;;  %1166 = vmatpush1.msra.mxu1 %v6317_v32 }
 0x179   :  { %1096 = vmatprep.subr.mxu0 %v6321_v23  ;;  %1167 = vmatprep.subr.mxu1 %v6323_v8 }
 0x17a   :  { %1097 = vmatpush1.msra.mxu0 %v6327_v15  ;;  %1168 = vmatpush1.msra.mxu1 %v6329_v1 }
 0x17b   :  { %1098 = vmatprep.subr.mxu0 %v6333_v14  ;;  %1169 = vmatprep.subr.mxu1 %v6335_v17 }
 0x17c   :  { %1099 = vmatpush1.msra.mxu0 %v6339_v21  ;;  %1170 = vmatpush1.msra.mxu1 %v6341_v19  ;;  %v8395_v19 = vld [vmem:[#allocation28_spill] sm:$0xff] }
 0x17d   :  { %1100 = vmatprep.subr.mxu0 %v6345_v4  ;;  %1171 = vmatprep.subr.mxu1 %v6347_v46 }
 0x17e   :  { %1101 = vmatpush1.msra.mxu0 %v6351_v38  ;;  %1134 = vmatprep.mubr.f32.mxu0 %v8364_v41 }
 0x17f   :  { %1172 = vmatpush1.msra.mxu1 %v6355_v42  ;;  %1205 = vmatprep.mubr.f32.mxu1 %v8364_v41 }
 0x180   :  { %1135 = vmatmul.mubr.f32.vlgmr.msra.gmra.mxu0 %v8364_v41  ;;  %1206 = vmatmul.mubr.f32.vlgmr.msra.gmra.mxu1 %v8364_v41 }
 0x181   :  { %1268 = vmatprep.subr.mxu0 %v8394_v16  ;;  %1339 = vmatprep.subr.mxu1 %v8395_v19 }
 0x182   :  { %1269 = vmatpush1.msra.mxu0 %v6173_v24  ;;  %1340 = vmatpush1.msra.mxu1 %v6175_v51 }
 0x183   :  { %1270 = vmatprep.subr.mxu0 %v6177_v44  ;;  %1341 = vmatprep.subr.mxu1 %v6179_v60 }
 0x184   :  { %1271 = vmatpush1.msra.mxu0 %v6181_v58  ;;  %1342 = vmatpush1.msra.mxu1 %v6183_v63 }
 0x185   :  { %1272 = vmatprep.subr.mxu0 %v6189_v7  ;;  %1343 = vmatprep.subr.mxu1 %v6191_v2 }
 0x186   :  { %1273 = vmatpush1.msra.mxu0 %v6197_v31  ;;  %1344 = vmatpush1.msra.mxu1 %v6199_v18 }
 0x187   :  { %1274 = vmatprep.subr.mxu0 %v6203_v28  ;;  %1345 = vmatprep.subr.mxu1 %v6205_v26 }
 0x188   :  { %1275 = vmatpush1.msra.mxu0 %v6207_v37  ;;  %1346 = vmatpush1.msra.mxu1 %v6209_v49 }
 0x189   :  { %1276 = vmatprep.subr.mxu0 %v6213_v29  ;;  %1347 = vmatprep.subr.mxu1 %v6215_v55 }
 0x18a   :  { %1277 = vmatpush1.msra.mxu0 %v6219_v56  ;;  %1348 = vmatpush1.msra.mxu1 %v6221_v43 }
 0x18b   :  { %1278 = vmatprep.subr.mxu0 %v6225_v59  ;;  %1349 = vmatprep.subr.mxu1 %v6227_v48 }
 0x18c   :  { %1279 = vmatpush1.msra.mxu0 %v6231_v54  ;;  %1350 = vmatpush1.msra.mxu1 %v6233_v50 }
 0x18d   :  { %1280 = vmatprep.subr.mxu0 %v6237_v12  ;;  %1351 = vmatprep.subr.mxu1 %v6239_v13 }
 0x18e   :  { %1281 = vmatpush1.msra.mxu0 %v6243_v62  ;;  %1352 = vmatpush1.msra.mxu1 %v6245_v20 }
 0x18f   :  { %1282 = vmatprep.subr.mxu0 %v6249_v35  ;;  %1353 = vmatprep.subr.mxu1 %v6251_v27 }
 0x190   :  { %1283 = vmatpush1.msra.mxu0 %v6255_v0  ;;  %1354 = vmatpush1.msra.mxu1 %v6257_v52 }
 0x191   :  { %1284 = vmatprep.subr.mxu0 %v6261_v9  ;;  %1355 = vmatprep.subr.mxu1 %v6263_v47 }
 0x192   :  { %1285 = vmatpush1.msra.mxu0 %v6267_v22  ;;  %1356 = vmatpush1.msra.mxu1 %v6269_v3 }
 0x193   :  { %1286 = vmatprep.subr.mxu0 %v6273_v11  ;;  %1357 = vmatprep.subr.mxu1 %v6275_v39 }
 0x194   :  { %1287 = vmatpush1.msra.mxu0 %v6279_v10  ;;  %1358 = vmatpush1.msra.mxu1 %v6281_v6 }
 0x195   :  { %1288 = vmatprep.subr.mxu0 %v6285_v61  ;;  %1359 = vmatprep.subr.mxu1 %v6287_v57 }
 0x196   :  { %1289 = vmatpush1.msra.mxu0 %v6291_v5  ;;  %1360 = vmatpush1.msra.mxu1 %v6293_v25 }
 0x197   :  { %1290 = vmatprep.subr.mxu0 %v6297_v33  ;;  %1361 = vmatprep.subr.mxu1 %v6299_v40 }
 0x198   :  { %1291 = vmatpush1.msra.mxu0 %v6303_v53  ;;  %1362 = vmatpush1.msra.mxu1 %v6305_v30 }
 0x199   :  { %1292 = vmatprep.subr.mxu0 %v6309_v45  ;;  %1363 = vmatprep.subr.mxu1 %v6311_v34  ;;  %v8396_v45 = vld [vmem:[#allocation43_spill] sm:$0xff] }
 0x19a   :  { %1293 = vmatpush1.msra.mxu0 %v6315_v36  ;;  %1364 = vmatpush1.msra.mxu1 %v6317_v32 }
 0x19b   :  { %1294 = vmatprep.subr.mxu0 %v6321_v23  ;;  %1365 = vmatprep.subr.mxu1 %v6323_v8 }
 0x19c   :  { %1295 = vmatpush1.msra.mxu0 %v6327_v15  ;;  %1366 = vmatpush1.msra.mxu1 %v6329_v1 }
 0x19d   :  { %1296 = vmatprep.subr.mxu0 %v6333_v14  ;;  %1367 = vmatprep.subr.mxu1 %v6335_v17  ;;  %v666_v17 = vlaneseq }
 0x19e   :  { %1297 = vmatpush1.msra.mxu0 %v6339_v21  ;;  %1368 = vmatpush1.msra.mxu1 %v8396_v45  ;;  %v5692_v45 = vmov 1983009808  }
 0x19f   :  { %1298 = vmatprep.subr.mxu0 %v6345_v4  ;;  %1369 = vmatprep.subr.mxu1 %v6347_v46  ;;  %v6433_v21 = vshrl.u32 %v666_v17, 7  ;;  %v851_v14 = vunpack.c.l.s4 %v5692_v45 }
 0x1a0   :  { %1299 = vmatpush1.msra.mxu0 %v6351_v38  ;;  %1332 = vmatprep.mubr.f32.mxu0 %v8364_v41 }
 0x1a1   :  { %1370 = vmatpush1.msra.mxu1 %v6355_v42  ;;  %1403 = vmatprep.mubr.f32.mxu1 %v8364_v41  ;;  %8397 = vst [vmem:[#allocation27_spill] sm:$0xff] %v6433_v21  ;;  %v8138_v4 = vsub.s32 0, %v6433_v21  ;;  %v8143_v46 = vsub.s32 2, %v6433_v21  ;;  %v8148_v38 = vsub.s32 1, %v6433_v21  ;;  %v8151_v1 = vsub.s32 3, %v6433_v21 }
 0x1a2   :  { %1467 = vmatprep.subr.mxu0 %v8394_v16  ;;  %1538 = vmatprep.subr.mxu1 %v8395_v19  ;;  %v664_v42 = vld [vmem:[%s8080_s3] sm:$0xf]  ;;  %v852_v16 = vunpack.c.0.s8 %v851_v14 }
 0x1a3   :  { %v669_v19 = vrot.slane %v664_v42, %v8138_v4  ;;  %v677_v17 = vrot.slane %v664_v42, %v8143_v46  ;;  %v673_v45 = vrot.slane %v664_v42, %v8148_v38  ;;  %v681_v41 = vrot.slane %v664_v42, %v8151_v1 }
 0x1a4   :  { %v6451_v23 = vsub.s32 %v852_v16, %v6433_v21 }
 0x21d   :  { %v752_v15 = vpop.f32.mrf.mxu0  ;;  %v829_v8 = vpop.f32.mrf.mxu1 }
 0x21e   :  { %v753_v14 = vadd.f32 %v752_v15, %v669_v19  ;;  %v830_v34 = vadd.f32 %v829_v8, %v677_v17 }
 0x21f   :  { %v754_v32 = vpop.f32.mrf.mxu0  ;;  %v831_v36 = vpop.f32.mrf.mxu1 }
 0x220   :  { %v755_v30 = vadd.f32 %v754_v32, %v673_v45  ;;  %v832_v4 = vadd.f32 %v831_v36, %v681_v41 }
 0x222   :  { %v848_v53 = vcombine.low %v753_v14, %v755_v30  ;;  %v929_v40 = vcombine.high %v753_v14, %v755_v30  ;;  %v849_v46 = vcombine.low %v830_v34, %v832_v4  ;;  %v930_v33 = vcombine.high %v830_v34, %v832_v4 }
 0x223   :  { %v758_v25 = vpop.f32.mrf.mxu0  ;;  %v835_v38 = vpop.f32.mrf.mxu1 }
 0x224   :  { %v856_v5 = vrot.slane %v848_v53, %v6451_v23  ;;  %v937_v42 = vrot.slane %v929_v40, %v6451_v23  ;;  %v863_v1 = vrot.slane %v849_v46, %v6451_v23  ;;  %v944_v16 = vrot.slane %v930_v33, %v6451_v23 }
 0x225   :  { %v760_v21 = vpop.f32.mrf.mxu0  ;;  %v837_v57 = vpop.f32.mrf.mxu1  ;;  %v759_v36 = vadd.f32 %v758_v25, %v669_v19  ;;  %v836_v61 = vadd.f32 %v835_v38, %v677_v17 }
 0x226   :  { %v907_v15 = vcombine.high %v856_v5, %v863_v1  ;;  %v945_v8 = vcombine.low %v937_v42, %v944_v16  ;;  %v983_v32 = vcombine.high %v937_v42, %v944_v16  ;;  %v761_v30 = vadd.f32 %v760_v21, %v673_v45 }
 0x227   :  { %v838_v14 = vadd.f32 %v837_v57, %v681_v41  ;;  %v864_v34 = vcombine.low %v856_v5, %v863_v1 }
 0x228   :  { %v865_v4 = vcombine.low %v759_v36, %v761_v30  ;;  %v946_v6 = vcombine.high %v759_v36, %v761_v30  ;;  %v919_v3 = vrot.slane %v907_v15, 1  ;;  %v973_v5 = vrot.slane %v945_v8, 1 }
 0x229   :  { %v866_v10 = vcombine.low %v836_v61, %v838_v14  ;;  %v947_v53 = vcombine.high %v836_v61, %v838_v14  ;;  %v897_v11 = vrot.slane %v864_v34, 1  ;;  %v995_v36 = vrot.slane %v983_v32, 1 }
 0x22a   :  { %v873_v40 = vrot.slane %v865_v4, %v6451_v23  ;;  %v954_v46 = vrot.slane %v946_v6, %v6451_v23 }
 0x22b   :  { %v880_v33 = vrot.slane %v866_v10, %v6451_v23  ;;  %v961_v39 = vrot.slane %v947_v53, %v6451_v23 }
 0x22d   :  { %v881_v25 = vcombine.low %v873_v40, %v880_v33  ;;  %v908_v21 = vcombine.high %v873_v40, %v880_v33  ;;  %v962_v41 = vcombine.low %v954_v46, %v961_v39  ;;  %v984_v57 = vcombine.high %v954_v46, %v961_v39 }
 0x22f   :  { %v900_v61 = vsel %vm887_vm0, %v881_v25, %v897_v11  ;;  %v911_v1 = vrot.slane %v908_v21, 7  ;;  %v922_v6 = vsel %vm887_vm0, %v908_v21, %v919_v3  ;;  %v965_v19 = vrot.slane %v962_v41, 7 }
 0x230   :  { %v901_v10 = vsel %vm889_vm1, %v881_v25, %v900_v61  ;;  %v923_v38 = vsel %vm889_vm1, %v908_v21, %v922_v6  ;;  %v976_v17 = vsel %vm887_vm0, %v962_v41, %v973_v5  ;;  %v998_v5 = vsel %vm887_vm0, %v984_v57, %v995_v36 }
 0x231   :  { %v902_v45 = vsel %vm891_vm2, %v881_v25, %v901_v10  ;;  %v912_v42 = vsel %vm887_vm0, %v911_v1, %v907_v15  ;;  %v924_v39 = vsel %vm891_vm2, %v908_v21, %v923_v38  ;;  %v966_v14 = vsel %vm887_vm0, %v965_v19, %v945_v8 }
 0x232   :  { %v6470_v16 = vsel %vm893_vm3, %v881_v25, %v902_v45  ;;  %v913_v11 = vsel %vm889_vm1, %v911_v1, %v912_v42  ;;  %v6474_v3 = vsel %vm893_vm3, %v908_v21, %v924_v39  ;;  %v977_v4 = vsel %vm889_vm1, %v962_v41, %v976_v17 }
 0x233   :  { %8398 = vst [vmem:[#allocation28_spill] sm:$0xff] %v6474_v3  ;;  %v914_v30 = vsel %vm891_vm2, %v911_v1, %v913_v11  ;;  %v967_v15 = vsel %vm889_vm1, %v965_v19, %v966_v14  ;;  %v978_v40 = vsel %vm891_vm2, %v962_v41, %v977_v4  ;;  %v987_v21 = vrot.slane %v984_v57, 7  ;;  %v8430_v3 = vld [vmem:[#allocation45_spill] sm:$0xff] }
 0x234   :  { %v6480_v53 = vsel %vm893_vm3, %v911_v1, %v914_v30  ;;  %v968_v46 = vsel %vm891_vm2, %v965_v19, %v967_v15  ;;  %v6486_v33 = vsel %vm893_vm3, %v962_v41, %v978_v40  ;;  %v999_v8 = vsel %vm889_vm1, %v984_v57, %v998_v5 }
 0x235   :  { %8399 = vst [vmem:[#allocation48_spill] sm:$0xff] %v6480_v53  ;;  %8400 = vst [vmem:[#allocation49_spill] sm:$0xff] %v6486_v33  ;;  %v6490_v61 = vsel %vm893_vm3, %v965_v19, %v968_v46  ;;  %v988_v1 = vsel %vm887_vm0, %v987_v21, %v983_v32  ;;  %v1000_v6 = vsel %vm891_vm2, %v984_v57, %v999_v8  ;;  %v886_v45 = vrot.slane %v881_v25, 7  ;;  %v8428_v33 = vld [vmem:[#allocation43_spill] sm:$0xff]  ;;  %v8431_v53 = vld [vmem:[#allocation46_spill] sm:$0xff] }
 0x236   :  { %8401 = vst [vmem:[#allocation50_spill] sm:$0xff] %v6490_v61  ;;  %v989_v10 = vsel %vm889_vm1, %v987_v21, %v988_v1  ;;  %v6497_v38 = vsel %vm893_vm3, %v984_v57, %v1000_v6  ;;  %v8429_v61 = vld [vmem:[#allocation44_spill] sm:$0xff] }
 0x237   :  { %8402 = vst [vmem:[#allocation51_spill] sm:$0xff] %v6497_v38  ;;  %v990_v41 = vsel %vm891_vm2, %v987_v21, %v989_v10  ;;  %v888_v19 = vsel %vm887_vm0, %v886_v45, %v864_v34  ;;  %v8426_v38 = vld [vmem:[#allocation41_spill] sm:$0xff] }
 0x238   :  { %v6501_v17 = vsel %vm893_vm3, %v987_v21, %v990_v41  ;;  %v890_v32 = vsel %vm889_vm1, %v886_v45, %v888_v19 }
 0x239   :  { %8403 = vst [vmem:[#allocation52_spill] sm:$0xff] %v6501_v17  ;;  %v892_v57 = vsel %vm891_vm2, %v886_v45, %v890_v32  ;;  %v8427_v17 = vld [vmem:[#allocation42_spill] sm:$0xff] }
 0x23a   :  { %v894_v46 = vsel %vm893_vm3, %v886_v45, %v892_v57 }
 0x240   :  { %v1136_v42 = vpop.f32.mrf.mxu0  ;;  %v1207_v39 = vpop.f32.mrf.mxu1 }
 0x242   :  { %v1138_v11 = vpop.f32.mrf.mxu0  ;;  %v1209_v36 = vpop.f32.mrf.mxu1 }
 0x243   :  { %v1216_v30 = vcombine.low %v1136_v42, %v1138_v11  ;;  %v1217_v14 = vcombine.low %v1207_v39, %v1209_v36 }
 0x245   :  { %v1224_v4 = vrot.slane %v1216_v30, %v6451_v23  ;;  %v1231_v15 = vrot.slane %v1217_v14, %v6451_v23 }
 0x247   :  { %v1232_v40 = vcombine.low %v1224_v4, %v1231_v15 }
 0x249   :  { %v1234_v25 = vadd.f32 %v1232_v40, %v894_v46  ;;  %v8404_v46 = vld [vmem:[#allocation23_spill] sm:$0xff] }
 0x24b   :  { %v4799_v21 = vmul.f32 -1.442695, %v1234_v25  ;;  %v1242_v34 = vrot.slane %v1234_v25, 2  ;;  %v1253_v8 = vrot.slane %v1234_v25, 6  ;;  %v1250_v10 = vrot.slane %v1234_v25, 4  ;;  %v8405_v25 = vld [vmem:[#allocation24_spill] sm:$0xff] }
 0x24d   :  { %5190 = vpow2.f32 %v4799_v21  ;;  %v4800_v5 = vmul.f32 -1.442695, %v1242_v34  ;;  %v4801_v1 = vmul.f32 -1.442695, %v1253_v8  ;;  %v8406_v21 = vld [vmem:[#allocation20_spill] sm:$0xff]  ;;  %v8407_v34 = vld [vmem:[#allocation17_spill] sm:$0xff] }
 0x24e   :  { %v8409_v8 = vld [vmem:[#allocation26_spill] sm:$0xff] }
 0x24f   :  { %5192 = vpow2.f32 %v4800_v5  ;;  %v8408_v5 = vld [vmem:[#allocation22_spill] sm:$0xff] }
 0x250   :  { %5194 = vpow2.f32 %v4801_v1  ;;  %v8410_v1 = vld [vmem:[#allocation25_spill] sm:$0xff] }
 0x25a   :  { %v5191_v6 = vpop.eup %5190 }
 0x25b   :  { %v1238_v41 = vadd.f32 1.0, %v5191_v6  ;;  %v8411_v6 = vld [vmem:[#allocation21_spill] sm:$0xff] }
 0x25c   :  { %v5193_v19 = vpop.eup %5192 }
 0x25d   :  { %5196 = vrcp.f32 %v1238_v41  ;;  %v1247_v42 = vadd.f32 1.0, %v5193_v19  ;;  %v5195_v39 = vpop.eup %5194  ;;  %v8413_v41 = vld [vmem:[#allocation19_spill] sm:$0xff]  ;;  %v8414_v19 = vld [vmem:[#allocation29_spill] sm:$0xff] }
 0x25e   :  { %5198 = vtanh.f32 %v1250_v10  ;;  %v1258_v36 = vadd.f32 1.0, %v5195_v39  ;;  %v8412_v10 = vld [vmem:[#allocation18_spill] sm:$0xff]  ;;  %v8416_v39 = vld [vmem:[#allocation31_spill] sm:$0xff] }
 0x25f   :  { %5200 = vrcp.f32 %v1247_v42  ;;  %v8415_v42 = vld [vmem:[#allocation30_spill] sm:$0xff] }
 0x260   :  { %5202 = vrcp.f32 %v1258_v36  ;;  %v8420_v36 = vld [vmem:[#allocation35_spill] sm:$0xff] }
 0x26a   :  { %v5197_v11 = vpop.eup %5196 }
 0x26b   :  { %v5199_v45 = vpop.eup %5198 }
 0x26c   :  { %v5201_v32 = vpop.eup %5200  ;;  %v1262_v14 = vmul.f32 %v5199_v45, %v5197_v11  ;;  %v8417_v11 = vld [vmem:[#allocation32_spill] sm:$0xff]  ;;  %v8418_v45 = vld [vmem:[#allocation33_spill] sm:$0xff] }
 0x26d   :  { %v1261_v30 = vmul.f32 0.0, %v5201_v32  ;;  %v5203_v57 = vpop.eup %5202  ;;  %v8419_v32 = vld [vmem:[#allocation34_spill] sm:$0xff] }
 0x26f   :  { %v6509_v4 = vadd.f32 %v1262_v14, %v1261_v30  ;;  %v8421_v30 = vld [vmem:[#allocation36_spill] sm:$0xff]  ;;  %v8422_v14 = vld [vmem:[#allocation37_spill] sm:$0xff] }
 0x271   :  { %5204 = vtanh.f32 %v6509_v4 }
 0x27e   :  { %v5205_v15 = vpop.eup %5204 }
 0x27f   :  { %v1265_v40 = vmul.f32 %v5205_v15, %v5203_v57  ;;  %v8423_v57 = vld [vmem:[#allocation38_spill] sm:$0xff]  ;;  %v8424_v15 = vld [vmem:[#allocation39_spill] sm:$0xff] }
 0x281   :  { %1266 = vst [vmem:[#allocation3] sm:$0x3] %v1265_v40  ;;  %1333 = vmatmul.mubr.f32.vlgmr.msra.gmra.mxu0 %v1265_v40  ;;  %1404 = vmatmul.mubr.f32.vlgmr.msra.gmra.mxu1 %v1265_v40  ;;  %v8425_v40 = vld [vmem:[#allocation40_spill] sm:$0xff] }
 0x282   :  { %1468 = vmatpush1.msra.mxu0 %v6173_v24  ;;  %1539 = vmatpush1.msra.mxu1 %v6175_v51 }
 0x283   :  { %1469 = vmatprep.subr.mxu0 %v6177_v44  ;;  %1540 = vmatprep.subr.mxu1 %v6179_v60 }
 0x284   :  { %1470 = vmatpush1.msra.mxu0 %v6181_v58  ;;  %1541 = vmatpush1.msra.mxu1 %v6183_v63 }
 0x285   :  { %1471 = vmatprep.subr.mxu0 %v6189_v7  ;;  %1542 = vmatprep.subr.mxu1 %v6191_v2 }
 0x286   :  { %1472 = vmatpush1.msra.mxu0 %v6197_v31  ;;  %1543 = vmatpush1.msra.mxu1 %v6199_v18 }
 0x287   :  { %1473 = vmatprep.subr.mxu0 %v6203_v28  ;;  %1544 = vmatprep.subr.mxu1 %v6205_v26 }
 0x288   :  { %1474 = vmatpush1.msra.mxu0 %v6207_v37  ;;  %1545 = vmatpush1.msra.mxu1 %v6209_v49 }
 0x289   :  { %1475 = vmatprep.subr.mxu0 %v6213_v29  ;;  %1546 = vmatprep.subr.mxu1 %v6215_v55 }
 0x28a   :  { %1476 = vmatpush1.msra.mxu0 %v6219_v56  ;;  %1547 = vmatpush1.msra.mxu1 %v6221_v43 }
 0x28b   :  { %1477 = vmatprep.subr.mxu0 %v6225_v59  ;;  %1548 = vmatprep.subr.mxu1 %v6227_v48 }
 0x28c   :  { %1478 = vmatpush1.msra.mxu0 %v6231_v54  ;;  %1549 = vmatpush1.msra.mxu1 %v6233_v50 }
 0x28d   :  { %1479 = vmatprep.subr.mxu0 %v6237_v12  ;;  %1550 = vmatprep.subr.mxu1 %v6239_v13 }
 0x28e   :  { %1480 = vmatpush1.msra.mxu0 %v6243_v62  ;;  %1551 = vmatpush1.msra.mxu1 %v6245_v20 }
 0x28f   :  { %1481 = vmatprep.subr.mxu0 %v6249_v35  ;;  %1552 = vmatprep.subr.mxu1 %v6251_v27 }
 0x290   :  { %1482 = vmatpush1.msra.mxu0 %v6255_v0  ;;  %1553 = vmatpush1.msra.mxu1 %v6257_v52 }
 0x291   :  { %1483 = vmatprep.subr.mxu0 %v6261_v9  ;;  %1554 = vmatprep.subr.mxu1 %v6263_v47 }
 0x292   :  { %1484 = vmatpush1.msra.mxu0 %v6267_v22  ;;  %1555 = vmatpush1.msra.mxu1 %v8404_v46 }
 0x293   :  { %1485 = vmatprep.subr.mxu0 %v8405_v25  ;;  %1556 = vmatprep.subr.mxu1 %v8406_v21 }
 0x294   :  { %1486 = vmatpush1.msra.mxu0 %v8407_v34  ;;  %1557 = vmatpush1.msra.mxu1 %v8408_v5 }
 0x295   :  { %1487 = vmatprep.subr.mxu0 %v8409_v8  ;;  %1558 = vmatprep.subr.mxu1 %v8410_v1 }
 0x296   :  { %1488 = vmatpush1.msra.mxu0 %v8411_v6  ;;  %1559 = vmatpush1.msra.mxu1 %v8412_v10 }
 0x297   :  { %1489 = vmatprep.subr.mxu0 %v8413_v41  ;;  %1560 = vmatprep.subr.mxu1 %v8414_v19 }
 0x298   :  { %1490 = vmatpush1.msra.mxu0 %v8415_v42  ;;  %1561 = vmatpush1.msra.mxu1 %v8416_v39 }
 0x299   :  { %1491 = vmatprep.subr.mxu0 %v8417_v11  ;;  %1562 = vmatprep.subr.mxu1 %v8418_v45 }
 0x29a   :  { %1492 = vmatpush1.msra.mxu0 %v8419_v32  ;;  %1563 = vmatpush1.msra.mxu1 %v8420_v36 }
 0x29b   :  { %1493 = vmatprep.subr.mxu0 %v8421_v30  ;;  %1564 = vmatprep.subr.mxu1 %v8422_v14  ;;  %v8432_v30 = vmov 0.0   ;;  %v8433_v14 = vld [vmem:[#allocation47_spill] sm:$0xff] }
 0x29c   :  { %1494 = vmatpush1.msra.mxu0 %v8423_v57  ;;  %1565 = vmatpush1.msra.mxu1 %v8424_v15  ;;  %v6576_v15 = vld [vmem:[#allocation7 + $0x1e8] sm:$0xff] }
 0x29d   :  { %1495 = vmatprep.subr.mxu0 %v8425_v40  ;;  %1566 = vmatprep.subr.mxu1 %v8426_v38  ;;  %8434 = vst [vmem:[#allocation23_spill] sm:$0xff] %v6576_v15  ;;  %v6579_v38 = vld [vmem:[#allocation7 + $0x1f8] sm:$0xff] }
 0x29e   :  { %1496 = vmatpush1.msra.mxu0 %v8427_v17  ;;  %1567 = vmatpush1.msra.mxu1 %v8428_v33  ;;  %8435 = vst [vmem:[#allocation24_spill] sm:$0xff] %v6579_v38 }
 0x29f   :  { %1497 = vmatprep.subr.mxu0 %v8429_v61  ;;  %1568 = vmatprep.subr.mxu1 %v8430_v3 }
 0x2a0   :  { %1498 = vmatpush1.msra.mxu0 %v8431_v53  ;;  %1531 = vmatprep.mubr.f32.mxu0 %v8432_v30 }
 0x2a1   :  { %1569 = vmatpush1.msra.mxu1 %v8433_v14  ;;  %1602 = vmatprep.mubr.f32.mxu1 %v8432_v30 }
 0x2a2   :  { %1666 = vmatprep.subr.mxu0 %v6576_v15  ;;  %1737 = vmatprep.subr.mxu1 %v6579_v38 }
 0x341   :  { %v1334_v33 = vpop.f32.mrf.mxu0  ;;  %v1405_v61 = vpop.f32.mrf.mxu1 }
 0x343   :  { %v1336_v17 = vpop.f32.mrf.mxu0  ;;  %v1407_v3 = vpop.f32.mrf.mxu1 }
 0x344   :  { %v1414_v40 = vcombine.low %v1334_v33, %v1336_v17  ;;  %v1415_v53 = vcombine.low %v1405_v61, %v1407_v3 }
 0x346   :  { %v1422_v57 = vrot.slane %v1414_v40, %v6451_v23  ;;  %v1429_v14 = vrot.slane %v1415_v53, %v6451_v23 }
 0x348   :  { %v1430_v36 = vcombine.low %v1422_v57, %v1429_v14 }
 0x34a   :  { %v1432_v30 = vadd.f32 %v1430_v36, %v6470_v16 }
 0x34c   :  { %v4802_v32 = vmul.f32 -1.442695, %v1432_v30  ;;  %v1440_v45 = vrot.slane %v1432_v30, 2  ;;  %v1451_v11 = vrot.slane %v1432_v30, 6  ;;  %v1448_v42 = vrot.slane %v1432_v30, 4 }
 0x34e   :  { %5206 = vpow2.f32 %v4802_v32  ;;  %v4803_v15 = vmul.f32 -1.442695, %v1440_v45  ;;  %v4804_v38 = vmul.f32 -1.442695, %v1451_v11 }
 0x350   :  { %5208 = vpow2.f32 %v4803_v15 }
 0x351   :  { %5210 = vpow2.f32 %v4804_v38 }
 0x35b   :  { %v5207_v39 = vpop.eup %5206 }
 0x35c   :  { %v1436_v19 = vadd.f32 1.0, %v5207_v39 }
 0x35d   :  { %v5209_v41 = vpop.eup %5208 }
 0x35e   :  { %5212 = vrcp.f32 %v1436_v19  ;;  %v1445_v3 = vadd.f32 1.0, %v5209_v41  ;;  %v5211_v53 = vpop.eup %5210 }
 0x35f   :  { %5214 = vtanh.f32 %v1448_v42  ;;  %v1456_v17 = vadd.f32 1.0, %v5211_v53 }
 0x360   :  { %5216 = vrcp.f32 %v1445_v3 }
 0x361   :  { %5218 = vrcp.f32 %v1456_v17  ;;  %v6665_v17 = vld [vmem:[#allocation7 + $0x1f0] sm:$0xff] }
 0x36b   :  { %v5213_v33 = vpop.eup %5212 }
 0x36c   :  { %v5215_v61 = vpop.eup %5214 }
 0x36d   :  { %v5217_v16 = vpop.eup %5216  ;;  %v1460_v45 = vmul.f32 %v5215_v61, %v5213_v33 }
 0x36e   :  { %v1459_v32 = vmul.f32 %v5217_v16, %v6509_v4  ;;  %v5219_v39 = vpop.eup %5218  ;;  %v6662_v16 = vld [vmem:[#allocation7 + $0x1e0] sm:$0xff] }
 0x370   :  { %v6586_v36 = vadd.f32 %v1460_v45, %v1459_v32  ;;  %v6668_v32 = vld [vmem:[#allocation7 + $0x1c8] sm:$0xff]  ;;  %v6671_v45 = vld [vmem:[#allocation7 + $0x1d8] sm:$0xff] }
 0x372   :  { %5220 = vtanh.f32 %v6586_v36 }
 0x37f   :  { %v5221_v11 = vpop.eup %5220 }
 0x380   :  { %v1463_v38 = vmul.f32 %v5221_v11, %v5219_v39  ;;  %v6677_v39 = vld [vmem:[#allocation7 + $0x1d0] sm:$0xff]  ;;  %v6680_v11 = vld [vmem:[#allocation7 + $0x1a8] sm:$0xff] }
 0x382   :  { %1465 = vst [vmem:[#allocation3 + $0x2] sm:$0x3] %v1463_v38  ;;  %1532 = vmatmul.mubr.f32.vlgmr.msra.gmra.mxu0 %v1463_v38  ;;  %1603 = vmatmul.mubr.f32.vlgmr.msra.gmra.mxu1 %v1463_v38  ;;  %v6683_v38 = vld [vmem:[#allocation7 + $0x1b8] sm:$0xff] }
 0x383   :  { %1667 = vmatpush1.msra.mxu0 %v6173_v24  ;;  %1738 = vmatpush1.msra.mxu1 %v6175_v51  ;;  %v8436_v24 = vld [vmem:[#allocation19_spill] sm:$0xff]  ;;  %v8437_v51 = vld [vmem:[#allocation29_spill] sm:$0xff] }
 0x384   :  { %1668 = vmatprep.subr.mxu0 %v6177_v44  ;;  %1739 = vmatprep.subr.mxu1 %v6179_v60  ;;  %v8438_v44 = vld [vmem:[#allocation30_spill] sm:$0xff]  ;;  %v8439_v60 = vld [vmem:[#allocation31_spill] sm:$0xff] }
 0x385   :  { %1669 = vmatpush1.msra.mxu0 %v6181_v58  ;;  %1740 = vmatpush1.msra.mxu1 %v6183_v63  ;;  %v8440_v58 = vld [vmem:[#allocation32_spill] sm:$0xff]  ;;  %v8441_v63 = vld [vmem:[#allocation33_spill] sm:$0xff] }
 0x386   :  { %1670 = vmatprep.subr.mxu0 %v6189_v7  ;;  %1741 = vmatprep.subr.mxu1 %v6191_v2  ;;  %v8442_v7 = vld [vmem:[#allocation34_spill] sm:$0xff]  ;;  %v8443_v2 = vld [vmem:[#allocation35_spill] sm:$0xff] }
 0x387   :  { %1671 = vmatpush1.msra.mxu0 %v6197_v31  ;;  %1742 = vmatpush1.msra.mxu1 %v6199_v18  ;;  %v8444_v31 = vld [vmem:[#allocation36_spill] sm:$0xff]  ;;  %v8445_v18 = vld [vmem:[#allocation37_spill] sm:$0xff] }
 0x388   :  { %1672 = vmatprep.subr.mxu0 %v6203_v28  ;;  %1743 = vmatprep.subr.mxu1 %v6205_v26  ;;  %v8446_v28 = vld [vmem:[#allocation38_spill] sm:$0xff]  ;;  %v8447_v26 = vld [vmem:[#allocation39_spill] sm:$0xff] }
 0x389   :  { %1673 = vmatpush1.msra.mxu0 %v6207_v37  ;;  %1744 = vmatpush1.msra.mxu1 %v6209_v49  ;;  %v8448_v37 = vld [vmem:[#allocation40_spill] sm:$0xff]  ;;  %v8449_v49 = vld [vmem:[#allocation41_spill] sm:$0xff] }
 0x38a   :  { %1674 = vmatprep.subr.mxu0 %v6213_v29  ;;  %1745 = vmatprep.subr.mxu1 %v6215_v55  ;;  %v8450_v29 = vld [vmem:[#allocation42_spill] sm:$0xff]  ;;  %v8451_v55 = vld [vmem:[#allocation43_spill] sm:$0xff] }
 0x38b   :  { %1675 = vmatpush1.msra.mxu0 %v6219_v56  ;;  %1746 = vmatpush1.msra.mxu1 %v6221_v43  ;;  %v8452_v56 = vld [vmem:[#allocation44_spill] sm:$0xff]  ;;  %v8453_v43 = vld [vmem:[#allocation45_spill] sm:$0xff] }
 0x38c   :  { %1676 = vmatprep.subr.mxu0 %v6225_v59  ;;  %1747 = vmatprep.subr.mxu1 %v6227_v48  ;;  %v8454_v59 = vld [vmem:[#allocation46_spill] sm:$0xff]  ;;  %v8455_v48 = vmov 0.0  }
 0x38d   :  { %1677 = vmatpush1.msra.mxu0 %v6231_v54  ;;  %1748 = vmatpush1.msra.mxu1 %v6233_v50  ;;  %v8456_v54 = vld [vmem:[#allocation47_spill] sm:$0xff] }
 0x38e   :  { %1678 = vmatprep.subr.mxu0 %v6237_v12  ;;  %1749 = vmatprep.subr.mxu1 %v6239_v13  ;;  %v8457_v50 = vld [vmem:[#allocation23_spill] sm:$0xff]  ;;  %v8458_v12 = vld [vmem:[#allocation24_spill] sm:$0xff] }
 0x38f   :  { %1679 = vmatpush1.msra.mxu0 %v6243_v62  ;;  %1750 = vmatpush1.msra.mxu1 %v6245_v20 }
 0x390   :  { %1680 = vmatprep.subr.mxu0 %v6249_v35  ;;  %1751 = vmatprep.subr.mxu1 %v6251_v27 }
 0x391   :  { %1681 = vmatpush1.msra.mxu0 %v6255_v0  ;;  %1752 = vmatpush1.msra.mxu1 %v6257_v52 }
 0x392   :  { %1682 = vmatprep.subr.mxu0 %v6261_v9  ;;  %1753 = vmatprep.subr.mxu1 %v6263_v47 }
 0x393   :  { %1683 = vmatpush1.msra.mxu0 %v6267_v22  ;;  %1754 = vmatpush1.msra.mxu1 %v8404_v46  ;;  %v8459_v22 = vld [vmem:[#allocation48_spill] sm:$0xff] }
 0x394   :  { %1684 = vmatprep.subr.mxu0 %v8405_v25  ;;  %1755 = vmatprep.subr.mxu1 %v8406_v21 }
 0x395   :  { %1685 = vmatpush1.msra.mxu0 %v8407_v34  ;;  %1756 = vmatpush1.msra.mxu1 %v8408_v5 }
 0x396   :  { %1686 = vmatprep.subr.mxu0 %v8409_v8  ;;  %1757 = vmatprep.subr.mxu1 %v8410_v1 }
 0x397   :  { %1687 = vmatpush1.msra.mxu0 %v8411_v6  ;;  %1758 = vmatpush1.msra.mxu1 %v8412_v10 }
 0x398   :  { %1688 = vmatprep.subr.mxu0 %v8436_v24  ;;  %1759 = vmatprep.subr.mxu1 %v8437_v51  ;;  %v6686_v24 = vld [vmem:[#allocation7 + $0x1a0] sm:$0xff]  ;;  %v6689_v51 = vld [vmem:[#allocation7 + $0x1b0] sm:$0xff] }
 0x399   :  { %1689 = vmatpush1.msra.mxu0 %v8438_v44  ;;  %1760 = vmatpush1.msra.mxu1 %v8439_v60  ;;  %v6692_v44 = vld [vmem:[#allocation7 + $0x188] sm:$0xff]  ;;  %v6695_v60 = vld [vmem:[#allocation7 + $0x198] sm:$0xff] }
 0x39a   :  { %1690 = vmatprep.subr.mxu0 %v8440_v58  ;;  %1761 = vmatprep.subr.mxu1 %v8441_v63 }
 0x39b   :  { %1691 = vmatpush1.msra.mxu0 %v8442_v7  ;;  %1762 = vmatpush1.msra.mxu1 %v8443_v2 }
 0x39c   :  { %1692 = vmatprep.subr.mxu0 %v8444_v31  ;;  %1763 = vmatprep.subr.mxu1 %v8445_v18 }
 0x39d   :  { %1693 = vmatpush1.msra.mxu0 %v8446_v28  ;;  %1764 = vmatpush1.msra.mxu1 %v8447_v26 }
 0x39e   :  { %1694 = vmatprep.subr.mxu0 %v8448_v37  ;;  %1765 = vmatprep.subr.mxu1 %v8449_v49 }
 0x39f   :  { %1695 = vmatpush1.msra.mxu0 %v8450_v29  ;;  %1766 = vmatpush1.msra.mxu1 %v8451_v55 }
 0x3a0   :  { %1696 = vmatprep.subr.mxu0 %v8452_v56  ;;  %1767 = vmatprep.subr.mxu1 %v8453_v43 }
 0x3a1   :  { %1697 = vmatpush1.msra.mxu0 %v8454_v59  ;;  %1730 = vmatprep.mubr.f32.mxu0 %v8455_v48 }
 0x3a2   :  { %1768 = vmatpush1.msra.mxu1 %v8456_v54  ;;  %1801 = vmatprep.mubr.f32.mxu1 %v8455_v48 }
 0x3a3   :  { %1865 = vmatprep.subr.mxu0 %v8457_v50  ;;  %1936 = vmatprep.subr.mxu1 %v8458_v12 }
 0x442   :  { %v1533_v13 = vpop.f32.mrf.mxu0  ;;  %v1604_v62 = vpop.f32.mrf.mxu1 }
 0x444   :  { %v1535_v20 = vpop.f32.mrf.mxu0  ;;  %v1606_v35 = vpop.f32.mrf.mxu1 }
 0x445   :  { %v1613_v27 = vcombine.low %v1533_v13, %v1535_v20  ;;  %v1614_v0 = vcombine.low %v1604_v62, %v1606_v35  ;;  %v6698_v13 = vld [vmem:[#allocation7 + $0x180] sm:$0xff]  ;;  %v6701_v62 = vld [vmem:[#allocation7 + $0x190] sm:$0xff]  ;;  %v6704_v20 = vld [vmem:[#allocation7 + $0x168] sm:$0xff] }
 0x446   :  { %v6707_v35 = vld [vmem:[#allocation7 + $0x178] sm:$0xff] }
 0x447   :  { %v1621_v52 = vrot.slane %v1613_v27, %v6451_v23  ;;  %v1628_v9 = vrot.slane %v1614_v0, %v6451_v23  ;;  %v6710_v27 = vld [vmem:[#allocation7 + $0x160] sm:$0xff]  ;;  %v6713_v0 = vld [vmem:[#allocation7 + $0x170] sm:$0xff] }
 0x449   :  { %v1629_v47 = vcombine.low %v1621_v52, %v1628_v9  ;;  %v6716_v52 = vld [vmem:[#allocation7 + $0x148] sm:$0xff]  ;;  %v6719_v9 = vld [vmem:[#allocation7 + $0x158] sm:$0xff] }
 0x44b   :  { %v1631_v4 = vadd.f32 %v1629_v47, %v8459_v22  ;;  %v6722_v47 = vld [vmem:[#allocation7 + $0x140] sm:$0xff]  ;;  %v6725_v22 = vld [vmem:[#allocation7 + $0x150] sm:$0xff] }
 0x44d   :  { %v4805_v46 = vmul.f32 -1.442695, %v1631_v4  ;;  %v1639_v25 = vrot.slane %v1631_v4, 2  ;;  %v1650_v34 = vrot.slane %v1631_v4, 6  ;;  %v1647_v1 = vrot.slane %v1631_v4, 4  ;;  %v6728_v4 = vld [vmem:[#allocation7 + $0x128] sm:$0xff] }
 0x44f   :  { %5222 = vpow2.f32 %v4805_v46  ;;  %v4806_v21 = vmul.f32 -1.442695, %v1639_v25  ;;  %v4807_v5 = vmul.f32 -1.442695, %v1650_v34  ;;  %v6731_v46 = vld [vmem:[#allocation7 + $0x138] sm:$0xff]  ;;  %v6734_v25 = vld [vmem:[#allocation7 + $0x120] sm:$0xff] }
 0x450   :  { %v6740_v34 = vld [vmem:[#allocation7 + $0x108] sm:$0xff] }
 0x451   :  { %5224 = vpow2.f32 %v4806_v21  ;;  %v6737_v21 = vld [vmem:[#allocation7 + $0x130] sm:$0xff] }
 0x452   :  { %5226 = vpow2.f32 %v4807_v5  ;;  %v6743_v5 = vld [vmem:[#allocation7 + $0x118] sm:$0xff] }
 0x45c   :  { %v5223_v8 = vpop.eup %5222 }
 0x45d   :  { %v1635_v6 = vadd.f32 1.0, %v5223_v8  ;;  %v6746_v8 = vld [vmem:[#allocation7 + $0x100] sm:$0xff] }
 0x45e   :  { %v5225_v10 = vpop.eup %5224 }
 0x45f   :  { %5228 = vrcp.f32 %v1635_v6  ;;  %v1644_v41 = vadd.f32 1.0, %v5225_v10  ;;  %v5227_v19 = vpop.eup %5226  ;;  %v6752_v6 = vld [vmem:[#allocation7 + $0xe8] sm:$0xff]  ;;  %v6755_v10 = vld [vmem:[#allocation7 + $0xf8] sm:$0xff] }
 0x460   :  { %5230 = vtanh.f32 %v1647_v1  ;;  %v1655_v57 = vadd.f32 1.0, %v5227_v19  ;;  %v6749_v1 = vld [vmem:[#allocation7 + $0x110] sm:$0xff] }
 0x461   :  { %5232 = vrcp.f32 %v1644_v41  ;;  %v6758_v41 = vld [vmem:[#allocation7 + $0xe0] sm:$0xff]  ;;  %v6761_v19 = vld [vmem:[#allocation7 + $0xf0] sm:$0xff] }
 0x462   :  { %5234 = vrcp.f32 %v1655_v57  ;;  %v6773_v57 = vld [vmem:[#allocation7 + $0xd0] sm:$0xff] }
 0x463   :  { %8460 = vst [vmem:[#allocation20_spill] sm:$0xff] %v6773_v57 }
 0x46c   :  { %v5229_v42 = vpop.eup %5228 }
 0x46d   :  { %v5231_v30 = vpop.eup %5230 }
 0x46e   :  { %v5233_v14 = vpop.eup %5232  ;;  %v1659_v40 = vmul.f32 %v5231_v30, %v5229_v42  ;;  %v6764_v42 = vld [vmem:[#allocation7 + $0xc8] sm:$0xff]  ;;  %v6767_v30 = vld [vmem:[#allocation7 + $0xd8] sm:$0xff] }
 0x46f   :  { %v1658_v15 = vmul.f32 %v5233_v14, %v6586_v36  ;;  %v5235_v53 = vpop.eup %5234  ;;  %v6674_v36 = vld [vmem:[#allocation7 + $0x1c0] sm:$0xff] }
 0x470   :  { %v6770_v14 = vld [vmem:[#allocation7 + $0xc0] sm:$0xff] }
 0x471   :  { %v6659_v3 = vadd.f32 %v1659_v40, %v1658_v15  ;;  %v6776_v15 = vld [vmem:[#allocation7 + $0xa8] sm:$0xff]  ;;  %v6779_v40 = vld [vmem:[#allocation7 + $0xb8] sm:$0xff] }
 0x472   :  { %8461 = vst [vmem:[#allocation17_spill] sm:$0xff] %v6776_v15  ;;  %8462 = vst [vmem:[#allocation22_spill] sm:$0xff] %v6779_v40 }
 0x473   :  { %5236 = vtanh.f32 %v6659_v3 }
 0x480   :  { %v5237_v33 = vpop.eup %5236 }
 0x481   :  { %v1662_v61 = vmul.f32 %v5237_v33, %v5235_v53  ;;  %v6782_v53 = vld [vmem:[#allocation7 + $0xa0] sm:$0xff]  ;;  %v6785_v33 = vld [vmem:[#allocation7 + $0xb0] sm:$0xff] }
 0x483   :  { %1664 = vst [vmem:[#allocation3 + $0x4] sm:$0x3] %v1662_v61  ;;  %1731 = vmatmul.mubr.f32.vlgmr.msra.gmra.mxu0 %v1662_v61  ;;  %1802 = vmatmul.mubr.f32.vlgmr.msra.gmra.mxu1 %v1662_v61  ;;  %v6788_v61 = vld [vmem:[#allocation7 + $0x88] sm:$0xff] }
 0x484   :  { %1866 = vmatpush1.msra.mxu0 %v6662_v16  ;;  %1937 = vmatpush1.msra.mxu1 %v6665_v17  ;;  %8463 = vst [vmem:[#allocation26_spill] sm:$0xff] %v6788_v61 }
 0x485   :  { %1867 = vmatprep.subr.mxu0 %v6668_v32  ;;  %1938 = vmatprep.subr.mxu1 %v6671_v45 }
 0x486   :  { %1868 = vmatpush1.msra.mxu0 %v6674_v36  ;;  %1939 = vmatpush1.msra.mxu1 %v6677_v39 }
 0x487   :  { %1869 = vmatprep.subr.mxu0 %v6680_v11  ;;  %1940 = vmatprep.subr.mxu1 %v6683_v38 }
 0x488   :  { %1870 = vmatpush1.msra.mxu0 %v6686_v24  ;;  %1941 = vmatpush1.msra.mxu1 %v6689_v51 }
 0x489   :  { %1871 = vmatprep.subr.mxu0 %v6692_v44  ;;  %1942 = vmatprep.subr.mxu1 %v6695_v60 }
 0x48a   :  { %1872 = vmatpush1.msra.mxu0 %v6698_v13  ;;  %1943 = vmatpush1.msra.mxu1 %v6701_v62 }
 0x48b   :  { %1873 = vmatprep.subr.mxu0 %v6704_v20  ;;  %1944 = vmatprep.subr.mxu1 %v6707_v35 }
 0x48c   :  { %1874 = vmatpush1.msra.mxu0 %v6710_v27  ;;  %1945 = vmatpush1.msra.mxu1 %v6713_v0 }
 0x48d   :  { %1875 = vmatprep.subr.mxu0 %v6716_v52  ;;  %1946 = vmatprep.subr.mxu1 %v6719_v9 }
 0x48e   :  { %1876 = vmatpush1.msra.mxu0 %v6722_v47  ;;  %1947 = vmatpush1.msra.mxu1 %v6725_v22 }
 0x48f   :  { %1877 = vmatprep.subr.mxu0 %v6728_v4  ;;  %1948 = vmatprep.subr.mxu1 %v6731_v46 }
 0x490   :  { %1878 = vmatpush1.msra.mxu0 %v6734_v25  ;;  %1949 = vmatpush1.msra.mxu1 %v6737_v21 }
 0x491   :  { %1879 = vmatprep.subr.mxu0 %v6740_v34  ;;  %1950 = vmatprep.subr.mxu1 %v6743_v5 }
 0x492   :  { %1880 = vmatpush1.msra.mxu0 %v6746_v8  ;;  %1951 = vmatpush1.msra.mxu1 %v6749_v1 }
 0x493   :  { %1881 = vmatprep.subr.mxu0 %v6752_v6  ;;  %1952 = vmatprep.subr.mxu1 %v6755_v10 }
 0x494   :  { %1882 = vmatpush1.msra.mxu0 %v6758_v41  ;;  %1953 = vmatpush1.msra.mxu1 %v6761_v19 }
 0x495   :  { %1883 = vmatprep.subr.mxu0 %v6764_v42  ;;  %1954 = vmatprep.subr.mxu1 %v6767_v30 }
 0x496   :  { %1884 = vmatpush1.msra.mxu0 %v6770_v14  ;;  %1955 = vmatpush1.msra.mxu1 %v6773_v57  ;;  %v6791_v57 = vld [vmem:[#allocation7 + $0x98] sm:$0xff] }
 0x497   :  { %1885 = vmatprep.subr.mxu0 %v6776_v15  ;;  %1956 = vmatprep.subr.mxu1 %v6779_v40  ;;  %8464 = vst [vmem:[#allocation25_spill] sm:$0xff] %v6791_v57  ;;  %v6794_v15 = vld [vmem:[#allocation7 + $0x80] sm:$0xff]  ;;  %v6797_v40 = vld [vmem:[#allocation7 + $0x90] sm:$0xff] }
 0x498   :  { %1886 = vmatpush1.msra.mxu0 %v6782_v53  ;;  %1957 = vmatpush1.msra.mxu1 %v6785_v33  ;;  %8465 = vst [vmem:[#allocation21_spill] sm:$0xff] %v6794_v15  ;;  %8466 = vst [vmem:[#allocation18_spill] sm:$0xff] %v6797_v40 }
 0x499   :  { %1887 = vmatprep.subr.mxu0 %v6788_v61  ;;  %1958 = vmatprep.subr.mxu1 %v6791_v57 }
 0x49a   :  { %1888 = vmatpush1.msra.mxu0 %v6794_v15  ;;  %1959 = vmatpush1.msra.mxu1 %v6797_v40 }
 0x49b   :  { %1889 = vmatprep.subr.mxu0 %v8440_v58  ;;  %1960 = vmatprep.subr.mxu1 %v8441_v63 }
 0x49c   :  { %1890 = vmatpush1.msra.mxu0 %v8442_v7  ;;  %1961 = vmatpush1.msra.mxu1 %v8443_v2 }
 0x49d   :  { %1891 = vmatprep.subr.mxu0 %v8444_v31  ;;  %1962 = vmatprep.subr.mxu1 %v8445_v18 }
 0x49e   :  { %1892 = vmatpush1.msra.mxu0 %v8446_v28  ;;  %1963 = vmatpush1.msra.mxu1 %v8447_v26 }
 0x49f   :  { %1893 = vmatprep.subr.mxu0 %v8448_v37  ;;  %1964 = vmatprep.subr.mxu1 %v8449_v49  ;;  %v8467_v49 = vld [vmem:[#allocation28_spill] sm:$0xff] }
 0x4a0   :  { %1894 = vmatpush1.msra.mxu0 %v8450_v29  ;;  %1965 = vmatpush1.msra.mxu1 %v8451_v55 }
 0x4a1   :  { %1895 = vmatprep.subr.mxu0 %v8452_v56  ;;  %1966 = vmatprep.subr.mxu1 %v8453_v43 }
 0x4a2   :  { %1896 = vmatpush1.msra.mxu0 %v8454_v59  ;;  %1929 = vmatprep.mubr.f32.mxu0 %v8455_v48 }
 0x4a3   :  { %1967 = vmatpush1.msra.mxu1 %v8456_v54  ;;  %2000 = vmatprep.mubr.f32.mxu1 %v8455_v48 }
 0x4a4   :  { %2064 = vmatprep.subr.mxu0 %v8457_v50  ;;  %2135 = vmatprep.subr.mxu1 %v8458_v12 }
 0x543   :  { %v1732_v58 = vpop.f32.mrf.mxu0  ;;  %v1803_v63 = vpop.f32.mrf.mxu1 }
 0x545   :  { %v1734_v7 = vpop.f32.mrf.mxu0  ;;  %v1805_v2 = vpop.f32.mrf.mxu1 }
 0x546   :  { %v1812_v31 = vcombine.low %v1732_v58, %v1734_v7  ;;  %v1813_v18 = vcombine.low %v1803_v63, %v1805_v2 }
 0x548   :  { %v1820_v28 = vrot.slane %v1812_v31, %v6451_v23  ;;  %v1827_v26 = vrot.slane %v1813_v18, %v6451_v23 }
 0x54a   :  { %v1828_v37 = vcombine.low %v1820_v28, %v1827_v26 }
 0x54c   :  { %v1830_v29 = vadd.f32 %v1828_v37, %v8467_v49 }
 0x54e   :  { %v4808_v55 = vmul.f32 -1.442695, %v1830_v29  ;;  %v1838_v56 = vrot.slane %v1830_v29, 2  ;;  %v1849_v59 = vrot.slane %v1830_v29, 6  ;;  %v1846_v50 = vrot.slane %v1830_v29, 4 }
 0x550   :  { %5238 = vpow2.f32 %v4808_v55  ;;  %v4809_v43 = vmul.f32 -1.442695, %v1838_v56  ;;  %v4810_v54 = vmul.f32 -1.442695, %v1849_v59  ;;  %v6873_v55 = vld [vmem:[#allocation7 + $0x68] sm:$0xff]  ;;  %v6876_v56 = vld [vmem:[#allocation7 + $0x78] sm:$0xff] }
 0x551   :  { %8472 = vst [vmem:[#allocation19_spill] sm:$0xff] %v6873_v55  ;;  %8473 = vst [vmem:[#allocation29_spill] sm:$0xff] %v6876_v56  ;;  %v6882_v59 = vld [vmem:[#allocation7 + $0x70] sm:$0xff] }
 0x552   :  { %5240 = vpow2.f32 %v4809_v43  ;;  %v6879_v43 = vld [vmem:[#allocation7 + $0x60] sm:$0xff]  ;;  %8475 = vst [vmem:[#allocation31_spill] sm:$0xff] %v6882_v59 }
 0x553   :  { %5242 = vpow2.f32 %v4810_v54  ;;  %8474 = vst [vmem:[#allocation30_spill] sm:$0xff] %v6879_v43  ;;  %v6885_v54 = vld [vmem:[#allocation7 + $0x48] sm:$0xff] }
 0x554   :  { %8476 = vst [vmem:[#allocation32_spill] sm:$0xff] %v6885_v54 }
 0x55d   :  { %v5239_v12 = vpop.eup %5238 }
 0x55e   :  { %v1834_v48 = vadd.f32 1.0, %v5239_v12 }
 0x55f   :  { %v5241_v40 = vpop.eup %5240 }
 0x560   :  { %5244 = vrcp.f32 %v1834_v48  ;;  %v1843_v58 = vadd.f32 1.0, %v5241_v40  ;;  %v5243_v63 = vpop.eup %5242  ;;  %v8468_v48 = vld [vmem:[#allocation20_spill] sm:$0xff]  ;;  %v8471_v40 = vld [vmem:[#allocation18_spill] sm:$0xff] }
 0x561   :  { %5246 = vtanh.f32 %v1846_v50  ;;  %v1854_v18 = vadd.f32 1.0, %v5243_v63  ;;  %v8469_v50 = vld [vmem:[#allocation17_spill] sm:$0xff] }
 0x562   :  { %5248 = vrcp.f32 %v1843_v58  ;;  %v6888_v58 = vld [vmem:[#allocation7 + $0x58] sm:$0xff]  ;;  %v6891_v63 = vld [vmem:[#allocation7 + $0x40] sm:$0xff] }
 0x563   :  { %5250 = vrcp.f32 %v1854_v18  ;;  %8477 = vst [vmem:[#allocation33_spill] sm:$0xff] %v6888_v58  ;;  %8478 = vst [vmem:[#allocation34_spill] sm:$0xff] %v6891_v63  ;;  %v6903_v18 = vld [vmem:[#allocation7 + $0x20] sm:$0xff] }
 0x564   :  { %8482 = vst [vmem:[#allocation38_spill] sm:$0xff] %v6903_v18 }
 0x56d   :  { %v5245_v7 = vpop.eup %5244 }
 0x56e   :  { %v5247_v2 = vpop.eup %5246 }
 0x56f   :  { %v5249_v31 = vpop.eup %5248  ;;  %v1858_v26 = vmul.f32 %v5247_v2, %v5245_v7  ;;  %v6894_v7 = vld [vmem:[#allocation7 + $0x50] sm:$0xff]  ;;  %v6897_v2 = vld [vmem:[#allocation7 + $0x28] sm:$0xff] }
 0x570   :  { %v1857_v28 = vmul.f32 %v5249_v31, %v6659_v3  ;;  %v5251_v12 = vpop.eup %5250  ;;  %v8470_v3 = vld [vmem:[#allocation22_spill] sm:$0xff]  ;;  %8479 = vst [vmem:[#allocation35_spill] sm:$0xff] %v6894_v7  ;;  %8480 = vst [vmem:[#allocation36_spill] sm:$0xff] %v6897_v2  ;;  %v6900_v31 = vld [vmem:[#allocation7 + $0x38] sm:$0xff] }
 0x571   :  { %8481 = vst [vmem:[#allocation37_spill] sm:$0xff] %v6900_v31 }
 0x572   :  { %v6824_v37 = vadd.f32 %v1858_v26, %v1857_v28  ;;  %v6906_v28 = vld [vmem:[#allocation7 + $0x30] sm:$0xff]  ;;  %v6909_v26 = vld [vmem:[#allocation7 + $0x8] sm:$0xff] }
 0x573   :  { %8483 = vst [vmem:[#allocation39_spill] sm:$0xff] %v6906_v28  ;;  %8484 = vst [vmem:[#allocation40_spill] sm:$0xff] %v6909_v26 }
 0x574   :  { %5252 = vtanh.f32 %v6824_v37 }
 0x581   :  { %v5253_v49 = vpop.eup %5252 }
 0x582   :  { %v1861_v29 = vmul.f32 %v5253_v49, %v5251_v12  ;;  %v6912_v12 = vld [vmem:[#allocation7 + $0x18] sm:$0xff]  ;;  %v6915_v49 = vld [vmem:[#allocation7] sm:$0xff] }
 0x583   :  { %8485 = vst [vmem:[#allocation41_spill] sm:$0xff] %v6912_v12  ;;  %8486 = vst [vmem:[#allocation42_spill] sm:$0xff] %v6915_v49 }
 0x584   :  { %1863 = vst [vmem:[#allocation3 + $0x6] sm:$0x3] %v1861_v29  ;;  %1930 = vmatmul.mubr.f32.vlgmr.msra.gmra.mxu0 %v1861_v29  ;;  %2001 = vmatmul.mubr.f32.vlgmr.msra.gmra.mxu1 %v1861_v29  ;;  %v8487_v29 = vmov 0.0  }
 0x585   :  { %2065 = vmatpush1.msra.mxu0 %v6662_v16  ;;  %2136 = vmatpush1.msra.mxu1 %v6665_v17 }
 0x586   :  { %2066 = vmatprep.subr.mxu0 %v6668_v32  ;;  %2137 = vmatprep.subr.mxu1 %v6671_v45 }
 0x587   :  { %2067 = vmatpush1.msra.mxu0 %v6674_v36  ;;  %2138 = vmatpush1.msra.mxu1 %v6677_v39 }
 0x588   :  { %2068 = vmatprep.subr.mxu0 %v6680_v11  ;;  %2139 = vmatprep.subr.mxu1 %v6683_v38 }
 0x589   :  { %2069 = vmatpush1.msra.mxu0 %v6686_v24  ;;  %2140 = vmatpush1.msra.mxu1 %v6689_v51 }
 0x58a   :  { %2070 = vmatprep.subr.mxu0 %v6692_v44  ;;  %2141 = vmatprep.subr.mxu1 %v6695_v60 }
 0x58b   :  { %2071 = vmatpush1.msra.mxu0 %v6698_v13  ;;  %2142 = vmatpush1.msra.mxu1 %v6701_v62 }
 0x58c   :  { %2072 = vmatprep.subr.mxu0 %v6704_v20  ;;  %2143 = vmatprep.subr.mxu1 %v6707_v35 }
 0x58d   :  { %2073 = vmatpush1.msra.mxu0 %v6710_v27  ;;  %2144 = vmatpush1.msra.mxu1 %v6713_v0 }
 0x58e   :  { %2074 = vmatprep.subr.mxu0 %v6716_v52  ;;  %2145 = vmatprep.subr.mxu1 %v6719_v9 }
 0x58f   :  { %2075 = vmatpush1.msra.mxu0 %v6722_v47  ;;  %2146 = vmatpush1.msra.mxu1 %v6725_v22 }
 0x590   :  { %2076 = vmatprep.subr.mxu0 %v6728_v4  ;;  %2147 = vmatprep.subr.mxu1 %v6731_v46 }
 0x591   :  { %2077 = vmatpush1.msra.mxu0 %v6734_v25  ;;  %2148 = vmatpush1.msra.mxu1 %v6737_v21 }
 0x592   :  { %2078 = vmatprep.subr.mxu0 %v6740_v34  ;;  %2149 = vmatprep.subr.mxu1 %v6743_v5 }
 0x593   :  { %2079 = vmatpush1.msra.mxu0 %v6746_v8  ;;  %2150 = vmatpush1.msra.mxu1 %v6749_v1 }
 0x594   :  { %2080 = vmatprep.subr.mxu0 %v6752_v6  ;;  %2151 = vmatprep.subr.mxu1 %v6755_v10 }
 0x595   :  { %2081 = vmatpush1.msra.mxu0 %v6758_v41  ;;  %2152 = vmatpush1.msra.mxu1 %v6761_v19 }
 0x596   :  { %2082 = vmatprep.subr.mxu0 %v6764_v42  ;;  %2153 = vmatprep.subr.mxu1 %v6767_v30 }
 0x597   :  { %2083 = vmatpush1.msra.mxu0 %v6770_v14  ;;  %2154 = vmatpush1.msra.mxu1 %v8468_v48 }
 0x598   :  { %2084 = vmatprep.subr.mxu0 %v8469_v50  ;;  %2155 = vmatprep.subr.mxu1 %v8470_v3 }
 0x599   :  { %2085 = vmatpush1.msra.mxu0 %v6782_v53  ;;  %2156 = vmatpush1.msra.mxu1 %v6785_v33 }
 0x59a   :  { %2086 = vmatprep.subr.mxu0 %v6788_v61  ;;  %2157 = vmatprep.subr.mxu1 %v6791_v57 }
 0x59b   :  { %2087 = vmatpush1.msra.mxu0 %v6794_v15  ;;  %2158 = vmatpush1.msra.mxu1 %v8471_v40 }
 0x59c   :  { %2088 = vmatprep.subr.mxu0 %v6873_v55  ;;  %2159 = vmatprep.subr.mxu1 %v6876_v56 }
 0x59d   :  { %2089 = vmatpush1.msra.mxu0 %v6879_v43  ;;  %2160 = vmatpush1.msra.mxu1 %v6882_v59  ;;  %v8491_v43 = vld [vmem:[#allocation50_spill] sm:$0xff] }
 0x59e   :  { %2090 = vmatprep.subr.mxu0 %v6885_v54  ;;  %2161 = vmatprep.subr.mxu1 %v6888_v58 }
 0x59f   :  { %2091 = vmatpush1.msra.mxu0 %v6891_v63  ;;  %2162 = vmatpush1.msra.mxu1 %v6894_v7 }
 0x5a0   :  { %2092 = vmatprep.subr.mxu0 %v6897_v2  ;;  %2163 = vmatprep.subr.mxu1 %v6900_v31  ;;  %v6919_v31 = vld [vmem:[#allocation7 + $0x10] sm:$0xff] }
 0x5a1   :  { %2093 = vmatpush1.msra.mxu0 %v6903_v18  ;;  %2164 = vmatpush1.msra.mxu1 %v6906_v28  ;;  %8488 = vst [vmem:[#allocation43_spill] sm:$0xff] %v6919_v31  ;;  %v8489_v28 = vld [vmem:[#allocation23_spill] sm:$0xff]  ;;  %v8490_v18 = vld [vmem:[#allocation24_spill] sm:$0xff] }
 0x5a2   :  { %2094 = vmatprep.subr.mxu0 %v6909_v26  ;;  %2165 = vmatprep.subr.mxu1 %v6912_v12 }
 0x5a3   :  { %2095 = vmatpush1.msra.mxu0 %v6915_v49  ;;  %2128 = vmatprep.mubr.f32.mxu0 %v8487_v29 }
 0x5a4   :  { %2166 = vmatpush1.msra.mxu1 %v6919_v31  ;;  %2199 = vmatprep.mubr.f32.mxu1 %v8487_v29 }
 0x5a5   :  { %2263 = vmatprep.subr.mxu0 %v8489_v28  ;;  %2334 = vmatprep.subr.mxu1 %v8490_v18 }
 0x644   :  { %v1931_v26 = vpop.f32.mrf.mxu0  ;;  %v2002_v2 = vpop.f32.mrf.mxu1 }
 0x646   :  { %v1933_v7 = vpop.f32.mrf.mxu0  ;;  %v2004_v12 = vpop.f32.mrf.mxu1 }
 0x647   :  { %v2011_v63 = vcombine.low %v1931_v26, %v1933_v7  ;;  %v2012_v58 = vcombine.low %v2002_v2, %v2004_v12  ;;  %v8497_v26 = vld [vmem:[#allocation29_spill] sm:$0xff]  ;;  %v8498_v12 = vld [vmem:[#allocation30_spill] sm:$0xff] }
 0x649   :  { %v2019_v49 = vrot.slane %v2011_v63, %v6451_v23  ;;  %v2026_v54 = vrot.slane %v2012_v58, %v6451_v23 }
 0x64b   :  { %v2027_v59 = vcombine.low %v2019_v49, %v2026_v54  ;;  %v8499_v49 = vld [vmem:[#allocation31_spill] sm:$0xff] }
 0x64d   :  { %v2029_v56 = vadd.f32 %v2027_v59, %v8491_v43 }
 0x64f   :  { %v4811_v31 = vmul.f32 -1.442695, %v2029_v56  ;;  %v2037_v55 = vrot.slane %v2029_v56, 2  ;;  %v2048_v28 = vrot.slane %v2029_v56, 6  ;;  %v2045_v15 = vrot.slane %v2029_v56, 4 }
 0x651   :  { %5254 = vpow2.f32 %v4811_v31  ;;  %v4812_v29 = vmul.f32 -1.442695, %v2037_v55  ;;  %v4813_v18 = vmul.f32 -1.442695, %v2048_v28  ;;  %v8496_v28 = vld [vmem:[#allocation19_spill] sm:$0xff] }
 0x653   :  { %5256 = vpow2.f32 %v4812_v29  ;;  %v8500_v29 = vld [vmem:[#allocation32_spill] sm:$0xff] }
 0x654   :  { %5258 = vpow2.f32 %v4813_v18 }
 0x65e   :  { %v5255_v40 = vpop.eup %5254 }
 0x65f   :  { %v2033_v57 = vadd.f32 1.0, %v5255_v40 }
 0x660   :  { %v5257_v61 = vpop.eup %5256 }
 0x661   :  { %5260 = vrcp.f32 %v2033_v57  ;;  %v2042_v7 = vadd.f32 1.0, %v5257_v61  ;;  %v5259_v58 = vpop.eup %5258  ;;  %v8492_v57 = vld [vmem:[#allocation26_spill] sm:$0xff]  ;;  %v8494_v61 = vld [vmem:[#allocation21_spill] sm:$0xff] }
 0x662   :  { %5262 = vtanh.f32 %v2045_v15  ;;  %v2053_v59 = vadd.f32 1.0, %v5259_v58  ;;  %v8493_v15 = vld [vmem:[#allocation25_spill] sm:$0xff]  ;;  %v8502_v58 = vld [vmem:[#allocation34_spill] sm:$0xff] }
 0x663   :  { %5264 = vrcp.f32 %v2042_v7  ;;  %v8501_v7 = vld [vmem:[#allocation33_spill] sm:$0xff] }
 0x664   :  { %5266 = vrcp.f32 %v2053_v59  ;;  %v8506_v59 = vld [vmem:[#allocation38_spill] sm:$0xff] }
 0x66e   :  { %v5261_v54 = vpop.eup %5260 }
 0x66f   :  { %v5263_v63 = vpop.eup %5262 }
 0x670   :  { %v5265_v43 = vpop.eup %5264  ;;  %v2057_v55 = vmul.f32 %v5263_v63, %v5261_v54  ;;  %v8503_v54 = vld [vmem:[#allocation35_spill] sm:$0xff]  ;;  %v8504_v63 = vld [vmem:[#allocation36_spill] sm:$0xff] }
 0x671   :  { %v2056_v2 = vmul.f32 %v5265_v43, %v6824_v37  ;;  %v5267_v40 = vpop.eup %5266  ;;  %v8495_v37 = vld [vmem:[#allocation18_spill] sm:$0xff]  ;;  %v8505_v43 = vld [vmem:[#allocation37_spill] sm:$0xff] }
 0x673   :  { %v6929_v31 = vadd.f32 %v2057_v55, %v2056_v2  ;;  %v8507_v2 = vld [vmem:[#allocation39_spill] sm:$0xff]  ;;  %v8508_v55 = vld [vmem:[#allocation40_spill] sm:$0xff] }
 0x675   :  { %5268 = vtanh.f32 %v6929_v31 }
 0x682   :  { %v5269_v56 = vpop.eup %5268 }
 0x683   :  { %v2060_v18 = vmul.f32 %v5269_v56, %v5267_v40  ;;  %v8509_v40 = vld [vmem:[#allocation41_spill] sm:$0xff]  ;;  %v8510_v56 = vld [vmem:[#allocation42_spill] sm:$0xff] }
 0x685   :  { %2062 = vst [vmem:[#allocation3 + $0x8] sm:$0x3] %v2060_v18  ;;  %2129 = vmatmul.mubr.f32.vlgmr.msra.gmra.mxu0 %v2060_v18  ;;  %2200 = vmatmul.mubr.f32.vlgmr.msra.gmra.mxu1 %v2060_v18  ;;  %v8511_v18 = vmov 0.0  }
 0x686   :  { %2264 = vmatpush1.msra.mxu0 %v6662_v16  ;;  %2335 = vmatpush1.msra.mxu1 %v6665_v17 }
 0x687   :  { %2265 = vmatprep.subr.mxu0 %v6668_v32  ;;  %2336 = vmatprep.subr.mxu1 %v6671_v45 }
 0x688   :  { %2266 = vmatpush1.msra.mxu0 %v6674_v36  ;;  %2337 = vmatpush1.msra.mxu1 %v6677_v39 }
 0x689   :  { %2267 = vmatprep.subr.mxu0 %v6680_v11  ;;  %2338 = vmatprep.subr.mxu1 %v6683_v38 }
 0x68a   :  { %2268 = vmatpush1.msra.mxu0 %v6686_v24  ;;  %2339 = vmatpush1.msra.mxu1 %v6689_v51 }
 0x68b   :  { %2269 = vmatprep.subr.mxu0 %v6692_v44  ;;  %2340 = vmatprep.subr.mxu1 %v6695_v60 }
 0x68c   :  { %2270 = vmatpush1.msra.mxu0 %v6698_v13  ;;  %2341 = vmatpush1.msra.mxu1 %v6701_v62 }
 0x68d   :  { %2271 = vmatprep.subr.mxu0 %v6704_v20  ;;  %2342 = vmatprep.subr.mxu1 %v6707_v35 }
 0x68e   :  { %2272 = vmatpush1.msra.mxu0 %v6710_v27  ;;  %2343 = vmatpush1.msra.mxu1 %v6713_v0 }
 0x68f   :  { %2273 = vmatprep.subr.mxu0 %v6716_v52  ;;  %2344 = vmatprep.subr.mxu1 %v6719_v9 }
 0x690   :  { %2274 = vmatpush1.msra.mxu0 %v6722_v47  ;;  %2345 = vmatpush1.msra.mxu1 %v6725_v22 }
 0x691   :  { %2275 = vmatprep.subr.mxu0 %v6728_v4  ;;  %2346 = vmatprep.subr.mxu1 %v6731_v46 }
 0x692   :  { %2276 = vmatpush1.msra.mxu0 %v6734_v25  ;;  %2347 = vmatpush1.msra.mxu1 %v6737_v21 }
 0x693   :  { %2277 = vmatprep.subr.mxu0 %v6740_v34  ;;  %2348 = vmatprep.subr.mxu1 %v6743_v5 }
 0x694   :  { %2278 = vmatpush1.msra.mxu0 %v6746_v8  ;;  %2349 = vmatpush1.msra.mxu1 %v6749_v1 }
 0x695   :  { %2279 = vmatprep.subr.mxu0 %v6752_v6  ;;  %2350 = vmatprep.subr.mxu1 %v6755_v10 }
 0x696   :  { %2280 = vmatpush1.msra.mxu0 %v6758_v41  ;;  %2351 = vmatpush1.msra.mxu1 %v6761_v19 }
 0x697   :  { %2281 = vmatprep.subr.mxu0 %v6764_v42  ;;  %2352 = vmatprep.subr.mxu1 %v6767_v30 }
 0x698   :  { %2282 = vmatpush1.msra.mxu0 %v6770_v14  ;;  %2353 = vmatpush1.msra.mxu1 %v8468_v48 }
 0x699   :  { %2283 = vmatprep.subr.mxu0 %v8469_v50  ;;  %2354 = vmatprep.subr.mxu1 %v8470_v3 }
 0x69a   :  { %2284 = vmatpush1.msra.mxu0 %v6782_v53  ;;  %2355 = vmatpush1.msra.mxu1 %v6785_v33 }
 0x69b   :  { %2285 = vmatprep.subr.mxu0 %v8492_v57  ;;  %2356 = vmatprep.subr.mxu1 %v8493_v15 }
 0x69c   :  { %2286 = vmatpush1.msra.mxu0 %v8494_v61  ;;  %2357 = vmatpush1.msra.mxu1 %v8495_v37 }
 0x69d   :  { %2287 = vmatprep.subr.mxu0 %v8496_v28  ;;  %2358 = vmatprep.subr.mxu1 %v8497_v26 }
 0x69e   :  { %2288 = vmatpush1.msra.mxu0 %v8498_v12  ;;  %2359 = vmatpush1.msra.mxu1 %v8499_v49  ;;  %v8515_v12 = vld [vmem:[#allocation49_spill] sm:$0xff] }
 0x69f   :  { %2289 = vmatprep.subr.mxu0 %v8500_v29  ;;  %2360 = vmatprep.subr.mxu1 %v8501_v7  ;;  %v8512_v7 = vld [vmem:[#allocation43_spill] sm:$0xff] }
 0x6a0   :  { %2290 = vmatpush1.msra.mxu0 %v8502_v58  ;;  %2361 = vmatpush1.msra.mxu1 %v8503_v54  ;;  %v8513_v54 = vld [vmem:[#allocation23_spill] sm:$0xff] }
 0x6a1   :  { %2291 = vmatprep.subr.mxu0 %v8504_v63  ;;  %2362 = vmatprep.subr.mxu1 %v8505_v43  ;;  %v8514_v63 = vld [vmem:[#allocation24_spill] sm:$0xff] }
 0x6a2   :  { %2292 = vmatpush1.msra.mxu0 %v8506_v59  ;;  %2363 = vmatpush1.msra.mxu1 %v8507_v2 }
 0x6a3   :  { %2293 = vmatprep.subr.mxu0 %v8508_v55  ;;  %2364 = vmatprep.subr.mxu1 %v8509_v40 }
 0x6a4   :  { %2294 = vmatpush1.msra.mxu0 %v8510_v56  ;;  %2327 = vmatprep.mubr.f32.mxu0 %v8511_v18 }
 0x6a5   :  { %2365 = vmatpush1.msra.mxu1 %v8512_v7  ;;  %2398 = vmatprep.mubr.f32.mxu1 %v8511_v18 }
 0x6a6   :  { %2462 = vmatprep.subr.mxu0 %v8513_v54  ;;  %2533 = vmatprep.subr.mxu1 %v8514_v63 }
 0x745   :  { %v2130_v43 = vpop.f32.mrf.mxu0  ;;  %v2201_v59 = vpop.f32.mrf.mxu1 }
 0x747   :  { %v2132_v58 = vpop.f32.mrf.mxu0  ;;  %v2203_v2 = vpop.f32.mrf.mxu1 }
 0x748   :  { %v2210_v29 = vcombine.low %v2130_v43, %v2132_v58  ;;  %v2211_v55 = vcombine.low %v2201_v59, %v2203_v2 }
 0x74a   :  { %v2218_v40 = vrot.slane %v2210_v29, %v6451_v23  ;;  %v2225_v56 = vrot.slane %v2211_v55, %v6451_v23 }
 0x74c   :  { %v2226_v49 = vcombine.low %v2218_v40, %v2225_v56 }
 0x74e   :  { %v2228_v26 = vadd.f32 %v2226_v49, %v8515_v12 }
 0x750   :  { %v4814_v7 = vmul.f32 -1.442695, %v2228_v26  ;;  %v2236_v28 = vrot.slane %v2228_v26, 2  ;;  %v2247_v54 = vrot.slane %v2228_v26, 6  ;;  %v2244_v61 = vrot.slane %v2228_v26, 4 }
 0x752   :  { %5270 = vpow2.f32 %v4814_v7  ;;  %v4815_v18 = vmul.f32 -1.442695, %v2236_v28  ;;  %v4816_v63 = vmul.f32 -1.442695, %v2247_v54 }
 0x754   :  { %5272 = vpow2.f32 %v4815_v18 }
 0x755   :  { %5274 = vpow2.f32 %v4816_v63 }
 0x75f   :  { %v5271_v37 = vpop.eup %5270 }
 0x760   :  { %v2232_v15 = vadd.f32 1.0, %v5271_v37 }
 0x761   :  { %v5273_v57 = vpop.eup %5272 }
 0x762   :  { %5276 = vrcp.f32 %v2232_v15  ;;  %v2241_v58 = vadd.f32 1.0, %v5273_v57  ;;  %v5275_v29 = vpop.eup %5274 }
 0x763   :  { %5278 = vtanh.f32 %v2244_v61  ;;  %v2252_v49 = vadd.f32 1.0, %v5275_v29 }
 0x764   :  { %5280 = vrcp.f32 %v2241_v58 }
 0x765   :  { %5282 = vrcp.f32 %v2252_v49  ;;  %v2730_v49 = vld [vmem:[#allocation9 + $0x1f0] sm:$0xff] }
 0x76f   :  { %v5277_v43 = vpop.eup %5276 }
 0x770   :  { %v5279_v59 = vpop.eup %5278 }
 0x771   :  { %v5281_v12 = vpop.eup %5280  ;;  %v2256_v28 = vmul.f32 %v5279_v59, %v5277_v43 }
 0x772   :  { %v2255_v7 = vmul.f32 %v5281_v12, %v6929_v31  ;;  %v5283_v37 = vpop.eup %5282  ;;  %v2728_v12 = vld [vmem:[#allocation9 + $0x1e0] sm:$0xff] }
 0x774   :  { %v7002_v2 = vadd.f32 %v2256_v28, %v2255_v7  ;;  %v2725_v7 = vld [vmem:[#allocation9 + $0x1c8] sm:$0xff]  ;;  %v2727_v28 = vld [vmem:[#allocation9 + $0x1d8] sm:$0xff] }
 0x776   :  { %5284 = vtanh.f32 %v7002_v2 }
 0x783   :  { %v5285_v26 = vpop.eup %5284 }
 0x784   :  { %v2259_v55 = vmul.f32 %v5285_v26, %v5283_v37  ;;  %v2724_v37 = vld [vmem:[#allocation9 + $0x1c0] sm:$0xff]  ;;  %v2726_v26 = vld [vmem:[#allocation9 + $0x1d0] sm:$0xff] }
 0x786   :  { %2261 = vst [vmem:[#allocation3 + $0xa] sm:$0x3] %v2259_v55  ;;  %2328 = vmatmul.mubr.f32.vlgmr.msra.gmra.mxu0 %v2259_v55  ;;  %2399 = vmatmul.mubr.f32.vlgmr.msra.gmra.mxu1 %v2259_v55  ;;  %v2723_v55 = vld [vmem:[#allocation9 + $0x1b8] sm:$0xff] }
 0x787   :  { %2463 = vmatpush1.msra.mxu0 %v6662_v16  ;;  %2534 = vmatpush1.msra.mxu1 %v6665_v17  ;;  %v8516_v16 = vld [vmem:[#allocation26_spill] sm:$0xff]  ;;  %v8517_v17 = vld [vmem:[#allocation25_spill] sm:$0xff] }
 0x788   :  { %2464 = vmatprep.subr.mxu0 %v6668_v32  ;;  %2535 = vmatprep.subr.mxu1 %v6671_v45  ;;  %v8518_v32 = vld [vmem:[#allocation21_spill] sm:$0xff]  ;;  %v8519_v45 = vld [vmem:[#allocation18_spill] sm:$0xff] }
 0x789   :  { %2465 = vmatpush1.msra.mxu0 %v6674_v36  ;;  %2536 = vmatpush1.msra.mxu1 %v6677_v39  ;;  %v8520_v36 = vld [vmem:[#allocation19_spill] sm:$0xff]  ;;  %v8521_v39 = vld [vmem:[#allocation29_spill] sm:$0xff] }
 0x78a   :  { %2466 = vmatprep.subr.mxu0 %v6680_v11  ;;  %2537 = vmatprep.subr.mxu1 %v6683_v38  ;;  %v8522_v11 = vld [vmem:[#allocation30_spill] sm:$0xff]  ;;  %v8523_v38 = vld [vmem:[#allocation31_spill] sm:$0xff] }
 0x78b   :  { %2467 = vmatpush1.msra.mxu0 %v6686_v24  ;;  %2538 = vmatpush1.msra.mxu1 %v6689_v51  ;;  %v8524_v24 = vld [vmem:[#allocation32_spill] sm:$0xff]  ;;  %v8525_v51 = vld [vmem:[#allocation33_spill] sm:$0xff] }
 0x78c   :  { %2468 = vmatprep.subr.mxu0 %v6692_v44  ;;  %2539 = vmatprep.subr.mxu1 %v6695_v60  ;;  %v8526_v44 = vld [vmem:[#allocation34_spill] sm:$0xff]  ;;  %v8527_v60 = vld [vmem:[#allocation35_spill] sm:$0xff] }
 0x78d   :  { %2469 = vmatpush1.msra.mxu0 %v6698_v13  ;;  %2540 = vmatpush1.msra.mxu1 %v6701_v62  ;;  %v8528_v13 = vld [vmem:[#allocation36_spill] sm:$0xff]  ;;  %v8529_v62 = vld [vmem:[#allocation37_spill] sm:$0xff] }
 0x78e   :  { %2470 = vmatprep.subr.mxu0 %v6704_v20  ;;  %2541 = vmatprep.subr.mxu1 %v6707_v35  ;;  %v8530_v20 = vld [vmem:[#allocation38_spill] sm:$0xff]  ;;  %v8531_v35 = vld [vmem:[#allocation39_spill] sm:$0xff] }
 0x78f   :  { %2471 = vmatpush1.msra.mxu0 %v6710_v27  ;;  %2542 = vmatpush1.msra.mxu1 %v6713_v0  ;;  %v8532_v27 = vld [vmem:[#allocation40_spill] sm:$0xff]  ;;  %v8533_v0 = vld [vmem:[#allocation41_spill] sm:$0xff] }
 0x790   :  { %2472 = vmatprep.subr.mxu0 %v6716_v52  ;;  %2543 = vmatprep.subr.mxu1 %v6719_v9  ;;  %v8534_v52 = vld [vmem:[#allocation42_spill] sm:$0xff]  ;;  %v8535_v9 = vld [vmem:[#allocation43_spill] sm:$0xff] }
 0x791   :  { %2473 = vmatpush1.msra.mxu0 %v6722_v47  ;;  %2544 = vmatpush1.msra.mxu1 %v6725_v22  ;;  %v8536_v47 = vmov 0.0   ;;  %v2729_v22 = vld [vmem:[#allocation9 + $0x1e8] sm:$0xff] }
 0x792   :  { %2474 = vmatprep.subr.mxu0 %v6728_v4  ;;  %2545 = vmatprep.subr.mxu1 %v6731_v46  ;;  %v2731_v4 = vld [vmem:[#allocation9 + $0x1f8] sm:$0xff] }
 0x793   :  { %2475 = vmatpush1.msra.mxu0 %v6734_v25  ;;  %2546 = vmatpush1.msra.mxu1 %v6737_v21 }
 0x794   :  { %2476 = vmatprep.subr.mxu0 %v6740_v34  ;;  %2547 = vmatprep.subr.mxu1 %v6743_v5 }
 0x795   :  { %2477 = vmatpush1.msra.mxu0 %v6746_v8  ;;  %2548 = vmatpush1.msra.mxu1 %v6749_v1 }
 0x796   :  { %2478 = vmatprep.subr.mxu0 %v6752_v6  ;;  %2549 = vmatprep.subr.mxu1 %v6755_v10 }
 0x797   :  { %2479 = vmatpush1.msra.mxu0 %v6758_v41  ;;  %2550 = vmatpush1.msra.mxu1 %v6761_v19  ;;  %v8537_v41 = vld [vmem:[#allocation52_spill] sm:$0xff] }
 0x798   :  { %2480 = vmatprep.subr.mxu0 %v6764_v42  ;;  %2551 = vmatprep.subr.mxu1 %v6767_v30 }
 0x799   :  { %2481 = vmatpush1.msra.mxu0 %v6770_v14  ;;  %2552 = vmatpush1.msra.mxu1 %v8468_v48 }
 0x79a   :  { %2482 = vmatprep.subr.mxu0 %v8469_v50  ;;  %2553 = vmatprep.subr.mxu1 %v8470_v3 }
 0x79b   :  { %2483 = vmatpush1.msra.mxu0 %v6782_v53  ;;  %2554 = vmatpush1.msra.mxu1 %v6785_v33 }
 0x79c   :  { %2484 = vmatprep.subr.mxu0 %v8516_v16  ;;  %2555 = vmatprep.subr.mxu1 %v8517_v17  ;;  %v2720_v16 = vld [vmem:[#allocation9 + $0x1a0] sm:$0xff]  ;;  %v2722_v17 = vld [vmem:[#allocation9 + $0x1b0] sm:$0xff] }
 0x79d   :  { %2485 = vmatpush1.msra.mxu0 %v8518_v32  ;;  %2556 = vmatpush1.msra.mxu1 %v8519_v45  ;;  %v2717_v32 = vld [vmem:[#allocation9 + $0x188] sm:$0xff]  ;;  %v2719_v45 = vld [vmem:[#allocation9 + $0x198] sm:$0xff] }
 0x79e   :  { %2486 = vmatprep.subr.mxu0 %v8520_v36  ;;  %2557 = vmatprep.subr.mxu1 %v8521_v39  ;;  %v2716_v36 = vld [vmem:[#allocation9 + $0x180] sm:$0xff]  ;;  %v2718_v39 = vld [vmem:[#allocation9 + $0x190] sm:$0xff] }
 0x79f   :  { %2487 = vmatpush1.msra.mxu0 %v8522_v11  ;;  %2558 = vmatpush1.msra.mxu1 %v8523_v38  ;;  %v2713_v11 = vld [vmem:[#allocation9 + $0x168] sm:$0xff]  ;;  %v2715_v38 = vld [vmem:[#allocation9 + $0x178] sm:$0xff] }
 0x7a0   :  { %2488 = vmatprep.subr.mxu0 %v8524_v24  ;;  %2559 = vmatprep.subr.mxu1 %v8525_v51  ;;  %v2712_v24 = vld [vmem:[#allocation9 + $0x160] sm:$0xff]  ;;  %v2714_v51 = vld [vmem:[#allocation9 + $0x170] sm:$0xff] }
 0x7a1   :  { %2489 = vmatpush1.msra.mxu0 %v8526_v44  ;;  %2560 = vmatpush1.msra.mxu1 %v8527_v60  ;;  %v2709_v44 = vld [vmem:[#allocation9 + $0x148] sm:$0xff]  ;;  %v2711_v60 = vld [vmem:[#allocation9 + $0x158] sm:$0xff] }
 0x7a2   :  { %2490 = vmatprep.subr.mxu0 %v8528_v13  ;;  %2561 = vmatprep.subr.mxu1 %v8529_v62  ;;  %v2708_v13 = vld [vmem:[#allocation9 + $0x140] sm:$0xff]  ;;  %v2710_v62 = vld [vmem:[#allocation9 + $0x150] sm:$0xff] }
 0x7a3   :  { %2491 = vmatpush1.msra.mxu0 %v8530_v20  ;;  %2562 = vmatpush1.msra.mxu1 %v8531_v35  ;;  %v2705_v20 = vld [vmem:[#allocation9 + $0x128] sm:$0xff]  ;;  %v2707_v35 = vld [vmem:[#allocation9 + $0x138] sm:$0xff] }
 0x7a4   :  { %2492 = vmatprep.subr.mxu0 %v8532_v27  ;;  %2563 = vmatprep.subr.mxu1 %v8533_v0  ;;  %v2704_v27 = vld [vmem:[#allocation9 + $0x120] sm:$0xff]  ;;  %v2706_v0 = vld [vmem:[#allocation9 + $0x130] sm:$0xff] }
 0x7a5   :  { %2493 = vmatpush1.msra.mxu0 %v8534_v52  ;;  %2564 = vmatpush1.msra.mxu1 %v8535_v9  ;;  %v2701_v52 = vld [vmem:[#allocation9 + $0x108] sm:$0xff]  ;;  %v2703_v9 = vld [vmem:[#allocation9 + $0x118] sm:$0xff] }
 0x7a6   :  { %2526 = vmatprep.mubr.f32.mxu0 %v8536_v47  ;;  %2597 = vmatprep.mubr.f32.mxu1 %v8536_v47 }
 0x7a7   :  { %2798 = vmatprep.subr.mxu0 %v2729_v22  ;;  %2875 = vmatprep.subr.mxu1 %v2731_v4  ;;  %v2700_v22 = vld [vmem:[#allocation9 + $0x100] sm:$0xff]  ;;  %v2702_v4 = vld [vmem:[#allocation9 + $0x110] sm:$0xff] }
 0x846   :  { %v2329_v46 = vpop.f32.mrf.mxu0  ;;  %v2400_v25 = vpop.f32.mrf.mxu1 }
 0x848   :  { %v2331_v21 = vpop.f32.mrf.mxu0  ;;  %v2402_v34 = vpop.f32.mrf.mxu1 }
 0x849   :  { %v2409_v5 = vcombine.low %v2329_v46, %v2331_v21  ;;  %v2410_v8 = vcombine.low %v2400_v25, %v2402_v34  ;;  %v2697_v46 = vld [vmem:[#allocation9 + $0xe8] sm:$0xff]  ;;  %v2699_v25 = vld [vmem:[#allocation9 + $0xf8] sm:$0xff]  ;;  %v2696_v21 = vld [vmem:[#allocation9 + $0xe0] sm:$0xff] }
 0x84a   :  { %v2698_v34 = vld [vmem:[#allocation9 + $0xf0] sm:$0xff] }
 0x84b   :  { %v2417_v1 = vrot.slane %v2409_v5, %v6451_v23  ;;  %v2424_v6 = vrot.slane %v2410_v8, %v6451_v23  ;;  %v2693_v5 = vld [vmem:[#allocation9 + $0xc8] sm:$0xff]  ;;  %v2695_v8 = vld [vmem:[#allocation9 + $0xd8] sm:$0xff] }
 0x84d   :  { %v2425_v10 = vcombine.low %v2417_v1, %v2424_v6  ;;  %v2692_v1 = vld [vmem:[#allocation9 + $0xc0] sm:$0xff]  ;;  %v2694_v6 = vld [vmem:[#allocation9 + $0xd0] sm:$0xff] }
 0x84f   :  { %v2427_v19 = vadd.f32 %v2425_v10, %v8537_v41  ;;  %v2689_v10 = vld [vmem:[#allocation9 + $0xa8] sm:$0xff]  ;;  %v2691_v41 = vld [vmem:[#allocation9 + $0xb8] sm:$0xff] }
 0x851   :  { %v4817_v42 = vmul.f32 -1.442695, %v2427_v19  ;;  %v2435_v30 = vrot.slane %v2427_v19, 2  ;;  %v2446_v53 = vrot.slane %v2427_v19, 6  ;;  %v2443_v50 = vrot.slane %v2427_v19, 4  ;;  %v2688_v19 = vld [vmem:[#allocation9 + $0xa0] sm:$0xff] }
 0x853   :  { %5286 = vpow2.f32 %v4817_v42  ;;  %v4818_v14 = vmul.f32 -1.442695, %v2435_v30  ;;  %v4819_v33 = vmul.f32 -1.442695, %v2446_v53  ;;  %v2690_v42 = vld [vmem:[#allocation9 + $0xb0] sm:$0xff]  ;;  %v2685_v30 = vld [vmem:[#allocation9 + $0x88] sm:$0xff] }
 0x854   :  { %v2684_v53 = vld [vmem:[#allocation9 + $0x80] sm:$0xff] }
 0x855   :  { %5288 = vpow2.f32 %v4818_v14  ;;  %v2687_v14 = vld [vmem:[#allocation9 + $0x98] sm:$0xff] }
 0x856   :  { %5290 = vpow2.f32 %v4819_v33  ;;  %v2686_v33 = vld [vmem:[#allocation9 + $0x90] sm:$0xff] }
 0x860   :  { %v5287_v48 = vpop.eup %5286 }
 0x861   :  { %v2431_v3 = vadd.f32 1.0, %v5287_v48  ;;  %v2663_v48 = vld [vmem:[#allocation3 + $0x6] sm:$0x3] }
 0x862   :  { %v5289_v31 = vpop.eup %5288 }
 0x863   :  { %5292 = vrcp.f32 %v2431_v3  ;;  %v2440_v57 = vadd.f32 1.0, %v5289_v31  ;;  %v5291_v15 = vpop.eup %5290  ;;  %v2683_v3 = vld [vmem:[#allocation9 + $0x78] sm:$0xff]  ;;  %v2661_v31 = vld [vmem:[#allocation3 + $0x2] sm:$0x3] }
 0x864   :  { %5294 = vtanh.f32 %v2443_v50  ;;  %v2451_v18 = vadd.f32 1.0, %v5291_v15  ;;  %v2681_v50 = vld [vmem:[#allocation9 + $0x68] sm:$0xff]  ;;  %v2682_v15 = vld [vmem:[#allocation9 + $0x70] sm:$0xff] }
 0x865   :  { %5296 = vrcp.f32 %v2440_v57  ;;  %v2680_v57 = vld [vmem:[#allocation9 + $0x60] sm:$0xff] }
 0x866   :  { %5298 = vrcp.f32 %v2451_v18 }
 0x870   :  { %v5293_v61 = vpop.eup %5292 }
 0x871   :  { %v5295_v40 = vpop.eup %5294 }
 0x872   :  { %v5297_v56 = vpop.eup %5296  ;;  %v2455_v63 = vmul.f32 %v5295_v40, %v5293_v61  ;;  %v2662_v61 = vld [vmem:[#allocation3 + $0x4] sm:$0x3]  ;;  %v2677_v40 = vld [vmem:[#allocation9 + $0x48] sm:$0xff] }
 0x873   :  { %v2454_v54 = vmul.f32 %v5297_v56, %v7002_v2  ;;  %v5299_v29 = vpop.eup %5298  ;;  %v2721_v2 = vld [vmem:[#allocation9 + $0x1a8] sm:$0xff]  ;;  %v2679_v56 = vld [vmem:[#allocation9 + $0x58] sm:$0xff]  ;;  %v2763_v18 = vcombine.low %v2662_v61, %v2663_v48  ;;  %v7204_v61 = vld [vmem:[#allocation10 + $0xa0] sm:$0xff] }
 0x874   :  { %v7186_v48 = vld [vmem:[#allocation10 + $0xc8] sm:$0xff] }
 0x875   :  { %v7073_v58 = vadd.f32 %v2455_v63, %v2454_v54  ;;  %v2676_v54 = vld [vmem:[#allocation9 + $0x40] sm:$0xff]  ;;  %v2678_v63 = vld [vmem:[#allocation9 + $0x50] sm:$0xff] }
 0x877   :  { %5300 = vtanh.f32 %v7073_v58 }
 0x884   :  { %v5301_v43 = vpop.eup %5300 }
 0x885   :  { %v2458_v59 = vmul.f32 %v5301_v43, %v5299_v29  ;;  %v2660_v29 = vld [vmem:[#allocation3] sm:$0x3]  ;;  %v2673_v43 = vld [vmem:[#allocation9 + $0x28] sm:$0xff] }
 0x887   :  { %2460 = vst [vmem:[#allocation3 + $0xc] sm:$0x3] %v2458_v59  ;;  %2527 = vmatmul.mubr.f32.vlgmr.msra.gmra.mxu0 %v2458_v59  ;;  %2598 = vmatmul.mubr.f32.vlgmr.msra.gmra.mxu1 %v2458_v59  ;;  %v2675_v59 = vld [vmem:[#allocation9 + $0x38] sm:$0xff] }
 0x888   :  { %2799 = vmatpush1.msra.mxu0 %v2728_v12  ;;  %2876 = vmatpush1.msra.mxu1 %v2730_v49  ;;  %v2762_v12 = vcombine.low %v2660_v29, %v2661_v31  ;;  %v2672_v49 = vld [vmem:[#allocation9 + $0x20] sm:$0xff]  ;;  %v7194_v31 = vld [vmem:[#allocation10 + $0xd0] sm:$0xff]  ;;  %v7222_v29 = vld [vmem:[#allocation10 + $0x68] sm:$0xff] }
 0x889   :  { %2800 = vmatprep.subr.mxu0 %v2725_v7  ;;  %2877 = vmatprep.subr.mxu1 %v2727_v28  ;;  %v2674_v7 = vld [vmem:[#allocation9 + $0x30] sm:$0xff]  ;;  %v2669_v28 = vld [vmem:[#allocation9 + $0x8] sm:$0xff]  ;;  %8545 = vst [vmem:[#allocation17_spill] sm:$0xff] %v7222_v29 }
 0x88a   :  { %2801 = vmatpush1.msra.mxu0 %v2724_v37  ;;  %2878 = vmatpush1.msra.mxu1 %v2726_v26  ;;  %v2671_v37 = vld [vmem:[#allocation9 + $0x18] sm:$0xff]  ;;  %v2777_v26 = vrot.slane %v2763_v18, %v6451_v23 }
 0x88b   :  { %2802 = vmatprep.subr.mxu0 %v2721_v2  ;;  %2879 = vmatprep.subr.mxu1 %v2723_v55  ;;  %v2668_v2 = vld [vmem:[#allocation9] sm:$0xff]  ;;  %v2670_v55 = vld [vmem:[#allocation9 + $0x10] sm:$0xff]  ;;  %v7212_v18 = vld [vmem:[#allocation10 + $0x98] sm:$0xff] }
 0x88c   :  { %2803 = vmatpush1.msra.mxu0 %v2720_v16  ;;  %2880 = vmatpush1.msra.mxu1 %v2722_v17  ;;  %v2770_v16 = vrot.slane %v2762_v12, %v6451_v23  ;;  %8542 = vst [vmem:[#allocation48_spill] sm:$0xff] %v7212_v18  ;;  %v7230_v12 = vld [vmem:[#allocation10 + $0x70] sm:$0xff] }
 0x88d   :  { %2804 = vmatprep.subr.mxu0 %v2717_v32  ;;  %2881 = vmatprep.subr.mxu1 %v2719_v45  ;;  %v7082_v32 = vld [vmem:[#allocation10 + $0x1e8] sm:$0xff]  ;;  %v7084_v45 = vld [vmem:[#allocation10 + $0x1f8] sm:$0xff]  ;;  %8548 = vst [vmem:[#allocation23_spill] sm:$0xff] %v7230_v12 }
 0x88e   :  { %2805 = vmatpush1.msra.mxu0 %v2716_v36  ;;  %2882 = vmatpush1.msra.mxu1 %v2718_v39  ;;  %v2778_v17 = vcombine.low %v2770_v16, %v2777_v26  ;;  %8538 = vst [vmem:[#allocation44_spill] sm:$0xff] %v7082_v32  ;;  %8539 = vst [vmem:[#allocation45_spill] sm:$0xff] %v7084_v45  ;;  %v7088_v36 = vld [vmem:[#allocation10 + $0x1e0] sm:$0xff]  ;;  %v7090_v39 = vld [vmem:[#allocation10 + $0x1f0] sm:$0xff] }
 0x88f   :  { %2806 = vmatprep.subr.mxu0 %v2713_v11  ;;  %2883 = vmatprep.subr.mxu1 %v2715_v38  ;;  %v7094_v11 = vld [vmem:[#allocation10 + $0x1c8] sm:$0xff]  ;;  %v7096_v38 = vld [vmem:[#allocation10 + $0x1d8] sm:$0xff]  ;;  %v7254_v16 = vld [vmem:[#allocation10 + $0x30] sm:$0xff] }
 0x890   :  { %2807 = vmatpush1.msra.mxu0 %v2712_v24  ;;  %2884 = vmatpush1.msra.mxu1 %v2714_v51  ;;  %v7100_v24 = vld [vmem:[#allocation10 + $0x1c0] sm:$0xff]  ;;  %v7102_v51 = vld [vmem:[#allocation10 + $0x1d0] sm:$0xff]  ;;  %v7246_v26 = vld [vmem:[#allocation10 + $0x28] sm:$0xff]  ;;  %8556 = vst [vmem:[#allocation29_spill] sm:$0xff] %v7254_v16 }
 0x891   :  { %2808 = vmatprep.subr.mxu0 %v2709_v44  ;;  %2885 = vmatprep.subr.mxu1 %v2711_v60  ;;  %v7106_v44 = vld [vmem:[#allocation10 + $0x1a8] sm:$0xff]  ;;  %v7108_v60 = vld [vmem:[#allocation10 + $0x1b8] sm:$0xff]  ;;  %8553 = vst [vmem:[#allocation21_spill] sm:$0xff] %v7246_v26 }
 0x892   :  { %2809 = vmatpush1.msra.mxu0 %v2708_v13  ;;  %2886 = vmatpush1.msra.mxu1 %v2710_v62  ;;  %v7112_v13 = vld [vmem:[#allocation10 + $0x1a0] sm:$0xff]  ;;  %v7114_v62 = vld [vmem:[#allocation10 + $0x1b0] sm:$0xff] }
 0x893   :  { %2810 = vmatprep.subr.mxu0 %v2705_v20  ;;  %2887 = vmatprep.subr.mxu1 %v2707_v35  ;;  %v7118_v20 = vld [vmem:[#allocation10 + $0x188] sm:$0xff]  ;;  %v7120_v35 = vld [vmem:[#allocation10 + $0x198] sm:$0xff] }
 0x894   :  { %2811 = vmatpush1.msra.mxu0 %v2704_v27  ;;  %2888 = vmatpush1.msra.mxu1 %v2706_v0  ;;  %v7124_v27 = vld [vmem:[#allocation10 + $0x180] sm:$0xff]  ;;  %v7126_v0 = vld [vmem:[#allocation10 + $0x190] sm:$0xff] }
 0x895   :  { %2812 = vmatprep.subr.mxu0 %v2701_v52  ;;  %2889 = vmatprep.subr.mxu1 %v2703_v9  ;;  %v7130_v52 = vld [vmem:[#allocation10 + $0x168] sm:$0xff]  ;;  %v7132_v9 = vld [vmem:[#allocation10 + $0x178] sm:$0xff] }
 0x896   :  { %2813 = vmatpush1.msra.mxu0 %v2700_v22  ;;  %2890 = vmatpush1.msra.mxu1 %v2702_v4  ;;  %v7136_v22 = vld [vmem:[#allocation10 + $0x160] sm:$0xff]  ;;  %v7138_v4 = vld [vmem:[#allocation10 + $0x170] sm:$0xff] }
 0x897   :  { %2814 = vmatprep.subr.mxu0 %v2697_v46  ;;  %2891 = vmatprep.subr.mxu1 %v2699_v25  ;;  %v7142_v46 = vld [vmem:[#allocation10 + $0x148] sm:$0xff]  ;;  %v7144_v25 = vld [vmem:[#allocation10 + $0x158] sm:$0xff] }
 0x898   :  { %2815 = vmatpush1.msra.mxu0 %v2696_v21  ;;  %2892 = vmatpush1.msra.mxu1 %v2698_v34  ;;  %v7146_v21 = vld [vmem:[#allocation10 + $0x140] sm:$0xff]  ;;  %v7150_v34 = vld [vmem:[#allocation10 + $0x150] sm:$0xff] }
 0x899   :  { %2816 = vmatprep.subr.mxu0 %v2693_v5  ;;  %2893 = vmatprep.subr.mxu1 %v2695_v8  ;;  %v7152_v5 = vld [vmem:[#allocation10 + $0x128] sm:$0xff]  ;;  %v7154_v8 = vld [vmem:[#allocation10 + $0x138] sm:$0xff] }
 0x89a   :  { %2817 = vmatpush1.msra.mxu0 %v2692_v1  ;;  %2894 = vmatpush1.msra.mxu1 %v2694_v6  ;;  %v7158_v1 = vld [vmem:[#allocation10 + $0x120] sm:$0xff]  ;;  %v7160_v6 = vld [vmem:[#allocation10 + $0x130] sm:$0xff] }
 0x89b   :  { %2818 = vmatprep.subr.mxu0 %v2689_v10  ;;  %2895 = vmatprep.subr.mxu1 %v2691_v41  ;;  %v7162_v10 = vld [vmem:[#allocation10 + $0x108] sm:$0xff]  ;;  %v7166_v41 = vld [vmem:[#allocation10 + $0x118] sm:$0xff] }
 0x89c   :  { %2819 = vmatpush1.msra.mxu0 %v2688_v19  ;;  %2896 = vmatpush1.msra.mxu1 %v2690_v42  ;;  %v7168_v19 = vld [vmem:[#allocation10 + $0x100] sm:$0xff]  ;;  %v7170_v42 = vld [vmem:[#allocation10 + $0x110] sm:$0xff] }
 0x89d   :  { %2820 = vmatprep.subr.mxu0 %v2685_v30  ;;  %2897 = vmatprep.subr.mxu1 %v2687_v14  ;;  %v7174_v30 = vld [vmem:[#allocation10 + $0xe8] sm:$0xff]  ;;  %v7176_v14 = vld [vmem:[#allocation10 + $0xf8] sm:$0xff] }
 0x89e   :  { %2821 = vmatpush1.msra.mxu0 %v2684_v53  ;;  %2898 = vmatpush1.msra.mxu1 %v2686_v33  ;;  %v7180_v53 = vld [vmem:[#allocation10 + $0xe0] sm:$0xff]  ;;  %v7182_v33 = vld [vmem:[#allocation10 + $0xf0] sm:$0xff] }
 0x89f   :  { %2822 = vmatprep.subr.mxu0 %v2681_v50  ;;  %2899 = vmatprep.subr.mxu1 %v2683_v3  ;;  %v7188_v50 = vld [vmem:[#allocation10 + $0xd8] sm:$0xff]  ;;  %v7192_v3 = vld [vmem:[#allocation10 + $0xc0] sm:$0xff] }
 0x8a0   :  { %2823 = vmatpush1.msra.mxu0 %v2680_v57  ;;  %2900 = vmatpush1.msra.mxu1 %v2682_v15  ;;  %v7198_v57 = vld [vmem:[#allocation10 + $0xa8] sm:$0xff]  ;;  %v7200_v15 = vld [vmem:[#allocation10 + $0xb8] sm:$0xff] }
 0x8a1   :  { %2824 = vmatprep.subr.mxu0 %v2677_v40  ;;  %2901 = vmatprep.subr.mxu1 %v2679_v56  ;;  %v7206_v40 = vld [vmem:[#allocation10 + $0xb0] sm:$0xff]  ;;  %v7210_v56 = vld [vmem:[#allocation10 + $0x88] sm:$0xff] }
 0x8a2   :  { %2825 = vmatpush1.msra.mxu0 %v2676_v54  ;;  %2902 = vmatpush1.msra.mxu1 %v2678_v63  ;;  %8540 = vst [vmem:[#allocation46_spill] sm:$0xff] %v7206_v40  ;;  %8541 = vst [vmem:[#allocation47_spill] sm:$0xff] %v7210_v56  ;;  %v7216_v54 = vld [vmem:[#allocation10 + $0x80] sm:$0xff]  ;;  %v7218_v63 = vld [vmem:[#allocation10 + $0x90] sm:$0xff] }
 0x8a3   :  { %2826 = vmatprep.subr.mxu0 %v2673_v43  ;;  %2903 = vmatprep.subr.mxu1 %v2675_v59  ;;  %8543 = vst [vmem:[#allocation28_spill] sm:$0xff] %v7216_v54  ;;  %8544 = vst [vmem:[#allocation20_spill] sm:$0xff] %v7218_v63  ;;  %v7224_v43 = vld [vmem:[#allocation10 + $0x78] sm:$0xff]  ;;  %v7228_v59 = vld [vmem:[#allocation10 + $0x60] sm:$0xff] }
 0x8a4   :  { %2827 = vmatpush1.msra.mxu0 %v2672_v49  ;;  %2904 = vmatpush1.msra.mxu1 %v2674_v7  ;;  %8546 = vst [vmem:[#allocation22_spill] sm:$0xff] %v7224_v43  ;;  %8547 = vst [vmem:[#allocation50_spill] sm:$0xff] %v7228_v59  ;;  %v7234_v49 = vld [vmem:[#allocation10 + $0x48] sm:$0xff]  ;;  %v7236_v7 = vld [vmem:[#allocation10 + $0x58] sm:$0xff] }
 0x8a5   :  { %2828 = vmatprep.subr.mxu0 %v2669_v28  ;;  %2905 = vmatprep.subr.mxu1 %v2671_v37  ;;  %8549 = vst [vmem:[#allocation24_spill] sm:$0xff] %v7234_v49  ;;  %8550 = vst [vmem:[#allocation49_spill] sm:$0xff] %v7236_v7  ;;  %v7240_v28 = vld [vmem:[#allocation10 + $0x40] sm:$0xff]  ;;  %v7242_v37 = vld [vmem:[#allocation10 + $0x50] sm:$0xff] }
 0x8a6   :  { %2829 = vmatpush1.msra.mxu0 %v2668_v2  ;;  %2862 = vmatprep.mubr.f32.mxu0 %v8536_v47  ;;  %8551 = vst [vmem:[#allocation26_spill] sm:$0xff] %v7240_v28  ;;  %8552 = vst [vmem:[#allocation25_spill] sm:$0xff] %v7242_v37  ;;  %v7248_v2 = vld [vmem:[#allocation10 + $0x38] sm:$0xff] }
 0x8a7   :  { %2906 = vmatpush1.msra.mxu1 %v2670_v55  ;;  %2939 = vmatprep.mubr.f32.mxu1 %v8536_v47  ;;  %8554 = vst [vmem:[#allocation18_spill] sm:$0xff] %v7248_v2  ;;  %v7252_v55 = vld [vmem:[#allocation10 + $0x20] sm:$0xff] }
 0x8a8   :  { %2863 = vmatmul.mubr.f32.vlgmr.msra.gmra.mxu0 %v2778_v17  ;;  %2940 = vmatmul.mubr.f32.vlgmr.msra.gmra.mxu1 %v2778_v17  ;;  %8555 = vst [vmem:[#allocation19_spill] sm:$0xff] %v7252_v55  ;;  %v7258_v17 = vld [vmem:[#allocation10 + $0x8] sm:$0xff] }
 0x8a9   :  { %2868 = vmatprep.mubr.f32.mxu0 %v8536_v47  ;;  %2945 = vmatprep.mubr.f32.mxu1 %v8536_v47  ;;  %8557 = vst [vmem:[#allocation30_spill] sm:$0xff] %v7258_v17 }
 0x8aa   :  { %3113 = vmatprep.subr.mxu0 %v7082_v32  ;;  %3184 = vmatprep.subr.mxu1 %v7084_v45 }
 0x8ab   :  { %3114 = vmatpush1.msra.mxu0 %v7088_v36  ;;  %3185 = vmatpush1.msra.mxu1 %v7090_v39 }
 0x8ac   :  { %3115 = vmatprep.subr.mxu0 %v7094_v11  ;;  %3186 = vmatprep.subr.mxu1 %v7096_v38 }
 0x8ad   :  { %3116 = vmatpush1.msra.mxu0 %v7100_v24  ;;  %3187 = vmatpush1.msra.mxu1 %v7102_v51 }
 0x8ae   :  { %3117 = vmatprep.subr.mxu0 %v7106_v44  ;;  %3188 = vmatprep.subr.mxu1 %v7108_v60 }
 0x8af   :  { %3118 = vmatpush1.msra.mxu0 %v7112_v13  ;;  %3189 = vmatpush1.msra.mxu1 %v7114_v62 }
 0x8b0   :  { %3119 = vmatprep.subr.mxu0 %v7118_v20  ;;  %3190 = vmatprep.subr.mxu1 %v7120_v35 }
 0x8b1   :  { %3120 = vmatpush1.msra.mxu0 %v7124_v27  ;;  %3191 = vmatpush1.msra.mxu1 %v7126_v0 }
 0x8b2   :  { %3121 = vmatprep.subr.mxu0 %v7130_v52  ;;  %3192 = vmatprep.subr.mxu1 %v7132_v9 }
 0x8b3   :  { %3122 = vmatpush1.msra.mxu0 %v7136_v22  ;;  %3193 = vmatpush1.msra.mxu1 %v7138_v4 }
 0x8b4   :  { %3123 = vmatprep.subr.mxu0 %v7142_v46  ;;  %3194 = vmatprep.subr.mxu1 %v7144_v25 }
 0x8b5   :  { %3124 = vmatpush1.msra.mxu0 %v7146_v21  ;;  %3195 = vmatpush1.msra.mxu1 %v7150_v34 }
 0x8b6   :  { %3125 = vmatprep.subr.mxu0 %v7152_v5  ;;  %3196 = vmatprep.subr.mxu1 %v7154_v8 }
 0x8b7   :  { %3126 = vmatpush1.msra.mxu0 %v7158_v1  ;;  %3197 = vmatpush1.msra.mxu1 %v7160_v6 }
 0x8b8   :  { %3127 = vmatprep.subr.mxu0 %v7162_v10  ;;  %3198 = vmatprep.subr.mxu1 %v7166_v41 }
 0x8b9   :  { %3128 = vmatpush1.msra.mxu0 %v7168_v19  ;;  %3199 = vmatpush1.msra.mxu1 %v7170_v42 }
 0x8ba   :  { %3129 = vmatprep.subr.mxu0 %v7174_v30  ;;  %3200 = vmatprep.subr.mxu1 %v7176_v14 }
 0x8bb   :  { %3130 = vmatpush1.msra.mxu0 %v7180_v53  ;;  %3201 = vmatpush1.msra.mxu1 %v7182_v33 }
 0x8bc   :  { %3131 = vmatprep.subr.mxu0 %v7186_v48  ;;  %3202 = vmatprep.subr.mxu1 %v7188_v50 }
 0x8bd   :  { %3132 = vmatpush1.msra.mxu0 %v7192_v3  ;;  %3203 = vmatpush1.msra.mxu1 %v7194_v31 }
 0x8be   :  { %3133 = vmatprep.subr.mxu0 %v7198_v57  ;;  %3204 = vmatprep.subr.mxu1 %v7200_v15 }
 0x8bf   :  { %3134 = vmatpush1.msra.mxu0 %v7204_v61  ;;  %3205 = vmatpush1.msra.mxu1 %v7206_v40 }
 0x8c0   :  { %3135 = vmatprep.subr.mxu0 %v7210_v56  ;;  %3206 = vmatprep.subr.mxu1 %v7212_v18 }
 0x8c1   :  { %3136 = vmatpush1.msra.mxu0 %v7216_v54  ;;  %3207 = vmatpush1.msra.mxu1 %v7218_v63 }
 0x8c2   :  { %3137 = vmatprep.subr.mxu0 %v7222_v29  ;;  %3208 = vmatprep.subr.mxu1 %v7224_v43 }
 0x8c3   :  { %3138 = vmatpush1.msra.mxu0 %v7228_v59  ;;  %3209 = vmatpush1.msra.mxu1 %v7230_v12  ;;  %v7260_v59 = vld [vmem:[#allocation10 + $0x18] sm:$0xff]  ;;  %v7264_v12 = vld [vmem:[#allocation10] sm:$0xff] }
 0x8c4   :  { %3139 = vmatprep.subr.mxu0 %v7234_v49  ;;  %3210 = vmatprep.subr.mxu1 %v7236_v7  ;;  %8558 = vst [vmem:[#allocation31_spill] sm:$0xff] %v7260_v59  ;;  %8559 = vst [vmem:[#allocation32_spill] sm:$0xff] %v7264_v12  ;;  %v7266_v49 = vld [vmem:[#allocation10 + $0x10] sm:$0xff] }
 0x8c5   :  { %3140 = vmatpush1.msra.mxu0 %v7240_v28  ;;  %3211 = vmatpush1.msra.mxu1 %v7242_v37  ;;  %8560 = vst [vmem:[#allocation33_spill] sm:$0xff] %v7266_v49 }
 0x8c6   :  { %3141 = vmatprep.subr.mxu0 %v7246_v26  ;;  %3212 = vmatprep.subr.mxu1 %v7248_v2 }
 0x8c7   :  { %3142 = vmatpush1.msra.mxu0 %v7252_v55  ;;  %3213 = vmatpush1.msra.mxu1 %v7254_v16 }
 0x8c8   :  { %3143 = vmatprep.subr.mxu0 %v7258_v17  ;;  %3214 = vmatprep.subr.mxu1 %v7260_v59  ;;  %v8561_v59 = vld [vmem:[#allocation51_spill] sm:$0xff] }
 0x8c9   :  { %3144 = vmatpush1.msra.mxu0 %v7264_v12  ;;  %3215 = vmatpush1.msra.mxu1 %v7266_v49 }
 0x8ca   :  { %3310 = vmatprep.subr.mxu0 %v7082_v32  ;;  %3381 = vmatprep.subr.mxu1 %v7084_v45 }
 0x947   :  { %v2528_v2 = vpop.f32.mrf.mxu0  ;;  %v2599_v26 = vpop.f32.mrf.mxu1 }
 0x949   :  { %v2530_v37 = vpop.f32.mrf.mxu0  ;;  %v2601_v28 = vpop.f32.mrf.mxu1 }
 0x94a   :  { %v2608_v7 = vcombine.low %v2528_v2, %v2530_v37  ;;  %v2609_v55 = vcombine.low %v2599_v26, %v2601_v28 }
 0x94c   :  { %v2616_v16 = vrot.slane %v2608_v7, %v6451_v23  ;;  %v2623_v17 = vrot.slane %v2609_v55, %v6451_v23  ;;  %v2732_v7 = vld [vmem:[%s8083_s6] sm:$0xf] }
 0x94e   :  { %v2624_v43 = vcombine.low %v2616_v16, %v2623_v17 }
 0x950   :  { %v2626_v29 = vadd.f32 %v2624_v43, %v8561_v59  ;;  %v8562_v43 = vld [vmem:[#allocation27_spill] sm:$0xff] }
 0x951   :  { %v8563_v59 = vsub.s32 0, %v8562_v43 }
 0x952   :  { %v4820_v12 = vmul.f32 -1.442695, %v2626_v29  ;;  %v2634_v63 = vrot.slane %v2626_v29, 2  ;;  %v2645_v32 = vrot.slane %v2626_v29, 6  ;;  %v2642_v18 = vrot.slane %v2626_v29, 4 }
 0x954   :  { %5302 = vpow2.f32 %v4820_v12  ;;  %v4821_v49 = vmul.f32 -1.442695, %v2634_v63  ;;  %v4822_v45 = vmul.f32 -1.442695, %v2645_v32  ;;  %v7284_v12 = vrot.slane %v2732_v7, %v8563_v59 }
 0x955   :  { %v8565_v63 = vsub.s32 2, %v8562_v43 }
 0x956   :  { %5304 = vpow2.f32 %v4821_v49  ;;  %8564 = vst [vmem:[#allocation34_spill] sm:$0xff] %v7284_v12 }
 0x957   :  { %5306 = vpow2.f32 %v4822_v45  ;;  %v7288_v32 = vrot.slane %v2732_v7, %v8565_v63  ;;  %v8569_v45 = vsub.s32 3, %v8562_v43 }
 0x959   :  { %8566 = vst [vmem:[#allocation35_spill] sm:$0xff] %v7288_v32 }
 0x961   :  { %v5303_v54 = vpop.eup %5302 }
 0x962   :  { %v2630_v56 = vadd.f32 1.0, %v5303_v54  ;;  %v8567_v54 = vsub.s32 1, %v8562_v43 }
 0x963   :  { %v5305_v40 = vpop.eup %5304 }
 0x964   :  { %5308 = vrcp.f32 %v2630_v56  ;;  %v2639_v28 = vadd.f32 1.0, %v5305_v40  ;;  %v7292_v29 = vrot.slane %v2732_v7, %v8567_v54  ;;  %v7296_v40 = vrot.slane %v2732_v7, %v8569_v45 }
 0x965   :  { %5310 = vtanh.f32 %v2642_v18 }
 0x966   :  { %5312 = vrcp.f32 %v2639_v28  ;;  %8568 = vst [vmem:[#allocation36_spill] sm:$0xff] %v7292_v29  ;;  %8570 = vst [vmem:[#allocation37_spill] sm:$0xff] %v7296_v40 }
 0x968   :  { %v2864_v56 = vpop.f32.mrf.mxu0  ;;  %v2941_v49 = vpop.f32.mrf.mxu1 }
 0x969   :  { %v2865_v26 = vadd.f32 %v2864_v56, %v7284_v12  ;;  %v2942_v2 = vadd.f32 %v2941_v49, %v7288_v32  ;;  %v5307_v56 = vpop.eup %5306 }
 0x96a   :  { %v2866_v18 = vpop.f32.mrf.mxu0  ;;  %v2943_v37 = vpop.f32.mrf.mxu1 }
 0x96b   :  { %v2867_v55 = vadd.f32 %v2866_v18, %v7292_v29  ;;  %v2944_v16 = vadd.f32 %v2943_v37, %v7296_v40  ;;  %v2665_v18 = vld [vmem:[#allocation3 + $0xa] sm:$0x3]  ;;  %v2666_v37 = vld [vmem:[#allocation3 + $0xc] sm:$0x3] }
 0x96d   :  { %v2960_v17 = vcombine.low %v2865_v26, %v2867_v55  ;;  %v2961_v28 = vcombine.high %v2865_v26, %v2867_v55  ;;  %v2962_v59 = vcombine.low %v2942_v2, %v2944_v16  ;;  %v2963_v63 = vcombine.high %v2942_v2, %v2944_v16 }
 0x96e   :  { %v2650_v16 = vadd.f32 1.0, %v5307_v56 }
 0x96f   :  { %v7303_v43 = vrot.slane %v2960_v17, %v6451_v23  ;;  %v7306_v7 = vrot.slane %v2961_v28, %v6451_v23  ;;  %v7309_v54 = vrot.slane %v2962_v59, %v6451_v23  ;;  %v7312_v45 = vrot.slane %v2963_v63, %v6451_v23 }
 0x970   :  { %5314 = vrcp.f32 %v2650_v16  ;;  %v8589_v16 = vld [vmem:[#allocation18_spill] sm:$0xff] }
 0x971   :  { %8571 = vst [vmem:[#allocation38_spill] sm:$0xff] %v7303_v43  ;;  %8572 = vst [vmem:[#allocation39_spill] sm:$0xff] %v7306_v7  ;;  %v5309_v49 = vpop.eup %5308  ;;  %v2664_v43 = vld [vmem:[#allocation3 + $0x8] sm:$0x3]  ;;  %v8595_v7 = vld [vmem:[#allocation33_spill] sm:$0xff] }
 0x972   :  { %8573 = vst [vmem:[#allocation40_spill] sm:$0xff] %v7309_v54  ;;  %8574 = vst [vmem:[#allocation41_spill] sm:$0xff] %v7312_v45  ;;  %v5311_v2 = vpop.eup %5310  ;;  %v2779_v54 = vcombine.low %v2664_v43, %v2665_v18  ;;  %v8580_v43 = vld [vmem:[#allocation17_spill] sm:$0xff]  ;;  %v8584_v18 = vld [vmem:[#allocation24_spill] sm:$0xff] }
 0x973   :  { %v5313_v55 = vpop.eup %5312  ;;  %v2654_v28 = vmul.f32 %v5311_v2, %v5309_v49  ;;  %v8583_v49 = vld [vmem:[#allocation23_spill] sm:$0xff]  ;;  %v8587_v2 = vld [vmem:[#allocation25_spill] sm:$0xff] }
 0x974   :  { %v2653_v17 = vmul.f32 %v5313_v55, %v7073_v58  ;;  %v2787_v26 = vrot.slane %v2779_v54, %v6451_v23  ;;  %v8575_v58 = vld [vmem:[#allocation46_spill] sm:$0xff]  ;;  %v8588_v55 = vld [vmem:[#allocation21_spill] sm:$0xff] }
 0x975   :  { %v8581_v54 = vld [vmem:[#allocation22_spill] sm:$0xff] }
 0x976   :  { %v2655_v59 = vadd.f32 %v2654_v28, %v2653_v17  ;;  %v8590_v17 = vld [vmem:[#allocation19_spill] sm:$0xff]  ;;  %v8591_v28 = vld [vmem:[#allocation29_spill] sm:$0xff] }
 0x978   :  { %5316 = vtanh.f32 %v2655_v59  ;;  %v8592_v59 = vld [vmem:[#allocation30_spill] sm:$0xff] }
 0x97d   :  { %v5315_v63 = vpop.eup %5314 }
 0x985   :  { %v5317_v40 = vpop.eup %5316 }
 0x986   :  { %v2657_v29 = vmul.f32 %v5317_v40, %v5315_v63  ;;  %v8579_v40 = vld [vmem:[#allocation20_spill] sm:$0xff]  ;;  %v8593_v63 = vld [vmem:[#allocation31_spill] sm:$0xff] }
 0x988   :  { %2659 = vst [vmem:[#allocation3 + $0xe] sm:$0x3] %v2657_v29  ;;  %v8578_v29 = vld [vmem:[#allocation28_spill] sm:$0xff] }
 0x98f   :  { %v2667_v32 = vld [vmem:[#allocation3 + $0xe] sm:$0x3] }
 0x990   :  { %v2780_v12 = vcombine.low %v2666_v37, %v2667_v32  ;;  %v8577_v32 = vld [vmem:[#allocation48_spill] sm:$0xff]  ;;  %v8585_v37 = vld [vmem:[#allocation49_spill] sm:$0xff] }
 0x992   :  { %v2794_v56 = vrot.slane %v2780_v12, %v6451_v23  ;;  %v8576_v12 = vld [vmem:[#allocation47_spill] sm:$0xff] }
 0x994   :  { %v2795_v45 = vcombine.low %v2787_v26, %v2794_v56  ;;  %v8586_v26 = vld [vmem:[#allocation26_spill] sm:$0xff]  ;;  %v8594_v56 = vld [vmem:[#allocation32_spill] sm:$0xff] }
 0x996   :  { %2869 = vmatmul.mubr.f32.gmra.mxu0 %v2795_v45  ;;  %2946 = vmatmul.mubr.f32.gmra.mxu1 %v2795_v45  ;;  %v8582_v45 = vld [vmem:[#allocation50_spill] sm:$0xff] }
 0x997   :  { %3177 = vmatprep.mubr.f32.mxu0 %v8536_v47  ;;  %3248 = vmatprep.mubr.f32.mxu1 %v8536_v47 }
 0x99a   :  { %3178 = vmatmul.mubr.f32.vlgmr.msra.gmra.mxu0 %v8536_v47  ;;  %3249 = vmatmul.mubr.f32.vlgmr.msra.gmra.mxu1 %v8536_v47 }
 0x99b   :  { %3311 = vmatpush1.msra.mxu0 %v7088_v36  ;;  %3382 = vmatpush1.msra.mxu1 %v7090_v39 }
 0x99c   :  { %3312 = vmatprep.subr.mxu0 %v7094_v11  ;;  %3383 = vmatprep.subr.mxu1 %v7096_v38 }
 0x99d   :  { %3313 = vmatpush1.msra.mxu0 %v7100_v24  ;;  %3384 = vmatpush1.msra.mxu1 %v7102_v51 }
 0x99e   :  { %3314 = vmatprep.subr.mxu0 %v7106_v44  ;;  %3385 = vmatprep.subr.mxu1 %v7108_v60 }
 0x99f   :  { %3315 = vmatpush1.msra.mxu0 %v7112_v13  ;;  %3386 = vmatpush1.msra.mxu1 %v7114_v62 }
 0x9a0   :  { %3316 = vmatprep.subr.mxu0 %v7118_v20  ;;  %3387 = vmatprep.subr.mxu1 %v7120_v35 }
 0x9a1   :  { %3317 = vmatpush1.msra.mxu0 %v7124_v27  ;;  %3388 = vmatpush1.msra.mxu1 %v7126_v0 }
 0x9a2   :  { %3318 = vmatprep.subr.mxu0 %v7130_v52  ;;  %3389 = vmatprep.subr.mxu1 %v7132_v9 }
 0x9a3   :  { %3319 = vmatpush1.msra.mxu0 %v7136_v22  ;;  %3390 = vmatpush1.msra.mxu1 %v7138_v4 }
 0x9a4   :  { %3320 = vmatprep.subr.mxu0 %v7142_v46  ;;  %3391 = vmatprep.subr.mxu1 %v7144_v25 }
 0x9a5   :  { %3321 = vmatpush1.msra.mxu0 %v7146_v21  ;;  %3392 = vmatpush1.msra.mxu1 %v7150_v34 }
 0x9a6   :  { %3322 = vmatprep.subr.mxu0 %v7152_v5  ;;  %3393 = vmatprep.subr.mxu1 %v7154_v8 }
 0x9a7   :  { %3323 = vmatpush1.msra.mxu0 %v7158_v1  ;;  %3394 = vmatpush1.msra.mxu1 %v7160_v6 }
 0x9a8   :  { %3324 = vmatprep.subr.mxu0 %v7162_v10  ;;  %3395 = vmatprep.subr.mxu1 %v7166_v41 }
 0x9a9   :  { %3325 = vmatpush1.msra.mxu0 %v7168_v19  ;;  %3396 = vmatpush1.msra.mxu1 %v7170_v42 }
 0x9aa   :  { %3326 = vmatprep.subr.mxu0 %v7174_v30  ;;  %3397 = vmatprep.subr.mxu1 %v7176_v14 }
 0x9ab   :  { %3327 = vmatpush1.msra.mxu0 %v7180_v53  ;;  %3398 = vmatpush1.msra.mxu1 %v7182_v33 }
 0x9ac   :  { %3328 = vmatprep.subr.mxu0 %v7186_v48  ;;  %3399 = vmatprep.subr.mxu1 %v7188_v50 }
 0x9ad   :  { %3329 = vmatpush1.msra.mxu0 %v7192_v3  ;;  %3400 = vmatpush1.msra.mxu1 %v7194_v31 }
 0x9ae   :  { %3330 = vmatprep.subr.mxu0 %v7198_v57  ;;  %3401 = vmatprep.subr.mxu1 %v7200_v15 }
 0x9af   :  { %3331 = vmatpush1.msra.mxu0 %v7204_v61  ;;  %3402 = vmatpush1.msra.mxu1 %v8575_v58 }
 0x9b0   :  { %3332 = vmatprep.subr.mxu0 %v8576_v12  ;;  %3403 = vmatprep.subr.mxu1 %v8577_v32 }
 0x9b1   :  { %3333 = vmatpush1.msra.mxu0 %v8578_v29  ;;  %3404 = vmatpush1.msra.mxu1 %v8579_v40 }
 0x9b2   :  { %3334 = vmatprep.subr.mxu0 %v8580_v43  ;;  %3405 = vmatprep.subr.mxu1 %v8581_v54 }
 0x9b3   :  { %3335 = vmatpush1.msra.mxu0 %v8582_v45  ;;  %3406 = vmatpush1.msra.mxu1 %v8583_v49  ;;  %v8600_v49 = vld [vmem:[#allocation36_spill] sm:$0xff]  ;;  %v8601_v45 = vld [vmem:[#allocation37_spill] sm:$0xff] }
 0x9b4   :  { %3336 = vmatprep.subr.mxu0 %v8584_v18  ;;  %3407 = vmatprep.subr.mxu1 %v8585_v37  ;;  %v8598_v37 = vld [vmem:[#allocation34_spill] sm:$0xff]  ;;  %v8599_v18 = vld [vmem:[#allocation35_spill] sm:$0xff] }
 0x9b5   :  { %3337 = vmatpush1.msra.mxu0 %v8586_v26  ;;  %3408 = vmatpush1.msra.mxu1 %v8587_v2  ;;  %v8596_v2 = vld [vmem:[#allocation44_spill] sm:$0xff] }
 0x9b6   :  { %3338 = vmatprep.subr.mxu0 %v8588_v55  ;;  %3409 = vmatprep.subr.mxu1 %v8589_v16  ;;  %v8597_v55 = vld [vmem:[#allocation45_spill] sm:$0xff] }
 0x9b7   :  { %3339 = vmatpush1.msra.mxu0 %v8590_v17  ;;  %3410 = vmatpush1.msra.mxu1 %v8591_v28 }
 0x9b8   :  { %3340 = vmatprep.subr.mxu0 %v8592_v59  ;;  %3411 = vmatprep.subr.mxu1 %v8593_v63 }
 0x9b9   :  { %3341 = vmatpush1.msra.mxu0 %v8594_v56  ;;  %3374 = vmatprep.mubr.f32.mxu0 %v8536_v47 }
 0x9ba   :  { %3412 = vmatpush1.msra.mxu1 %v8595_v7  ;;  %3445 = vmatprep.mubr.f32.mxu1 %v8536_v47 }
 0x9bb   :  { %3507 = vmatprep.subr.mxu0 %v8596_v2  ;;  %3578 = vmatprep.subr.mxu1 %v8597_v55 }
 0xa56   :  { %v2870_v16 = vpop.f32.mrf.mxu0  ;;  %v2947_v17 = vpop.f32.mrf.mxu1 }
 0xa57   :  { %v2871_v59 = vadd.f32 %v2870_v16, %v8598_v37  ;;  %v2948_v63 = vadd.f32 %v2947_v17, %v8599_v18  ;;  %v8607_v17 = vld [vmem:[#allocation38_spill] sm:$0xff] }
 0xa58   :  { %v2872_v26 = vpop.f32.mrf.mxu0  ;;  %v2949_v28 = vpop.f32.mrf.mxu1 }
 0xa59   :  { %v2873_v56 = vadd.f32 %v2872_v26, %v8600_v49  ;;  %v2950_v54 = vadd.f32 %v2949_v28, %v8601_v45 }
 0xa5a   :  { %v3179_v43 = vpop.f32.mrf.mxu0  ;;  %v3250_v7 = vpop.f32.mrf.mxu1 }
 0xa5b   :  { %v2996_v40 = vcombine.low %v2871_v59, %v2873_v56  ;;  %v2997_v47 = vcombine.high %v2871_v59, %v2873_v56  ;;  %v2998_v29 = vcombine.low %v2948_v63, %v2950_v54  ;;  %v2999_v2 = vcombine.high %v2948_v63, %v2950_v54 }
 0xa5c   :  { %v3181_v32 = vpop.f32.mrf.mxu0  ;;  %v3252_v55 = vpop.f32.mrf.mxu1 }
 0xa5d   :  { %v7398_v12 = vrot.slane %v2996_v40, %v6451_v23  ;;  %v7401_v58 = vrot.slane %v2997_v47, %v6451_v23  ;;  %v7404_v18 = vrot.slane %v2998_v29, %v6451_v23  ;;  %v7407_v49 = vrot.slane %v2999_v2, %v6451_v23  ;;  %v8606_v2 = vld [vmem:[#allocation40_spill] sm:$0xff] }
 0xa5e   :  { %v3259_v45 = vcombine.low %v3179_v43, %v3181_v32  ;;  %v3260_v37 = vcombine.low %v3250_v7, %v3252_v55  ;;  %v2992_v32 = vcombine.low %v8607_v17, %v8606_v2 }
 0xa5f   :  { %8602 = vst [vmem:[#allocation42_spill] sm:$0xff] %v7398_v12  ;;  %8603 = vst [vmem:[#allocation43_spill] sm:$0xff] %v7401_v58  ;;  %v8624_v58 = vld [vmem:[#allocation29_spill] sm:$0xff]  ;;  %v8626_v12 = vld [vmem:[#allocation31_spill] sm:$0xff] }
 0xa60   :  { %8604 = vst [vmem:[#allocation52_spill] sm:$0xff] %v7404_v18  ;;  %8605 = vst [vmem:[#allocation51_spill] sm:$0xff] %v7407_v49  ;;  %v3267_v29 = vrot.slane %v3259_v45, %v6451_v23  ;;  %v3274_v16 = vrot.slane %v3260_v37, %v6451_v23  ;;  %v8625_v18 = vld [vmem:[#allocation30_spill] sm:$0xff] }
 0xa62   :  { %v3275_v7 = vcombine.low %v3267_v29, %v3274_v16 }
 0xa64   :  { %v3277_v43 = vadd.f32 %v3275_v7, %v2992_v32 }
 0xa66   :  { %v4823_v55 = vmul.f32 -1.442695, %v3277_v43  ;;  %v3285_v28 = vrot.slane %v3277_v43, 2  ;;  %v3296_v63 = vrot.slane %v3277_v43, 6  ;;  %v3293_v54 = vrot.slane %v3277_v43, 4 }
 0xa68   :  { %5318 = vpow2.f32 %v4823_v55  ;;  %v4824_v59 = vmul.f32 -1.442695, %v3285_v28  ;;  %v4825_v56 = vmul.f32 -1.442695, %v3296_v63  ;;  %v8612_v63 = vld [vmem:[#allocation20_spill] sm:$0xff] }
 0xa6a   :  { %5320 = vpow2.f32 %v4824_v59 }
 0xa6b   :  { %5322 = vpow2.f32 %v4825_v56  ;;  %v8613_v56 = vld [vmem:[#allocation17_spill] sm:$0xff] }
 0xa75   :  { %v5319_v40 = vpop.eup %5318 }
 0xa76   :  { %v3281_v26 = vadd.f32 1.0, %v5319_v40 }
 0xa77   :  { %v5321_v47 = vpop.eup %5320 }
 0xa78   :  { %5324 = vrcp.f32 %v3281_v26  ;;  %v3290_v45 = vadd.f32 1.0, %v5321_v47  ;;  %v5323_v37 = vpop.eup %5322  ;;  %v8609_v26 = vld [vmem:[#allocation47_spill] sm:$0xff]  ;;  %v8611_v47 = vld [vmem:[#allocation28_spill] sm:$0xff] }
 0xa79   :  { %5326 = vtanh.f32 %v3293_v54  ;;  %v3301_v32 = vadd.f32 1.0, %v5323_v37  ;;  %v8610_v54 = vld [vmem:[#allocation48_spill] sm:$0xff]  ;;  %v8615_v37 = vld [vmem:[#allocation50_spill] sm:$0xff] }
 0xa7a   :  { %5328 = vrcp.f32 %v3290_v45  ;;  %v8614_v45 = vld [vmem:[#allocation22_spill] sm:$0xff] }
 0xa7b   :  { %5330 = vrcp.f32 %v3301_v32  ;;  %v8618_v32 = vld [vmem:[#allocation49_spill] sm:$0xff] }
 0xa85   :  { %v5325_v49 = vpop.eup %5324 }
 0xa86   :  { %v5327_v29 = vpop.eup %5326 }
 0xa87   :  { %v5329_v16 = vpop.eup %5328  ;;  %v3305_v55 = vmul.f32 %v5327_v29, %v5325_v49  ;;  %v8608_v49 = vld [vmem:[#allocation46_spill] sm:$0xff]  ;;  %v8616_v29 = vld [vmem:[#allocation23_spill] sm:$0xff] }
 0xa88   :  { %v3304_v7 = vmul.f32 0.0, %v5329_v16  ;;  %v5331_v43 = vpop.eup %5330  ;;  %v8617_v16 = vld [vmem:[#allocation24_spill] sm:$0xff] }
 0xa8a   :  { %v7421_v28 = vadd.f32 %v3305_v55, %v3304_v7  ;;  %v8619_v7 = vld [vmem:[#allocation26_spill] sm:$0xff]  ;;  %v8620_v55 = vld [vmem:[#allocation25_spill] sm:$0xff] }
 0xa8c   :  { %5332 = vtanh.f32 %v7421_v28 }
 0xa99   :  { %v5333_v40 = vpop.eup %5332 }
 0xa9a   :  { %v3308_v59 = vmul.f32 %v5333_v40, %v5331_v43  ;;  %v8621_v43 = vld [vmem:[#allocation21_spill] sm:$0xff]  ;;  %v8622_v40 = vld [vmem:[#allocation18_spill] sm:$0xff] }
 0xa9c   :  { %3375 = vmatmul.mubr.f32.vlgmr.msra.gmra.mxu0 %v3308_v59  ;;  %3446 = vmatmul.mubr.f32.vlgmr.msra.gmra.mxu1 %v3308_v59  ;;  %v8623_v59 = vld [vmem:[#allocation19_spill] sm:$0xff] }
 0xa9d   :  { %3508 = vmatpush1.msra.mxu0 %v7088_v36  ;;  %3579 = vmatpush1.msra.mxu1 %v7090_v39 }
 0xa9e   :  { %3509 = vmatprep.subr.mxu0 %v7094_v11  ;;  %3580 = vmatprep.subr.mxu1 %v7096_v38 }
 0xa9f   :  { %3510 = vmatpush1.msra.mxu0 %v7100_v24  ;;  %3581 = vmatpush1.msra.mxu1 %v7102_v51 }
 0xaa0   :  { %3511 = vmatprep.subr.mxu0 %v7106_v44  ;;  %3582 = vmatprep.subr.mxu1 %v7108_v60 }
 0xaa1   :  { %3512 = vmatpush1.msra.mxu0 %v7112_v13  ;;  %3583 = vmatpush1.msra.mxu1 %v7114_v62 }
 0xaa2   :  { %3513 = vmatprep.subr.mxu0 %v7118_v20  ;;  %3584 = vmatprep.subr.mxu1 %v7120_v35 }
 0xaa3   :  { %3514 = vmatpush1.msra.mxu0 %v7124_v27  ;;  %3585 = vmatpush1.msra.mxu1 %v7126_v0 }
 0xaa4   :  { %3515 = vmatprep.subr.mxu0 %v7130_v52  ;;  %3586 = vmatprep.subr.mxu1 %v7132_v9 }
 0xaa5   :  { %3516 = vmatpush1.msra.mxu0 %v7136_v22  ;;  %3587 = vmatpush1.msra.mxu1 %v7138_v4 }
 0xaa6   :  { %3517 = vmatprep.subr.mxu0 %v7142_v46  ;;  %3588 = vmatprep.subr.mxu1 %v7144_v25 }
 0xaa7   :  { %3518 = vmatpush1.msra.mxu0 %v7146_v21  ;;  %3589 = vmatpush1.msra.mxu1 %v7150_v34 }
 0xaa8   :  { %3519 = vmatprep.subr.mxu0 %v7152_v5  ;;  %3590 = vmatprep.subr.mxu1 %v7154_v8 }
 0xaa9   :  { %3520 = vmatpush1.msra.mxu0 %v7158_v1  ;;  %3591 = vmatpush1.msra.mxu1 %v7160_v6 }
 0xaaa   :  { %3521 = vmatprep.subr.mxu0 %v7162_v10  ;;  %3592 = vmatprep.subr.mxu1 %v7166_v41 }
 0xaab   :  { %3522 = vmatpush1.msra.mxu0 %v7168_v19  ;;  %3593 = vmatpush1.msra.mxu1 %v7170_v42 }
 0xaac   :  { %3523 = vmatprep.subr.mxu0 %v7174_v30  ;;  %3594 = vmatprep.subr.mxu1 %v7176_v14 }
 0xaad   :  { %3524 = vmatpush1.msra.mxu0 %v7180_v53  ;;  %3595 = vmatpush1.msra.mxu1 %v7182_v33 }
 0xaae   :  { %3525 = vmatprep.subr.mxu0 %v7186_v48  ;;  %3596 = vmatprep.subr.mxu1 %v7188_v50 }
 0xaaf   :  { %3526 = vmatpush1.msra.mxu0 %v7192_v3  ;;  %3597 = vmatpush1.msra.mxu1 %v7194_v31 }
 0xab0   :  { %3527 = vmatprep.subr.mxu0 %v7198_v57  ;;  %3598 = vmatprep.subr.mxu1 %v7200_v15 }
 0xab1   :  { %3528 = vmatpush1.msra.mxu0 %v7204_v61  ;;  %3599 = vmatpush1.msra.mxu1 %v8608_v49 }
 0xab2   :  { %3529 = vmatprep.subr.mxu0 %v8609_v26  ;;  %3600 = vmatprep.subr.mxu1 %v8610_v54 }
 0xab3   :  { %3530 = vmatpush1.msra.mxu0 %v8611_v47  ;;  %3601 = vmatpush1.msra.mxu1 %v8612_v63 }
 0xab4   :  { %3531 = vmatprep.subr.mxu0 %v8613_v56  ;;  %3602 = vmatprep.subr.mxu1 %v8614_v45 }
 0xab5   :  { %3532 = vmatpush1.msra.mxu0 %v8615_v37  ;;  %3603 = vmatpush1.msra.mxu1 %v8616_v29  ;;  %v8627_v29 = vld [vmem:[#allocation32_spill] sm:$0xff] }
 0xab6   :  { %3533 = vmatprep.subr.mxu0 %v8617_v16  ;;  %3604 = vmatprep.subr.mxu1 %v8618_v32  ;;  %v8628_v16 = vmov 0.0   ;;  %v8629_v32 = vld [vmem:[#allocation33_spill] sm:$0xff] }
 0xab7   :  { %3534 = vmatpush1.msra.mxu0 %v8619_v7  ;;  %3605 = vmatpush1.msra.mxu1 %v8620_v55  ;;  %v8630_v55 = vld [vmem:[#allocation44_spill] sm:$0xff] }
 0xab8   :  { %3535 = vmatprep.subr.mxu0 %v8621_v43  ;;  %3606 = vmatprep.subr.mxu1 %v8622_v40  ;;  %v8631_v43 = vld [vmem:[#allocation45_spill] sm:$0xff] }
 0xab9   :  { %3536 = vmatpush1.msra.mxu0 %v8623_v59  ;;  %3607 = vmatpush1.msra.mxu1 %v8624_v58 }
 0xaba   :  { %3537 = vmatprep.subr.mxu0 %v8625_v18  ;;  %3608 = vmatprep.subr.mxu1 %v8626_v12 }
 0xabb   :  { %3538 = vmatpush1.msra.mxu0 %v8627_v29  ;;  %3571 = vmatprep.mubr.f32.mxu0 %v8628_v16 }
 0xabc   :  { %3609 = vmatpush1.msra.mxu1 %v8629_v32  ;;  %3642 = vmatprep.mubr.f32.mxu1 %v8628_v16  ;;  %v8632_v32 = vcombine.high %v8607_v17, %v8606_v2 }
 0xabd   :  { %3704 = vmatprep.subr.mxu0 %v8630_v55  ;;  %3775 = vmatprep.subr.mxu1 %v8631_v43 }
 0xb5c   :  { %v3376_v40 = vpop.f32.mrf.mxu0  ;;  %v3447_v59 = vpop.f32.mrf.mxu1 }
 0xb5e   :  { %v3378_v7 = vpop.f32.mrf.mxu0  ;;  %v3449_v58 = vpop.f32.mrf.mxu1 }
 0xb5f   :  { %v3456_v37 = vcombine.low %v3376_v40, %v3378_v7  ;;  %v3457_v18 = vcombine.low %v3447_v59, %v3449_v58 }
 0xb61   :  { %v3464_v12 = vrot.slane %v3456_v37, %v6451_v23  ;;  %v3471_v29 = vrot.slane %v3457_v18, %v6451_v23 }
 0xb63   :  { %v3472_v45 = vcombine.low %v3464_v12, %v3471_v29 }
 0xb65   :  { %v3474_v56 = vadd.f32 %v3472_v45, %v8632_v32 }
 0xb67   :  { %v4826_v16 = vmul.f32 -1.442695, %v3474_v56  ;;  %v3482_v63 = vrot.slane %v3474_v56, 2  ;;  %v3493_v43 = vrot.slane %v3474_v56, 6  ;;  %v3490_v26 = vrot.slane %v3474_v56, 4 }
 0xb69   :  { %5334 = vpow2.f32 %v4826_v16  ;;  %v4827_v55 = vmul.f32 -1.442695, %v3482_v63  ;;  %v4828_v47 = vmul.f32 -1.442695, %v3493_v43 }
 0xb6b   :  { %5336 = vpow2.f32 %v4827_v55 }
 0xb6c   :  { %5338 = vpow2.f32 %v4828_v47 }
 0xb76   :  { %v5335_v54 = vpop.eup %5334 }
 0xb77   :  { %v3478_v7 = vadd.f32 1.0, %v5335_v54 }
 0xb78   :  { %v5337_v58 = vpop.eup %5336 }
 0xb79   :  { %5340 = vrcp.f32 %v3478_v7  ;;  %v3487_v37 = vadd.f32 1.0, %v5337_v58  ;;  %v5339_v12 = vpop.eup %5338 }
 0xb7a   :  { %5342 = vtanh.f32 %v3490_v26  ;;  %v3498_v45 = vadd.f32 1.0, %v5339_v12 }
 0xb7b   :  { %5344 = vrcp.f32 %v3487_v37 }
 0xb7c   :  { %5346 = vrcp.f32 %v3498_v45 }
 0xb86   :  { %v5341_v18 = vpop.eup %5340 }
 0xb87   :  { %v5343_v2 = vpop.eup %5342 }
 0xb88   :  { %v5345_v17 = vpop.eup %5344  ;;  %v3502_v63 = vmul.f32 %v5343_v2, %v5341_v18 }
 0xb89   :  { %v3501_v29 = vmul.f32 %v5345_v17, %v7421_v28  ;;  %v5347_v54 = vpop.eup %5346 }
 0xb8b   :  { %v7496_v16 = vadd.f32 %v3502_v63, %v3501_v29 }
 0xb8d   :  { %5348 = vtanh.f32 %v7496_v16 }
 0xb9a   :  { %v5349_v56 = vpop.eup %5348 }
 0xb9b   :  { %v3505_v47 = vmul.f32 %v5349_v56, %v5347_v54  ;;  %v7574_v54 = vld [vmem:[#allocation10 + $0x1e0] sm:$0xff]  ;;  %v7577_v56 = vld [vmem:[#allocation10 + $0x1f0] sm:$0xff] }
 0xb9d   :  { %3572 = vmatmul.mubr.f32.vlgmr.msra.gmra.mxu0 %v3505_v47  ;;  %3643 = vmatmul.mubr.f32.vlgmr.msra.gmra.mxu1 %v3505_v47  ;;  %v7583_v47 = vld [vmem:[#allocation10 + $0x1d8] sm:$0xff] }
 0xb9e   :  { %3705 = vmatpush1.msra.mxu0 %v7088_v36  ;;  %3776 = vmatpush1.msra.mxu1 %v7090_v39  ;;  %v8633_v36 = vld [vmem:[#allocation47_spill] sm:$0xff]  ;;  %v8634_v39 = vld [vmem:[#allocation48_spill] sm:$0xff] }
 0xb9f   :  { %3706 = vmatprep.subr.mxu0 %v7094_v11  ;;  %3777 = vmatprep.subr.mxu1 %v7096_v38  ;;  %v8635_v11 = vld [vmem:[#allocation28_spill] sm:$0xff] }
 0xba0   :  { %3707 = vmatpush1.msra.mxu0 %v7100_v24  ;;  %3778 = vmatpush1.msra.mxu1 %v7102_v51  ;;  %v8636_v38 = vld [vmem:[#allocation20_spill] sm:$0xff]  ;;  %v8637_v24 = vld [vmem:[#allocation17_spill] sm:$0xff]  ;;  %v8638_v51 = vld [vmem:[#allocation22_spill] sm:$0xff] }
 0xba1   :  { %3708 = vmatprep.subr.mxu0 %v7106_v44  ;;  %3779 = vmatprep.subr.mxu1 %v7108_v60  ;;  %v8639_v44 = vld [vmem:[#allocation50_spill] sm:$0xff]  ;;  %v8640_v60 = vld [vmem:[#allocation23_spill] sm:$0xff] }
 0xba2   :  { %3709 = vmatpush1.msra.mxu0 %v7112_v13  ;;  %3780 = vmatpush1.msra.mxu1 %v7114_v62  ;;  %v8641_v13 = vld [vmem:[#allocation24_spill] sm:$0xff]  ;;  %v8642_v62 = vld [vmem:[#allocation49_spill] sm:$0xff] }
 0xba3   :  { %3710 = vmatprep.subr.mxu0 %v7118_v20  ;;  %3781 = vmatprep.subr.mxu1 %v7120_v35  ;;  %v8643_v20 = vld [vmem:[#allocation26_spill] sm:$0xff]  ;;  %v8644_v35 = vld [vmem:[#allocation25_spill] sm:$0xff] }
 0xba4   :  { %3711 = vmatpush1.msra.mxu0 %v7124_v27  ;;  %3782 = vmatpush1.msra.mxu1 %v7126_v0  ;;  %v8645_v27 = vld [vmem:[#allocation21_spill] sm:$0xff]  ;;  %v8646_v0 = vld [vmem:[#allocation18_spill] sm:$0xff] }
 0xba5   :  { %3712 = vmatprep.subr.mxu0 %v7130_v52  ;;  %3783 = vmatprep.subr.mxu1 %v7132_v9  ;;  %v8647_v52 = vld [vmem:[#allocation19_spill] sm:$0xff]  ;;  %v8648_v9 = vld [vmem:[#allocation29_spill] sm:$0xff] }
 0xba6   :  { %3713 = vmatpush1.msra.mxu0 %v7136_v22  ;;  %3784 = vmatpush1.msra.mxu1 %v7138_v4  ;;  %v8649_v22 = vld [vmem:[#allocation30_spill] sm:$0xff]  ;;  %v8650_v4 = vld [vmem:[#allocation31_spill] sm:$0xff] }
 0xba7   :  { %3714 = vmatprep.subr.mxu0 %v7142_v46  ;;  %3785 = vmatprep.subr.mxu1 %v7144_v25  ;;  %v8651_v46 = vld [vmem:[#allocation32_spill] sm:$0xff]  ;;  %v8652_v25 = vmov 0.0  }
 0xba8   :  { %3715 = vmatpush1.msra.mxu0 %v7146_v21  ;;  %3786 = vmatpush1.msra.mxu1 %v7150_v34  ;;  %v8653_v21 = vld [vmem:[#allocation33_spill] sm:$0xff]  ;;  %v8654_v34 = vld [vmem:[#allocation44_spill] sm:$0xff] }
 0xba9   :  { %3716 = vmatprep.subr.mxu0 %v7152_v5  ;;  %3787 = vmatprep.subr.mxu1 %v7154_v8  ;;  %v8655_v5 = vld [vmem:[#allocation45_spill] sm:$0xff] }
 0xbaa   :  { %3717 = vmatpush1.msra.mxu0 %v7158_v1  ;;  %3788 = vmatpush1.msra.mxu1 %v7160_v6 }
 0xbab   :  { %3718 = vmatprep.subr.mxu0 %v7162_v10  ;;  %3789 = vmatprep.subr.mxu1 %v7166_v41 }
 0xbac   :  { %3719 = vmatpush1.msra.mxu0 %v7168_v19  ;;  %3790 = vmatpush1.msra.mxu1 %v7170_v42 }
 0xbad   :  { %3720 = vmatprep.subr.mxu0 %v7174_v30  ;;  %3791 = vmatprep.subr.mxu1 %v7176_v14 }
 0xbae   :  { %3721 = vmatpush1.msra.mxu0 %v7180_v53  ;;  %3792 = vmatpush1.msra.mxu1 %v7182_v33  ;;  %v8656_v53 = vld [vmem:[#allocation39_spill] sm:$0xff]  ;;  %v8657_v33 = vld [vmem:[#allocation41_spill] sm:$0xff] }
 0xbaf   :  { %3722 = vmatprep.subr.mxu0 %v7186_v48  ;;  %3793 = vmatprep.subr.mxu1 %v7188_v50  ;;  %v8658_v48 = vcombine.low %v8656_v53, %v8657_v33 }
 0xbb0   :  { %3723 = vmatpush1.msra.mxu0 %v7192_v3  ;;  %3794 = vmatpush1.msra.mxu1 %v7194_v31 }
 0xbb1   :  { %3724 = vmatprep.subr.mxu0 %v7198_v57  ;;  %3795 = vmatprep.subr.mxu1 %v7200_v15 }
 0xbb2   :  { %3725 = vmatpush1.msra.mxu0 %v7204_v61  ;;  %3796 = vmatpush1.msra.mxu1 %v8608_v49 }
 0xbb3   :  { %3726 = vmatprep.subr.mxu0 %v8633_v36  ;;  %3797 = vmatprep.subr.mxu1 %v8634_v39 }
 0xbb4   :  { %3727 = vmatpush1.msra.mxu0 %v8635_v11  ;;  %3798 = vmatpush1.msra.mxu1 %v8636_v38 }
 0xbb5   :  { %3728 = vmatprep.subr.mxu0 %v8637_v24  ;;  %3799 = vmatprep.subr.mxu1 %v8638_v51 }
 0xbb6   :  { %3729 = vmatpush1.msra.mxu0 %v8639_v44  ;;  %3800 = vmatpush1.msra.mxu1 %v8640_v60 }
 0xbb7   :  { %3730 = vmatprep.subr.mxu0 %v8641_v13  ;;  %3801 = vmatprep.subr.mxu1 %v8642_v62 }
 0xbb8   :  { %3731 = vmatpush1.msra.mxu0 %v8643_v20  ;;  %3802 = vmatpush1.msra.mxu1 %v8644_v35 }
 0xbb9   :  { %3732 = vmatprep.subr.mxu0 %v8645_v27  ;;  %3803 = vmatprep.subr.mxu1 %v8646_v0 }
 0xbba   :  { %3733 = vmatpush1.msra.mxu0 %v8647_v52  ;;  %3804 = vmatpush1.msra.mxu1 %v8648_v9 }
 0xbbb   :  { %3734 = vmatprep.subr.mxu0 %v8649_v22  ;;  %3805 = vmatprep.subr.mxu1 %v8650_v4 }
 0xbbc   :  { %3735 = vmatpush1.msra.mxu0 %v8651_v46  ;;  %3768 = vmatprep.mubr.f32.mxu0 %v8652_v25 }
 0xbbd   :  { %3806 = vmatpush1.msra.mxu1 %v8653_v21  ;;  %3839 = vmatprep.mubr.f32.mxu1 %v8652_v25 }
 0xbbe   :  { %3901 = vmatprep.subr.mxu0 %v8654_v34  ;;  %3972 = vmatprep.subr.mxu1 %v8655_v5  ;;  %v7586_v34 = vld [vmem:[#allocation10 + $0x1c0] sm:$0xff]  ;;  %v7589_v5 = vld [vmem:[#allocation10 + $0x1d0] sm:$0xff] }
 0xc5d   :  { %v3573_v8 = vpop.f32.mrf.mxu0  ;;  %v3644_v1 = vpop.f32.mrf.mxu1 }
 0xc5f   :  { %v3575_v6 = vpop.f32.mrf.mxu0  ;;  %v3646_v10 = vpop.f32.mrf.mxu1 }
 0xc60   :  { %v3653_v41 = vcombine.low %v3573_v8, %v3575_v6  ;;  %v3654_v19 = vcombine.low %v3644_v1, %v3646_v10  ;;  %v7592_v8 = vld [vmem:[#allocation10 + $0x1a8] sm:$0xff]  ;;  %v7595_v1 = vld [vmem:[#allocation10 + $0x1b8] sm:$0xff]  ;;  %v7598_v6 = vld [vmem:[#allocation10 + $0x1a0] sm:$0xff] }
 0xc61   :  { %v7601_v10 = vld [vmem:[#allocation10 + $0x1b0] sm:$0xff] }
 0xc62   :  { %v3661_v42 = vrot.slane %v3653_v41, %v6451_v23  ;;  %v3668_v30 = vrot.slane %v3654_v19, %v6451_v23  ;;  %v7604_v41 = vld [vmem:[#allocation10 + $0x188] sm:$0xff]  ;;  %v7607_v19 = vld [vmem:[#allocation10 + $0x198] sm:$0xff] }
 0xc64   :  { %v3669_v14 = vcombine.low %v3661_v42, %v3668_v30  ;;  %v7610_v42 = vld [vmem:[#allocation10 + $0x180] sm:$0xff]  ;;  %v7613_v30 = vld [vmem:[#allocation10 + $0x190] sm:$0xff] }
 0xc66   :  { %v3671_v50 = vadd.f32 %v3669_v14, %v8658_v48  ;;  %v7616_v14 = vld [vmem:[#allocation10 + $0x168] sm:$0xff]  ;;  %v7619_v48 = vld [vmem:[#allocation10 + $0x178] sm:$0xff] }
 0xc68   :  { %v4829_v3 = vmul.f32 -1.442695, %v3671_v50  ;;  %v3679_v31 = vrot.slane %v3671_v50, 2  ;;  %v3690_v15 = vrot.slane %v3671_v50, 6  ;;  %v3687_v32 = vrot.slane %v3671_v50, 4  ;;  %v7622_v50 = vld [vmem:[#allocation10 + $0x160] sm:$0xff] }
 0xc6a   :  { %5350 = vpow2.f32 %v4829_v3  ;;  %v4830_v57 = vmul.f32 -1.442695, %v3679_v31  ;;  %v4831_v28 = vmul.f32 -1.442695, %v3690_v15  ;;  %v7625_v3 = vld [vmem:[#allocation10 + $0x170] sm:$0xff]  ;;  %v7628_v31 = vld [vmem:[#allocation10 + $0x148] sm:$0xff] }
 0xc6b   :  { %v7634_v15 = vld [vmem:[#allocation10 + $0x140] sm:$0xff] }
 0xc6c   :  { %5352 = vpow2.f32 %v4830_v57  ;;  %v7631_v57 = vld [vmem:[#allocation10 + $0x158] sm:$0xff] }
 0xc6d   :  { %5354 = vpow2.f32 %v4831_v28  ;;  %v7637_v28 = vld [vmem:[#allocation10 + $0x150] sm:$0xff] }
 0xc77   :  { %v5351_v26 = vpop.eup %5350 }
 0xc78   :  { %v3675_v55 = vadd.f32 1.0, %v5351_v26  ;;  %v7640_v26 = vld [vmem:[#allocation10 + $0x128] sm:$0xff] }
 0xc79   :  { %v5353_v43 = vpop.eup %5352 }
 0xc7a   :  { %5356 = vrcp.f32 %v3675_v55  ;;  %v3684_v40 = vadd.f32 1.0, %v5353_v43  ;;  %v5355_v59 = vpop.eup %5354  ;;  %v7646_v55 = vld [vmem:[#allocation10 + $0x120] sm:$0xff]  ;;  %v7649_v43 = vld [vmem:[#allocation10 + $0x130] sm:$0xff] }
 0xc7b   :  { %5358 = vtanh.f32 %v3687_v32  ;;  %v3695_v12 = vadd.f32 1.0, %v5355_v59  ;;  %v7643_v32 = vld [vmem:[#allocation10 + $0x138] sm:$0xff] }
 0xc7c   :  { %5360 = vrcp.f32 %v3684_v40  ;;  %v7652_v40 = vld [vmem:[#allocation10 + $0x108] sm:$0xff]  ;;  %v7655_v59 = vld [vmem:[#allocation10 + $0x118] sm:$0xff] }
 0xc7d   :  { %5362 = vrcp.f32 %v3695_v12  ;;  %v7667_v12 = vld [vmem:[#allocation10 + $0xf8] sm:$0xff] }
 0xc7e   :  { %8659 = vst [vmem:[#allocation27_spill] sm:$0xff] %v7667_v12 }
 0xc87   :  { %v5357_v7 = vpop.eup %5356 }
 0xc88   :  { %v5359_v58 = vpop.eup %5358 }
 0xc89   :  { %v5361_v37 = vpop.eup %5360  ;;  %v3699_v2 = vmul.f32 %v5359_v58, %v5357_v7  ;;  %v7658_v7 = vld [vmem:[#allocation10 + $0x100] sm:$0xff]  ;;  %v7661_v58 = vld [vmem:[#allocation10 + $0x110] sm:$0xff] }
 0xc8a   :  { %v3698_v18 = vmul.f32 %v5361_v37, %v7496_v16  ;;  %v5363_v45 = vpop.eup %5362  ;;  %v7580_v16 = vld [vmem:[#allocation10 + $0x1c8] sm:$0xff] }
 0xc8b   :  { %v7664_v37 = vld [vmem:[#allocation10 + $0xe8] sm:$0xff] }
 0xc8c   :  { %v7571_v17 = vadd.f32 %v3699_v2, %v3698_v18  ;;  %v7670_v18 = vld [vmem:[#allocation10 + $0xe0] sm:$0xff]  ;;  %v7673_v2 = vld [vmem:[#allocation10 + $0xf0] sm:$0xff] }
 0xc8d   :  { %8660 = vst [vmem:[#allocation34_spill] sm:$0xff] %v7670_v18  ;;  %8661 = vst [vmem:[#allocation35_spill] sm:$0xff] %v7673_v2 }
 0xc8e   :  { %5364 = vtanh.f32 %v7571_v17 }
 0xc9b   :  { %v5365_v29 = vpop.eup %5364 }
 0xc9c   :  { %v3702_v63 = vmul.f32 %v5365_v29, %v5363_v45  ;;  %v7676_v45 = vld [vmem:[#allocation10 + $0xc8] sm:$0xff]  ;;  %v7679_v29 = vld [vmem:[#allocation10 + $0xd8] sm:$0xff] }
 0xc9e   :  { %3769 = vmatmul.mubr.f32.vlgmr.msra.gmra.mxu0 %v3702_v63  ;;  %3840 = vmatmul.mubr.f32.vlgmr.msra.gmra.mxu1 %v3702_v63  ;;  %v7682_v63 = vld [vmem:[#allocation10 + $0xc0] sm:$0xff] }
 0xc9f   :  { %3902 = vmatpush1.msra.mxu0 %v7574_v54  ;;  %3973 = vmatpush1.msra.mxu1 %v7577_v56 }
 0xca0   :  { %3903 = vmatprep.subr.mxu0 %v7580_v16  ;;  %3974 = vmatprep.subr.mxu1 %v7583_v47 }
 0xca1   :  { %3904 = vmatpush1.msra.mxu0 %v7586_v34  ;;  %3975 = vmatpush1.msra.mxu1 %v7589_v5 }
 0xca2   :  { %3905 = vmatprep.subr.mxu0 %v7592_v8  ;;  %3976 = vmatprep.subr.mxu1 %v7595_v1 }
 0xca3   :  { %3906 = vmatpush1.msra.mxu0 %v7598_v6  ;;  %3977 = vmatpush1.msra.mxu1 %v7601_v10 }
 0xca4   :  { %3907 = vmatprep.subr.mxu0 %v7604_v41  ;;  %3978 = vmatprep.subr.mxu1 %v7607_v19 }
 0xca5   :  { %3908 = vmatpush1.msra.mxu0 %v7610_v42  ;;  %3979 = vmatpush1.msra.mxu1 %v7613_v30 }
 0xca6   :  { %3909 = vmatprep.subr.mxu0 %v7616_v14  ;;  %3980 = vmatprep.subr.mxu1 %v7619_v48 }
 0xca7   :  { %3910 = vmatpush1.msra.mxu0 %v7622_v50  ;;  %3981 = vmatpush1.msra.mxu1 %v7625_v3 }
 0xca8   :  { %3911 = vmatprep.subr.mxu0 %v7628_v31  ;;  %3982 = vmatprep.subr.mxu1 %v7631_v57 }
 0xca9   :  { %3912 = vmatpush1.msra.mxu0 %v7634_v15  ;;  %3983 = vmatpush1.msra.mxu1 %v7637_v28 }
 0xcaa   :  { %3913 = vmatprep.subr.mxu0 %v7640_v26  ;;  %3984 = vmatprep.subr.mxu1 %v7643_v32 }
 0xcab   :  { %3914 = vmatpush1.msra.mxu0 %v7646_v55  ;;  %3985 = vmatpush1.msra.mxu1 %v7649_v43 }
 0xcac   :  { %3915 = vmatprep.subr.mxu0 %v7652_v40  ;;  %3986 = vmatprep.subr.mxu1 %v7655_v59 }
 0xcad   :  { %3916 = vmatpush1.msra.mxu0 %v7658_v7  ;;  %3987 = vmatpush1.msra.mxu1 %v7661_v58 }
 0xcae   :  { %3917 = vmatprep.subr.mxu0 %v7664_v37  ;;  %3988 = vmatprep.subr.mxu1 %v7667_v12  ;;  %v7685_v12 = vld [vmem:[#allocation10 + $0xd0] sm:$0xff] }
 0xcaf   :  { %3918 = vmatpush1.msra.mxu0 %v7670_v18  ;;  %3989 = vmatpush1.msra.mxu1 %v7673_v2  ;;  %v7688_v18 = vld [vmem:[#allocation10 + $0xa8] sm:$0xff]  ;;  %v7691_v2 = vld [vmem:[#allocation10 + $0xb8] sm:$0xff] }
 0xcb0   :  { %3919 = vmatprep.subr.mxu0 %v7676_v45  ;;  %3990 = vmatprep.subr.mxu1 %v7679_v29 }
 0xcb1   :  { %3920 = vmatpush1.msra.mxu0 %v7682_v63  ;;  %3991 = vmatpush1.msra.mxu1 %v7685_v12 }
 0xcb2   :  { %3921 = vmatprep.subr.mxu0 %v7688_v18  ;;  %3992 = vmatprep.subr.mxu1 %v7691_v2 }
 0xcb3   :  { %3922 = vmatpush1.msra.mxu0 %v7204_v61  ;;  %3993 = vmatpush1.msra.mxu1 %v8608_v49  ;;  %v7718_v61 = vld [vmem:[#allocation10 + $0x1e8] sm:$0xff]  ;;  %v7721_v49 = vld [vmem:[#allocation10 + $0x1f8] sm:$0xff] }
 0xcb4   :  { %3923 = vmatprep.subr.mxu0 %v8633_v36  ;;  %3994 = vmatprep.subr.mxu1 %v8634_v39  ;;  %8662 = vst [vmem:[#allocation36_spill] sm:$0xff] %v7718_v61  ;;  %8663 = vst [vmem:[#allocation37_spill] sm:$0xff] %v7721_v49 }
 0xcb5   :  { %3924 = vmatpush1.msra.mxu0 %v8635_v11  ;;  %3995 = vmatpush1.msra.mxu1 %v8636_v38 }
 0xcb6   :  { %3925 = vmatprep.subr.mxu0 %v8637_v24  ;;  %3996 = vmatprep.subr.mxu1 %v8638_v51 }
 0xcb7   :  { %3926 = vmatpush1.msra.mxu0 %v8639_v44  ;;  %3997 = vmatpush1.msra.mxu1 %v8640_v60 }
 0xcb8   :  { %3927 = vmatprep.subr.mxu0 %v8641_v13  ;;  %3998 = vmatprep.subr.mxu1 %v8642_v62  ;;  %v8664_v62 = vcombine.high %v8656_v53, %v8657_v33 }
 0xcb9   :  { %3928 = vmatpush1.msra.mxu0 %v8643_v20  ;;  %3999 = vmatpush1.msra.mxu1 %v8644_v35 }
 0xcba   :  { %3929 = vmatprep.subr.mxu0 %v8645_v27  ;;  %4000 = vmatprep.subr.mxu1 %v8646_v0 }
 0xcbb   :  { %3930 = vmatpush1.msra.mxu0 %v8647_v52  ;;  %4001 = vmatpush1.msra.mxu1 %v8648_v9 }
 0xcbc   :  { %3931 = vmatprep.subr.mxu0 %v8649_v22  ;;  %4002 = vmatprep.subr.mxu1 %v8650_v4 }
 0xcbd   :  { %3932 = vmatpush1.msra.mxu0 %v8651_v46  ;;  %3965 = vmatprep.mubr.f32.mxu0 %v8652_v25 }
 0xcbe   :  { %4003 = vmatpush1.msra.mxu1 %v8653_v21  ;;  %4036 = vmatprep.mubr.f32.mxu1 %v8652_v25 }
 0xcbf   :  { %4098 = vmatprep.subr.mxu0 %v7718_v61  ;;  %4169 = vmatprep.subr.mxu1 %v7721_v49 }
 0xd5e   :  { %v3770_v36 = vpop.f32.mrf.mxu0  ;;  %v3841_v39 = vpop.f32.mrf.mxu1 }
 0xd60   :  { %v3772_v11 = vpop.f32.mrf.mxu0  ;;  %v3843_v38 = vpop.f32.mrf.mxu1 }
 0xd61   :  { %v3850_v24 = vcombine.low %v3770_v36, %v3772_v11  ;;  %v3851_v51 = vcombine.low %v3841_v39, %v3843_v38 }
 0xd63   :  { %v3858_v44 = vrot.slane %v3850_v24, %v6451_v23  ;;  %v3865_v60 = vrot.slane %v3851_v51, %v6451_v23 }
 0xd65   :  { %v3866_v13 = vcombine.low %v3858_v44, %v3865_v60 }
 0xd67   :  { %v3868_v20 = vadd.f32 %v3866_v13, %v8664_v62 }
 0xd69   :  { %v4832_v35 = vmul.f32 -1.442695, %v3868_v20  ;;  %v3876_v27 = vrot.slane %v3868_v20, 2  ;;  %v3887_v52 = vrot.slane %v3868_v20, 6  ;;  %v3884_v4 = vrot.slane %v3868_v20, 4  ;;  %v8666_v20 = vld [vmem:[#allocation34_spill] sm:$0xff] }
 0xd6b   :  { %5366 = vpow2.f32 %v4832_v35  ;;  %v4833_v0 = vmul.f32 -1.442695, %v3876_v27  ;;  %v4834_v9 = vmul.f32 -1.442695, %v3887_v52  ;;  %v8667_v35 = vld [vmem:[#allocation35_spill] sm:$0xff]  ;;  %v7773_v27 = vld [vmem:[#allocation10 + $0xa0] sm:$0xff] }
 0xd6c   :  { %v7779_v52 = vld [vmem:[#allocation10 + $0x88] sm:$0xff] }
 0xd6d   :  { %5368 = vpow2.f32 %v4833_v0  ;;  %v7776_v0 = vld [vmem:[#allocation10 + $0xb0] sm:$0xff]  ;;  %8668 = vst [vmem:[#allocation40_spill] sm:$0xff] %v7779_v52 }
 0xd6e   :  { %5370 = vpow2.f32 %v4834_v9  ;;  %v7782_v9 = vld [vmem:[#allocation10 + $0x98] sm:$0xff] }
 0xd6f   :  { %8669 = vst [vmem:[#allocation38_spill] sm:$0xff] %v7782_v9 }
 0xd78   :  { %v5367_v22 = vpop.eup %5366 }
 0xd79   :  { %v3872_v46 = vadd.f32 1.0, %v5367_v22  ;;  %v7785_v22 = vld [vmem:[#allocation10 + $0x80] sm:$0xff] }
 0xd7a   :  { %v5369_v21 = vpop.eup %5368  ;;  %8670 = vst [vmem:[#allocation46_spill] sm:$0xff] %v7785_v22 }
 0xd7b   :  { %5372 = vrcp.f32 %v3872_v46  ;;  %v3881_v36 = vadd.f32 1.0, %v5369_v21  ;;  %v5371_v39 = vpop.eup %5370  ;;  %v7791_v46 = vld [vmem:[#allocation10 + $0x68] sm:$0xff]  ;;  %v7794_v21 = vld [vmem:[#allocation10 + $0x78] sm:$0xff] }
 0xd7c   :  { %5374 = vtanh.f32 %v3884_v4  ;;  %v3892_v38 = vadd.f32 1.0, %v5371_v39  ;;  %v7788_v4 = vld [vmem:[#allocation10 + $0x90] sm:$0xff]  ;;  %8672 = vst [vmem:[#allocation48_spill] sm:$0xff] %v7791_v46  ;;  %8673 = vst [vmem:[#allocation28_spill] sm:$0xff] %v7794_v21 }
 0xd7d   :  { %5376 = vrcp.f32 %v3881_v36  ;;  %8671 = vst [vmem:[#allocation47_spill] sm:$0xff] %v7788_v4  ;;  %v7797_v36 = vld [vmem:[#allocation10 + $0x60] sm:$0xff]  ;;  %v7800_v39 = vld [vmem:[#allocation10 + $0x70] sm:$0xff] }
 0xd7e   :  { %5378 = vrcp.f32 %v3892_v38  ;;  %8674 = vst [vmem:[#allocation20_spill] sm:$0xff] %v7797_v36  ;;  %8675 = vst [vmem:[#allocation17_spill] sm:$0xff] %v7800_v39  ;;  %v7812_v38 = vld [vmem:[#allocation10 + $0x50] sm:$0xff] }
 0xd7f   :  { %8679 = vst [vmem:[#allocation24_spill] sm:$0xff] %v7812_v38 }
 0xd88   :  { %v5373_v11 = vpop.eup %5372 }
 0xd89   :  { %v5375_v53 = vpop.eup %5374 }
 0xd8a   :  { %v5377_v33 = vpop.eup %5376  ;;  %v3896_v51 = vmul.f32 %v5375_v53, %v5373_v11  ;;  %v7803_v11 = vld [vmem:[#allocation10 + $0x48] sm:$0xff]  ;;  %v7806_v53 = vld [vmem:[#allocation10 + $0x58] sm:$0xff] }
 0xd8b   :  { %v3895_v24 = vmul.f32 %v5377_v33, %v7571_v17  ;;  %v5379_v60 = vpop.eup %5378  ;;  %v8665_v17 = vld [vmem:[#allocation27_spill] sm:$0xff]  ;;  %8676 = vst [vmem:[#allocation22_spill] sm:$0xff] %v7803_v11  ;;  %8677 = vst [vmem:[#allocation50_spill] sm:$0xff] %v7806_v53  ;;  %v7809_v33 = vld [vmem:[#allocation10 + $0x40] sm:$0xff] }
 0xd8c   :  { %8678 = vst [vmem:[#allocation23_spill] sm:$0xff] %v7809_v33 }
 0xd8d   :  { %v7730_v44 = vadd.f32 %v3896_v51, %v3895_v24  ;;  %v7815_v24 = vld [vmem:[#allocation10 + $0x28] sm:$0xff]  ;;  %v7818_v51 = vld [vmem:[#allocation10 + $0x38] sm:$0xff] }
 0xd8e   :  { %8680 = vst [vmem:[#allocation49_spill] sm:$0xff] %v7815_v24  ;;  %8681 = vst [vmem:[#allocation26_spill] sm:$0xff] %v7818_v51 }
 0xd8f   :  { %5380 = vtanh.f32 %v7730_v44 }
 0xd9c   :  { %v5381_v13 = vpop.eup %5380 }
 0xd9d   :  { %v3899_v62 = vmul.f32 %v5381_v13, %v5379_v60  ;;  %v7821_v60 = vld [vmem:[#allocation10 + $0x20] sm:$0xff]  ;;  %v7824_v13 = vld [vmem:[#allocation10 + $0x30] sm:$0xff] }
 0xd9e   :  { %8682 = vst [vmem:[#allocation25_spill] sm:$0xff] %v7821_v60  ;;  %8683 = vst [vmem:[#allocation21_spill] sm:$0xff] %v7824_v13 }
 0xd9f   :  { %3966 = vmatmul.mubr.f32.vlgmr.msra.gmra.mxu0 %v3899_v62  ;;  %4037 = vmatmul.mubr.f32.vlgmr.msra.gmra.mxu1 %v3899_v62  ;;  %v7827_v62 = vld [vmem:[#allocation10 + $0x8] sm:$0xff] }
 0xda0   :  { %4099 = vmatpush1.msra.mxu0 %v7574_v54  ;;  %4170 = vmatpush1.msra.mxu1 %v7577_v56  ;;  %8684 = vst [vmem:[#allocation18_spill] sm:$0xff] %v7827_v62 }
 0xda1   :  { %4100 = vmatprep.subr.mxu0 %v7580_v16  ;;  %4171 = vmatprep.subr.mxu1 %v7583_v47 }
 0xda2   :  { %4101 = vmatpush1.msra.mxu0 %v7586_v34  ;;  %4172 = vmatpush1.msra.mxu1 %v7589_v5 }
 0xda3   :  { %4102 = vmatprep.subr.mxu0 %v7592_v8  ;;  %4173 = vmatprep.subr.mxu1 %v7595_v1 }
 0xda4   :  { %4103 = vmatpush1.msra.mxu0 %v7598_v6  ;;  %4174 = vmatpush1.msra.mxu1 %v7601_v10 }
 0xda5   :  { %4104 = vmatprep.subr.mxu0 %v7604_v41  ;;  %4175 = vmatprep.subr.mxu1 %v7607_v19 }
 0xda6   :  { %4105 = vmatpush1.msra.mxu0 %v7610_v42  ;;  %4176 = vmatpush1.msra.mxu1 %v7613_v30 }
 0xda7   :  { %4106 = vmatprep.subr.mxu0 %v7616_v14  ;;  %4177 = vmatprep.subr.mxu1 %v7619_v48 }
 0xda8   :  { %4107 = vmatpush1.msra.mxu0 %v7622_v50  ;;  %4178 = vmatpush1.msra.mxu1 %v7625_v3 }
 0xda9   :  { %4108 = vmatprep.subr.mxu0 %v7628_v31  ;;  %4179 = vmatprep.subr.mxu1 %v7631_v57 }
 0xdaa   :  { %4109 = vmatpush1.msra.mxu0 %v7634_v15  ;;  %4180 = vmatpush1.msra.mxu1 %v7637_v28 }
 0xdab   :  { %4110 = vmatprep.subr.mxu0 %v7640_v26  ;;  %4181 = vmatprep.subr.mxu1 %v7643_v32 }
 0xdac   :  { %4111 = vmatpush1.msra.mxu0 %v7646_v55  ;;  %4182 = vmatpush1.msra.mxu1 %v7649_v43 }
 0xdad   :  { %4112 = vmatprep.subr.mxu0 %v7652_v40  ;;  %4183 = vmatprep.subr.mxu1 %v7655_v59 }
 0xdae   :  { %4113 = vmatpush1.msra.mxu0 %v7658_v7  ;;  %4184 = vmatpush1.msra.mxu1 %v7661_v58 }
 0xdaf   :  { %4114 = vmatprep.subr.mxu0 %v7664_v37  ;;  %4185 = vmatprep.subr.mxu1 %v8665_v17 }
 0xdb0   :  { %4115 = vmatpush1.msra.mxu0 %v8666_v20  ;;  %4186 = vmatpush1.msra.mxu1 %v8667_v35 }
 0xdb1   :  { %4116 = vmatprep.subr.mxu0 %v7676_v45  ;;  %4187 = vmatprep.subr.mxu1 %v7679_v29 }
 0xdb2   :  { %4117 = vmatpush1.msra.mxu0 %v7682_v63  ;;  %4188 = vmatpush1.msra.mxu1 %v7685_v12 }
 0xdb3   :  { %4118 = vmatprep.subr.mxu0 %v7688_v18  ;;  %4189 = vmatprep.subr.mxu1 %v7691_v2 }
 0xdb4   :  { %4119 = vmatpush1.msra.mxu0 %v7773_v27  ;;  %4190 = vmatpush1.msra.mxu1 %v7776_v0 }
 0xdb5   :  { %4120 = vmatprep.subr.mxu0 %v7779_v52  ;;  %4191 = vmatprep.subr.mxu1 %v7782_v9 }
 0xdb6   :  { %4121 = vmatpush1.msra.mxu0 %v7785_v22  ;;  %4192 = vmatpush1.msra.mxu1 %v7788_v4 }
 0xdb7   :  { %4122 = vmatprep.subr.mxu0 %v7791_v46  ;;  %4193 = vmatprep.subr.mxu1 %v7794_v21  ;;  %v8689_v21 = vld [vmem:[#allocation52_spill] sm:$0xff] }
 0xdb8   :  { %4123 = vmatpush1.msra.mxu0 %v7797_v36  ;;  %4194 = vmatpush1.msra.mxu1 %v7800_v39  ;;  %v8688_v36 = vld [vmem:[#allocation42_spill] sm:$0xff] }
 0xdb9   :  { %4124 = vmatprep.subr.mxu0 %v7803_v11  ;;  %4195 = vmatprep.subr.mxu1 %v7806_v53 }
 0xdba   :  { %4125 = vmatpush1.msra.mxu0 %v7809_v33  ;;  %4196 = vmatpush1.msra.mxu1 %v7812_v38  ;;  %v7830_v38 = vld [vmem:[#allocation10 + $0x18] sm:$0xff] }
 0xdbb   :  { %4126 = vmatprep.subr.mxu0 %v7815_v24  ;;  %4197 = vmatprep.subr.mxu1 %v7818_v51  ;;  %8685 = vst [vmem:[#allocation19_spill] sm:$0xff] %v7830_v38  ;;  %v7833_v24 = vld [vmem:[#allocation10] sm:$0xff]  ;;  %v7837_v51 = vld [vmem:[#allocation10 + $0x10] sm:$0xff] }
 0xdbc   :  { %4127 = vmatpush1.msra.mxu0 %v7821_v60  ;;  %4198 = vmatpush1.msra.mxu1 %v7824_v13  ;;  %8686 = vst [vmem:[#allocation29_spill] sm:$0xff] %v7833_v24  ;;  %8687 = vst [vmem:[#allocation30_spill] sm:$0xff] %v7837_v51 }
 0xdbd   :  { %4128 = vmatprep.subr.mxu0 %v7827_v62  ;;  %4199 = vmatprep.subr.mxu1 %v7830_v38 }
 0xdbe   :  { %4129 = vmatpush1.msra.mxu0 %v7833_v24  ;;  %4162 = vmatprep.mubr.f32.mxu0 %v8652_v25 }
 0xdbf   :  { %4200 = vmatpush1.msra.mxu1 %v7837_v51  ;;  %4233 = vmatprep.mubr.f32.mxu1 %v8652_v25  ;;  %v8690_v51 = vcombine.low %v8688_v36, %v8689_v21 }
 0xdc0   :  { %4295 = vmatprep.subr.mxu0 %v7718_v61  ;;  %4366 = vmatprep.subr.mxu1 %v7721_v49 }
 0xe5f   :  { %v3967_v62 = vpop.f32.mrf.mxu0  ;;  %v4038_v13 = vpop.f32.mrf.mxu1 }
 0xe61   :  { %v3969_v60 = vpop.f32.mrf.mxu0  ;;  %v4040_v38 = vpop.f32.mrf.mxu1 }
 0xe62   :  { %v4047_v33 = vcombine.low %v3967_v62, %v3969_v60  ;;  %v4048_v53 = vcombine.low %v4038_v13, %v4040_v38  ;;  %v8694_v13 = vld [vmem:[#allocation47_spill] sm:$0xff]  ;;  %v8695_v62 = vld [vmem:[#allocation48_spill] sm:$0xff] }
 0xe64   :  { %v4055_v24 = vrot.slane %v4047_v33, %v6451_v23  ;;  %v4062_v11 = vrot.slane %v4048_v53, %v6451_v23 }
 0xe66   :  { %v4063_v39 = vcombine.low %v4055_v24, %v4062_v11 }
 0xe68   :  { %v4065_v46 = vadd.f32 %v4063_v39, %v8690_v51 }
 0xe6a   :  { %v4835_v25 = vmul.f32 -1.442695, %v4065_v46  ;;  %v4073_v4 = vrot.slane %v4065_v46, 2  ;;  %v4084_v49 = vrot.slane %v4065_v46, 6  ;;  %v4081_v52 = vrot.slane %v4065_v46, 4  ;;  %v8693_v46 = vld [vmem:[#allocation46_spill] sm:$0xff] }
 0xe6c   :  { %5382 = vpow2.f32 %v4835_v25  ;;  %v4836_v61 = vmul.f32 -1.442695, %v4073_v4  ;;  %v4837_v22 = vmul.f32 -1.442695, %v4084_v49 }
 0xe6e   :  { %5384 = vpow2.f32 %v4836_v61 }
 0xe6f   :  { %5386 = vpow2.f32 %v4837_v22 }
 0xe79   :  { %v5383_v9 = vpop.eup %5382 }
 0xe7a   :  { %v4069_v60 = vadd.f32 1.0, %v5383_v9 }
 0xe7b   :  { %v5385_v38 = vpop.eup %5384 }
 0xe7c   :  { %5388 = vrcp.f32 %v4069_v60  ;;  %v4078_v33 = vadd.f32 1.0, %v5385_v38  ;;  %v5387_v11 = vpop.eup %5386  ;;  %v8696_v60 = vld [vmem:[#allocation28_spill] sm:$0xff] }
 0xe7d   :  { %5390 = vtanh.f32 %v4081_v52  ;;  %v4089_v51 = vadd.f32 1.0, %v5387_v11  ;;  %v8692_v52 = vld [vmem:[#allocation38_spill] sm:$0xff]  ;;  %v8697_v38 = vld [vmem:[#allocation20_spill] sm:$0xff] }
 0xe7e   :  { %5392 = vrcp.f32 %v4078_v33  ;;  %v8698_v33 = vld [vmem:[#allocation17_spill] sm:$0xff]  ;;  %v8699_v11 = vld [vmem:[#allocation22_spill] sm:$0xff] }
 0xe7f   :  { %5394 = vrcp.f32 %v4089_v51  ;;  %v8703_v51 = vld [vmem:[#allocation49_spill] sm:$0xff] }
 0xe89   :  { %v5389_v53 = vpop.eup %5388 }
 0xe8a   :  { %v5391_v24 = vpop.eup %5390 }
 0xe8b   :  { %v5393_v39 = vpop.eup %5392  ;;  %v4093_v4 = vmul.f32 %v5391_v24, %v5389_v53  ;;  %v8700_v53 = vld [vmem:[#allocation50_spill] sm:$0xff]  ;;  %v8701_v24 = vld [vmem:[#allocation23_spill] sm:$0xff] }
 0xe8c   :  { %v4092_v25 = vmul.f32 %v5393_v39, %v7730_v44  ;;  %v5395_v49 = vpop.eup %5394  ;;  %v8691_v44 = vld [vmem:[#allocation40_spill] sm:$0xff] }
 0xe8d   :  { %v8702_v39 = vld [vmem:[#allocation24_spill] sm:$0xff] }
 0xe8e   :  { %v7849_v61 = vadd.f32 %v4093_v4, %v4092_v25  ;;  %v8704_v25 = vld [vmem:[#allocation26_spill] sm:$0xff]  ;;  %v8705_v4 = vld [vmem:[#allocation25_spill] sm:$0xff] }
 0xe90   :  { %5396 = vtanh.f32 %v7849_v61 }
 0xe9d   :  { %v5397_v9 = vpop.eup %5396 }
 0xe9e   :  { %v4096_v22 = vmul.f32 %v5397_v9, %v5395_v49  ;;  %v8706_v49 = vld [vmem:[#allocation21_spill] sm:$0xff]  ;;  %v8707_v9 = vld [vmem:[#allocation18_spill] sm:$0xff] }
 0xea0   :  { %4163 = vmatmul.mubr.f32.vlgmr.msra.gmra.mxu0 %v4096_v22  ;;  %4234 = vmatmul.mubr.f32.vlgmr.msra.gmra.mxu1 %v4096_v22  ;;  %v8708_v22 = vld [vmem:[#allocation19_spill] sm:$0xff] }
 0xea1   :  { %4296 = vmatpush1.msra.mxu0 %v7574_v54  ;;  %4367 = vmatpush1.msra.mxu1 %v7577_v56 }
 0xea2   :  { %4297 = vmatprep.subr.mxu0 %v7580_v16  ;;  %4368 = vmatprep.subr.mxu1 %v7583_v47 }
 0xea3   :  { %4298 = vmatpush1.msra.mxu0 %v7586_v34  ;;  %4369 = vmatpush1.msra.mxu1 %v7589_v5 }
 0xea4   :  { %4299 = vmatprep.subr.mxu0 %v7592_v8  ;;  %4370 = vmatprep.subr.mxu1 %v7595_v1 }
 0xea5   :  { %4300 = vmatpush1.msra.mxu0 %v7598_v6  ;;  %4371 = vmatpush1.msra.mxu1 %v7601_v10 }
 0xea6   :  { %4301 = vmatprep.subr.mxu0 %v7604_v41  ;;  %4372 = vmatprep.subr.mxu1 %v7607_v19 }
 0xea7   :  { %4302 = vmatpush1.msra.mxu0 %v7610_v42  ;;  %4373 = vmatpush1.msra.mxu1 %v7613_v30 }
 0xea8   :  { %4303 = vmatprep.subr.mxu0 %v7616_v14  ;;  %4374 = vmatprep.subr.mxu1 %v7619_v48 }
 0xea9   :  { %4304 = vmatpush1.msra.mxu0 %v7622_v50  ;;  %4375 = vmatpush1.msra.mxu1 %v7625_v3 }
 0xeaa   :  { %4305 = vmatprep.subr.mxu0 %v7628_v31  ;;  %4376 = vmatprep.subr.mxu1 %v7631_v57 }
 0xeab   :  { %4306 = vmatpush1.msra.mxu0 %v7634_v15  ;;  %4377 = vmatpush1.msra.mxu1 %v7637_v28 }
 0xeac   :  { %4307 = vmatprep.subr.mxu0 %v7640_v26  ;;  %4378 = vmatprep.subr.mxu1 %v7643_v32 }
 0xead   :  { %4308 = vmatpush1.msra.mxu0 %v7646_v55  ;;  %4379 = vmatpush1.msra.mxu1 %v7649_v43 }
 0xeae   :  { %4309 = vmatprep.subr.mxu0 %v7652_v40  ;;  %4380 = vmatprep.subr.mxu1 %v7655_v59 }
 0xeaf   :  { %4310 = vmatpush1.msra.mxu0 %v7658_v7  ;;  %4381 = vmatpush1.msra.mxu1 %v7661_v58 }
 0xeb0   :  { %4311 = vmatprep.subr.mxu0 %v7664_v37  ;;  %4382 = vmatprep.subr.mxu1 %v8665_v17 }
 0xeb1   :  { %4312 = vmatpush1.msra.mxu0 %v8666_v20  ;;  %4383 = vmatpush1.msra.mxu1 %v8667_v35 }
 0xeb2   :  { %4313 = vmatprep.subr.mxu0 %v7676_v45  ;;  %4384 = vmatprep.subr.mxu1 %v7679_v29 }
 0xeb3   :  { %4314 = vmatpush1.msra.mxu0 %v7682_v63  ;;  %4385 = vmatpush1.msra.mxu1 %v7685_v12 }
 0xeb4   :  { %4315 = vmatprep.subr.mxu0 %v7688_v18  ;;  %4386 = vmatprep.subr.mxu1 %v7691_v2 }
 0xeb5   :  { %4316 = vmatpush1.msra.mxu0 %v7773_v27  ;;  %4387 = vmatpush1.msra.mxu1 %v7776_v0 }
 0xeb6   :  { %4317 = vmatprep.subr.mxu0 %v8691_v44  ;;  %4388 = vmatprep.subr.mxu1 %v8692_v52 }
 0xeb7   :  { %4318 = vmatpush1.msra.mxu0 %v8693_v46  ;;  %4389 = vmatpush1.msra.mxu1 %v8694_v13 }
 0xeb8   :  { %4319 = vmatprep.subr.mxu0 %v8695_v62  ;;  %4390 = vmatprep.subr.mxu1 %v8696_v60 }
 0xeb9   :  { %4320 = vmatpush1.msra.mxu0 %v8697_v38  ;;  %4391 = vmatpush1.msra.mxu1 %v8698_v33  ;;  %v8709_v33 = vld [vmem:[#allocation29_spill] sm:$0xff] }
 0xeba   :  { %4321 = vmatprep.subr.mxu0 %v8699_v11  ;;  %4392 = vmatprep.subr.mxu1 %v8700_v53  ;;  %v8710_v11 = vmov 0.0   ;;  %v8711_v53 = vld [vmem:[#allocation30_spill] sm:$0xff] }
 0xebb   :  { %4322 = vmatpush1.msra.mxu0 %v8701_v24  ;;  %4393 = vmatpush1.msra.mxu1 %v8702_v39  ;;  %v8712_v39 = vld [vmem:[#allocation36_spill] sm:$0xff] }
 0xebc   :  { %4323 = vmatprep.subr.mxu0 %v8703_v51  ;;  %4394 = vmatprep.subr.mxu1 %v8704_v25  ;;  %v8713_v51 = vld [vmem:[#allocation37_spill] sm:$0xff] }
 0xebd   :  { %4324 = vmatpush1.msra.mxu0 %v8705_v4  ;;  %4395 = vmatpush1.msra.mxu1 %v8706_v49 }
 0xebe   :  { %4325 = vmatprep.subr.mxu0 %v8707_v9  ;;  %4396 = vmatprep.subr.mxu1 %v8708_v22 }
 0xebf   :  { %4326 = vmatpush1.msra.mxu0 %v8709_v33  ;;  %4359 = vmatprep.mubr.f32.mxu0 %v8710_v11 }
 0xec0   :  { %4397 = vmatpush1.msra.mxu1 %v8711_v53  ;;  %4430 = vmatprep.mubr.f32.mxu1 %v8710_v11  ;;  %v8714_v53 = vcombine.high %v8688_v36, %v8689_v21 }
 0xec1   :  { %4492 = vmatprep.subr.mxu0 %v8712_v39  ;;  %4563 = vmatprep.subr.mxu1 %v8713_v51 }
 0xf60   :  { %v4164_v25 = vpop.f32.mrf.mxu0  ;;  %v4235_v4 = vpop.f32.mrf.mxu1 }
 0xf62   :  { %v4166_v24 = vpop.f32.mrf.mxu0  ;;  %v4237_v49 = vpop.f32.mrf.mxu1 }
 0xf63   :  { %v4244_v38 = vcombine.low %v4164_v25, %v4166_v24  ;;  %v4245_v9 = vcombine.low %v4235_v4, %v4237_v49 }
 0xf65   :  { %v4252_v22 = vrot.slane %v4244_v38, %v6451_v23  ;;  %v4259_v33 = vrot.slane %v4245_v9, %v6451_v23 }
 0xf67   :  { %v4260_v60 = vcombine.low %v4252_v22, %v4259_v33 }
 0xf69   :  { %v4262_v62 = vadd.f32 %v4260_v60, %v8714_v53 }
 0xf6b   :  { %v4838_v11 = vmul.f32 -1.442695, %v4262_v62  ;;  %v4270_v13 = vrot.slane %v4262_v62, 2  ;;  %v4281_v51 = vrot.slane %v4262_v62, 6  ;;  %v4278_v44 = vrot.slane %v4262_v62, 4 }
 0xf6d   :  { %5398 = vpow2.f32 %v4838_v11  ;;  %v4839_v39 = vmul.f32 -1.442695, %v4270_v13  ;;  %v4840_v46 = vmul.f32 -1.442695, %v4281_v51 }
 0xf6f   :  { %5400 = vpow2.f32 %v4839_v39 }
 0xf70   :  { %5402 = vpow2.f32 %v4840_v46 }
 0xf7a   :  { %v5399_v52 = vpop.eup %5398 }
 0xf7b   :  { %v4266_v24 = vadd.f32 1.0, %v5399_v52 }
 0xf7c   :  { %v5401_v25 = vpop.eup %5400 }
 0xf7d   :  { %5404 = vrcp.f32 %v4266_v24  ;;  %v4275_v38 = vadd.f32 1.0, %v5401_v25  ;;  %v5403_v33 = vpop.eup %5402 }
 0xf7e   :  { %5406 = vtanh.f32 %v4278_v44  ;;  %v4286_v60 = vadd.f32 1.0, %v5403_v33 }
 0xf7f   :  { %5408 = vrcp.f32 %v4275_v38 }
 0xf80   :  { %5410 = vrcp.f32 %v4286_v60  ;;  %v4702_v60 = vld [vmem:[%s8084_s7 + $0x70] sm:$0xff] }
 0xf8a   :  { %v5405_v4 = vpop.eup %5404 }
 0xf8b   :  { %v5407_v21 = vpop.eup %5406 }
 0xf8c   :  { %v5409_v36 = vpop.eup %5408  ;;  %v4290_v13 = vmul.f32 %v5407_v21, %v5405_v4 }
 0xf8d   :  { %v4289_v11 = vmul.f32 %v5409_v36, %v7849_v61  ;;  %v5411_v52 = vpop.eup %5410  ;;  %v4703_v36 = vld [vmem:[%s8084_s7 + $0x78] sm:$0xff] }
 0xf8f   :  { %v7924_v53 = vadd.f32 %v4290_v13, %v4289_v11  ;;  %v4701_v11 = vld [vmem:[%s8084_s7 + $0x68] sm:$0xff]  ;;  %v4700_v13 = vld [vmem:[%s8084_s7 + $0x60] sm:$0xff] }
 0xf91   :  { %5412 = vtanh.f32 %v7924_v53 }
 0xf9e   :  { %v5413_v62 = vpop.eup %5412 }
 0xf9f   :  { %v4293_v46 = vmul.f32 %v5413_v62, %v5411_v52  ;;  %v4698_v52 = vld [vmem:[%s8084_s7 + $0x50] sm:$0xff]  ;;  %v4697_v62 = vld [vmem:[%s8084_s7 + $0x48] sm:$0xff] }
 0xfa1   :  { %4360 = vmatmul.mubr.f32.vlgmr.msra.gmra.mxu0 %v4293_v46  ;;  %4431 = vmatmul.mubr.f32.vlgmr.msra.gmra.mxu1 %v4293_v46  ;;  %v4696_v46 = vld [vmem:[%s8084_s7 + $0x40] sm:$0xff] }
 0xfa2   :  { %4493 = vmatpush1.msra.mxu0 %v7574_v54  ;;  %4564 = vmatpush1.msra.mxu1 %v7577_v56  ;;  %v8715_v54 = vld [vmem:[#allocation40_spill] sm:$0xff]  ;;  %v8716_v56 = vld [vmem:[#allocation38_spill] sm:$0xff] }
 0xfa3   :  { %4494 = vmatprep.subr.mxu0 %v7580_v16  ;;  %4565 = vmatprep.subr.mxu1 %v7583_v47  ;;  %v8717_v16 = vld [vmem:[#allocation46_spill] sm:$0xff]  ;;  %v8718_v47 = vld [vmem:[#allocation47_spill] sm:$0xff] }
 0xfa4   :  { %4495 = vmatpush1.msra.mxu0 %v7586_v34  ;;  %4566 = vmatpush1.msra.mxu1 %v7589_v5  ;;  %v8719_v34 = vld [vmem:[#allocation48_spill] sm:$0xff] }
 0xfa5   :  { %4496 = vmatprep.subr.mxu0 %v7592_v8  ;;  %4567 = vmatprep.subr.mxu1 %v7595_v1  ;;  %v8720_v5 = vld [vmem:[#allocation28_spill] sm:$0xff]  ;;  %v8722_v1 = vld [vmem:[#allocation17_spill] sm:$0xff] }
 0xfa6   :  { %4497 = vmatpush1.msra.mxu0 %v7598_v6  ;;  %4568 = vmatpush1.msra.mxu1 %v7601_v10  ;;  %v8721_v8 = vld [vmem:[#allocation20_spill] sm:$0xff]  ;;  %v8723_v6 = vld [vmem:[#allocation22_spill] sm:$0xff] }
 0xfa7   :  { %4498 = vmatprep.subr.mxu0 %v7604_v41  ;;  %4569 = vmatprep.subr.mxu1 %v7607_v19  ;;  %v8724_v10 = vld [vmem:[#allocation50_spill] sm:$0xff]  ;;  %v8725_v41 = vld [vmem:[#allocation23_spill] sm:$0xff]  ;;  %v8726_v19 = vld [vmem:[#allocation24_spill] sm:$0xff] }
 0xfa8   :  { %4499 = vmatpush1.msra.mxu0 %v7610_v42  ;;  %4570 = vmatpush1.msra.mxu1 %v7613_v30  ;;  %v8727_v42 = vld [vmem:[#allocation49_spill] sm:$0xff]  ;;  %v8728_v30 = vld [vmem:[#allocation26_spill] sm:$0xff] }
 0xfa9   :  { %4500 = vmatprep.subr.mxu0 %v7616_v14  ;;  %4571 = vmatprep.subr.mxu1 %v7619_v48  ;;  %v8729_v14 = vld [vmem:[#allocation25_spill] sm:$0xff] }
 0xfaa   :  { %4501 = vmatpush1.msra.mxu0 %v7622_v50  ;;  %4572 = vmatpush1.msra.mxu1 %v7625_v3  ;;  %v8730_v48 = vld [vmem:[#allocation21_spill] sm:$0xff]  ;;  %v8731_v50 = vld [vmem:[#allocation18_spill] sm:$0xff]  ;;  %v8732_v3 = vld [vmem:[#allocation19_spill] sm:$0xff] }
 0xfab   :  { %4502 = vmatprep.subr.mxu0 %v7628_v31  ;;  %4573 = vmatprep.subr.mxu1 %v7631_v57  ;;  %v8733_v31 = vld [vmem:[#allocation29_spill] sm:$0xff]  ;;  %v8734_v57 = vmov 0.0  }
 0xfac   :  { %4503 = vmatpush1.msra.mxu0 %v7634_v15  ;;  %4574 = vmatpush1.msra.mxu1 %v7637_v28  ;;  %v8735_v15 = vld [vmem:[#allocation30_spill] sm:$0xff] }
 0xfad   :  { %4504 = vmatprep.subr.mxu0 %v7640_v26  ;;  %4575 = vmatprep.subr.mxu1 %v7643_v32 }
 0xfae   :  { %4505 = vmatpush1.msra.mxu0 %v7646_v55  ;;  %4576 = vmatpush1.msra.mxu1 %v7649_v43 }
 0xfaf   :  { %4506 = vmatprep.subr.mxu0 %v7652_v40  ;;  %4577 = vmatprep.subr.mxu1 %v7655_v59 }
 0xfb0   :  { %4507 = vmatpush1.msra.mxu0 %v7658_v7  ;;  %4578 = vmatpush1.msra.mxu1 %v7661_v58 }
 0xfb1   :  { %4508 = vmatprep.subr.mxu0 %v7664_v37  ;;  %4579 = vmatprep.subr.mxu1 %v8665_v17  ;;  %v8736_v37 = vld [vmem:[#allocation43_spill] sm:$0xff] }
 0xfb2   :  { %4509 = vmatpush1.msra.mxu0 %v8666_v20  ;;  %4580 = vmatpush1.msra.mxu1 %v8667_v35 }
 0xfb3   :  { %4510 = vmatprep.subr.mxu0 %v7676_v45  ;;  %4581 = vmatprep.subr.mxu1 %v7679_v29 }
 0xfb4   :  { %4511 = vmatpush1.msra.mxu0 %v7682_v63  ;;  %4582 = vmatpush1.msra.mxu1 %v7685_v12  ;;  %v8737_v12 = vld [vmem:[#allocation51_spill] sm:$0xff] }
 0xfb5   :  { %4512 = vmatprep.subr.mxu0 %v7688_v18  ;;  %4583 = vmatprep.subr.mxu1 %v7691_v2  ;;  %v8738_v18 = vcombine.low %v8736_v37, %v8737_v12 }
 0xfb6   :  { %4513 = vmatpush1.msra.mxu0 %v7773_v27  ;;  %4584 = vmatpush1.msra.mxu1 %v7776_v0 }
 0xfb7   :  { %4514 = vmatprep.subr.mxu0 %v8715_v54  ;;  %4585 = vmatprep.subr.mxu1 %v8716_v56  ;;  %v4695_v54 = vld [vmem:[%s8084_s7 + $0x38] sm:$0xff]  ;;  %v4694_v56 = vld [vmem:[%s8084_s7 + $0x30] sm:$0xff] }
 0xfb8   :  { %4515 = vmatpush1.msra.mxu0 %v8717_v16  ;;  %4586 = vmatpush1.msra.mxu1 %v8718_v47  ;;  %v4693_v16 = vld [vmem:[%s8084_s7 + $0x28] sm:$0xff]  ;;  %v4692_v47 = vld [vmem:[%s8084_s7 + $0x20] sm:$0xff] }
 0xfb9   :  { %4516 = vmatprep.subr.mxu0 %v8719_v34  ;;  %4587 = vmatprep.subr.mxu1 %v8720_v5  ;;  %v4691_v34 = vld [vmem:[%s8084_s7 + $0x18] sm:$0xff]  ;;  %v4690_v5 = vld [vmem:[%s8084_s7 + $0x10] sm:$0xff] }
 0xfba   :  { %4517 = vmatpush1.msra.mxu0 %v8721_v8  ;;  %4588 = vmatpush1.msra.mxu1 %v8722_v1  ;;  %v4689_v8 = vld [vmem:[%s8084_s7 + $0x8] sm:$0xff]  ;;  %v4688_v1 = vld [vmem:[%s8084_s7] sm:$0xff] }
 0xfbb   :  { %4518 = vmatprep.subr.mxu0 %v8723_v6  ;;  %4589 = vmatprep.subr.mxu1 %v8724_v10 }
 0xfbc   :  { %4519 = vmatpush1.msra.mxu0 %v8725_v41  ;;  %4590 = vmatpush1.msra.mxu1 %v8726_v19 }
 0xfbd   :  { %4520 = vmatprep.subr.mxu0 %v8727_v42  ;;  %4591 = vmatprep.subr.mxu1 %v8728_v30 }
 0xfbe   :  { %4521 = vmatpush1.msra.mxu0 %v8729_v14  ;;  %4592 = vmatpush1.msra.mxu1 %v8730_v48 }
 0xfbf   :  { %4522 = vmatprep.subr.mxu0 %v8731_v50  ;;  %4593 = vmatprep.subr.mxu1 %v8732_v3  ;;  %v8739_v3 = vcombine.high %v8736_v37, %v8737_v12 }
 0xfc0   :  { %4523 = vmatpush1.msra.mxu0 %v8733_v31  ;;  %4556 = vmatprep.mubr.f32.mxu0 %v8734_v57 }
 0xfc1   :  { %4594 = vmatpush1.msra.mxu1 %v8735_v15  ;;  %4627 = vmatprep.mubr.f32.mxu1 %v8734_v57 }
 0xfc2   :  { %4865 = vmatprep.subr.mxu0 %v8734_v57 }
0x1061   :  { %v4361_v28 = vpop.f32.mrf.mxu0  ;;  %v4432_v26 = vpop.f32.mrf.mxu1 }
0x1063   :  { %v4363_v32 = vpop.f32.mrf.mxu0  ;;  %v4434_v55 = vpop.f32.mrf.mxu1 }
0x1064   :  { %v4441_v43 = vcombine.low %v4361_v28, %v4363_v32  ;;  %v4442_v40 = vcombine.low %v4432_v26, %v4434_v55 }
0x1066   :  { %v4449_v59 = vrot.slane %v4441_v43, %v6451_v23  ;;  %v4456_v7 = vrot.slane %v4442_v40, %v6451_v23 }
0x1068   :  { %v4457_v58 = vcombine.low %v4449_v59, %v4456_v7 }
0x106a   :  { %v4459_v2 = vadd.f32 %v4457_v58, %v8738_v18 }
0x106c   :  { %v4841_v45 = vmul.f32 -1.442695, %v4459_v2  ;;  %v4467_v29 = vrot.slane %v4459_v2, 2  ;;  %v4478_v17 = vrot.slane %v4459_v2, 6  ;;  %v4475_v27 = vrot.slane %v4459_v2, 4 }
0x106e   :  { %5414 = vpow2.f32 %v4841_v45  ;;  %v4842_v63 = vmul.f32 -1.442695, %v4467_v29  ;;  %v4843_v20 = vmul.f32 -1.442695, %v4478_v17 }
0x1070   :  { %5416 = vpow2.f32 %v4842_v63 }
0x1071   :  { %5418 = vpow2.f32 %v4843_v20 }
0x107b   :  { %v5415_v35 = vpop.eup %5414 }
0x107c   :  { %v4463_v0 = vadd.f32 1.0, %v5415_v35  ;;  %v4847_v35 = vld [vmem:[%s8085_s8] ss:$0 sm:$0xff] }
0x107d   :  { %v5417_v61 = vpop.eup %5416 }
0x107e   :  { %5420 = vrcp.f32 %v4463_v0  ;;  %v4472_v44 = vadd.f32 1.0, %v5417_v61  ;;  %v5419_v49 = vpop.eup %5418 }
0x107f   :  { %5422 = vtanh.f32 %v4475_v27  ;;  %v4483_v51 = vadd.f32 1.0, %v5419_v49 }
0x1080   :  { %5424 = vrcp.f32 %v4472_v44 }
0x1081   :  { %5426 = vrcp.f32 %v4483_v51 }
0x108b   :  { %v5421_v9 = vpop.eup %5420 }
0x108c   :  { %v5423_v22 = vpop.eup %5422 }
0x108d   :  { %v5425_v39 = vpop.eup %5424  ;;  %v4487_v25 = vmul.f32 %v5423_v22, %v5421_v9 }
0x108e   :  { %v4486_v24 = vmul.f32 %v5425_v39, %v7924_v53  ;;  %v5427_v33 = vpop.eup %5426  ;;  %v4699_v53 = vld [vmem:[%s8084_s7 + $0x58] sm:$0xff] }
0x1090   :  { %v7998_v38 = vadd.f32 %v4487_v25, %v4486_v24 }
0x1092   :  { %5428 = vtanh.f32 %v7998_v38 }
0x109f   :  { %v5429_v4 = vpop.eup %5428 }
0x10a0   :  { %v4490_v21 = vmul.f32 %v5429_v4, %v5427_v33 }
0x10a2   :  { %4557 = vmatmul.mubr.f32.vlgmr.msra.gmra.mxu0 %v4490_v21  ;;  %4628 = vmatmul.mubr.f32.vlgmr.msra.gmra.mxu1 %v4490_v21 }
0x10a3   :  { %4866 = vmatpush3.msra.mxu0 %v4703_v36  ;;  %4897 = vmatprep.mubr.msk.f32.mxu0 %vm5693_vm4, %v8734_v57 }
0x10a4   :  { %4867 = vmatprep.subr.mxu0 %v8734_v57 }
0x10a5   :  { %4868 = vmatpush3.msra.mxu0 %v4702_v60 }
0x10a6   :  { %4869 = vmatprep.subr.mxu0 %v8734_v57 }
0x10a7   :  { %4870 = vmatpush3.msra.mxu0 %v4701_v11 }
0x10a8   :  { %4871 = vmatprep.subr.mxu0 %v8734_v57 }
0x10a9   :  { %4872 = vmatpush3.msra.mxu0 %v4700_v13 }
0x10aa   :  { %4873 = vmatprep.subr.mxu0 %v8734_v57 }
0x10ab   :  { %4874 = vmatpush3.msra.mxu0 %v4699_v53 }
0x10ac   :  { %4875 = vmatprep.subr.mxu0 %v8734_v57 }
0x10ad   :  { %4876 = vmatpush3.msra.mxu0 %v4698_v52 }
0x10ae   :  { %4877 = vmatprep.subr.mxu0 %v8734_v57 }
0x10af   :  { %4878 = vmatpush3.msra.mxu0 %v4697_v62 }
0x10b0   :  { %4879 = vmatprep.subr.mxu0 %v8734_v57 }
0x10b1   :  { %4880 = vmatpush3.msra.mxu0 %v4696_v46 }
0x10b2   :  { %4881 = vmatprep.subr.mxu0 %v8734_v57 }
0x10b3   :  { %4882 = vmatpush3.msra.mxu0 %v4695_v54 }
0x10b4   :  { %4883 = vmatprep.subr.mxu0 %v8734_v57 }
0x10b5   :  { %4884 = vmatpush3.msra.mxu0 %v4694_v56 }
0x10b6   :  { %4885 = vmatprep.subr.mxu0 %v8734_v57 }
0x10b7   :  { %4886 = vmatpush3.msra.mxu0 %v4693_v16 }
0x10b8   :  { %4887 = vmatprep.subr.mxu0 %v8734_v57 }
0x10b9   :  { %4888 = vmatpush3.msra.mxu0 %v4692_v47 }
0x10ba   :  { %4889 = vmatprep.subr.mxu0 %v8734_v57 }
0x10bb   :  { %4890 = vmatpush3.msra.mxu0 %v4691_v34 }
0x10bc   :  { %4891 = vmatprep.subr.mxu0 %v8734_v57 }
0x10bd   :  { %4892 = vmatpush3.msra.mxu0 %v4690_v5 }
0x10be   :  { %4893 = vmatprep.subr.mxu0 %v8734_v57 }
0x10bf   :  { %4894 = vmatpush3.msra.mxu0 %v4689_v8 }
0x10c0   :  { %4895 = vmatprep.subr.mxu0 %v8734_v57 }
0x10c1   :  { %4896 = vmatpush3.msra.mxu0 %v4688_v1 }
0x1162   :  { %v4558_v6 = vpop.f32.mrf.mxu0  ;;  %v4629_v10 = vpop.f32.mrf.mxu1 }
0x1164   :  { %v4560_v41 = vpop.f32.mrf.mxu0  ;;  %v4631_v19 = vpop.f32.mrf.mxu1 }
0x1165   :  { %v4638_v42 = vcombine.low %v4558_v6, %v4560_v41  ;;  %v4639_v30 = vcombine.low %v4629_v10, %v4631_v19 }
0x1167   :  { %v4646_v14 = vrot.slane %v4638_v42, %v6451_v23  ;;  %v4653_v48 = vrot.slane %v4639_v30, %v6451_v23 }
0x1169   :  { %v4654_v50 = vcombine.low %v4646_v14, %v4653_v48 }
0x116b   :  { %v4656_v31 = vadd.f32 %v4654_v50, %v8739_v3 }
0x116d   :  { %v4844_v15 = vmul.f32 -1.442695, %v4656_v31  ;;  %v4664_v28 = vrot.slane %v4656_v31, 2  ;;  %v4675_v26 = vrot.slane %v4656_v31, 6  ;;  %v4672_v43 = vrot.slane %v4656_v31, 4 }
0x116f   :  { %5430 = vpow2.f32 %v4844_v15  ;;  %v4845_v57 = vmul.f32 -1.442695, %v4664_v28  ;;  %v4846_v32 = vmul.f32 -1.442695, %v4675_v26 }
0x1171   :  { %5432 = vpow2.f32 %v4845_v57 }
0x1172   :  { %5434 = vpow2.f32 %v4846_v32 }
0x117c   :  { %v5431_v55 = vpop.eup %5430 }
0x117d   :  { %v4660_v40 = vadd.f32 1.0, %v5431_v55 }
0x117e   :  { %v5433_v59 = vpop.eup %5432 }
0x117f   :  { %5436 = vrcp.f32 %v4660_v40  ;;  %v4669_v7 = vadd.f32 1.0, %v5433_v59  ;;  %v5435_v23 = vpop.eup %5434 }
0x1180   :  { %5438 = vtanh.f32 %v4672_v43  ;;  %v4680_v18 = vadd.f32 1.0, %v5435_v23 }
0x1181   :  { %5440 = vrcp.f32 %v4669_v7 }
0x1182   :  { %5442 = vrcp.f32 %v4680_v18 }
0x118c   :  { %v5437_v58 = vpop.eup %5436 }
0x118d   :  { %v5439_v37 = vpop.eup %5438 }
0x118e   :  { %v5441_v12 = vpop.eup %5440  ;;  %v4684_v45 = vmul.f32 %v5439_v37, %v5437_v58 }
0x118f   :  { %v4683_v2 = vmul.f32 %v5441_v12, %v7998_v38  ;;  %v5443_v63 = vpop.eup %5442 }
0x1191   :  { %v4685_v29 = vadd.f32 %v4684_v45, %v4683_v2 }
0x1193   :  { %5444 = vtanh.f32 %v4685_v29 }
0x11a0   :  { %v5445_v17 = vpop.eup %5444 }
0x11a1   :  { %v4687_v20 = vmul.f32 %v5445_v17, %v5443_v63 }
0x11a3   :  { %4898 = vmatmul.mubr.f32.vlgmr.msra.gmra.mxu0 %v4687_v20 }
0x1263   :  { %v4777_v27 = vpop.f32.mrf.mxu0 }
0x1264   :  { %v4778_v0 = vadd.f32 %v4847_v35, %v4777_v27 }
0x1265   :  { %v4899_v61 = vpop.f32.mrf.mxu0 }
0x1266   :  { %4781 = vst [vmem:[#allocation12] sm:$0x3] %v4778_v0 }
0x1267   :  { %5665 = shalt.err (!%p5662_p10)
}
0x1268   :  { %4791 = dma.vmem_to_hbm [thread:$0]  %s4789_s30, 32, %s8086_s9, [#allocation6]  }
0x1269   :  { %5680 = dma.done.wait [#allocation6], 32  }
0x126a   :  { %5681 = vsyncadd [#allocation6], 4294967264 }
0x126b   :  { %4795 = vsyncpa [#allocation5], 1 }
0x126c   :  { %4796 = vsyncpa [#allocation8], 1 }
0x126d   :  { %4797 = vsyncpa [#allocation11], 1 }
0x126e   :  { %4798 = vsyncpa [#allocation6], 1 }

</bundles_post_ra>
